<compile_context>
chip_gen: v7x
topology: tpu7x:2x2x1
jax: 0.10.0
libtpu: 0.0.40
codegen_flags: <defaults>
</compile_context>

<pallas_src>
import math
from types import SimpleNamespace

import numpy as np

import jax
import jax.numpy as jnp
from jax import lax
from jax.experimental import pallas as pl
from jax.experimental.pallas import tpu as pltpu


NEG_INF = -1e30      # finite stand-in for -inf: keeps padded rows NaN-free
DPAD = 8             # coordinate feature dim padded 2 -> 8 (sublane aligned, MXU K)


# ----------------------------------------------------------------------------
# epsilon-annealing schedule (mirrors geomloss.epsilon_schedule).
# diameter uses the sqrt(2) upper bound for coords normalised to [0, 1]^2.
# ----------------------------------------------------------------------------
def epsilon_schedule(p, diameter, blur, scaling):
    eps_list = [diameter ** p]
    e = p * math.log(diameter)
    target = p * math.log(blur)
    step = p * math.log(scaling)  # negative
    while e > target:
        eps_list.append(math.exp(e))
        e += step
    eps_list.append(blur ** p)
    return [float(v) for v in eps_list]


# ----------------------------------------------------------------------------
# Per-generation knobs (bf16 EUP, megacore semantics, VMEM budget).
# ----------------------------------------------------------------------------
def _device_kind():
    try:
        return jax.devices()[0].device_kind.lower()
    except Exception:
        return ""


def _use_bf16_exp():
    k = _device_kind()
    # bf16 VPU/EUP exists on v6e / v7x only; keep f32 elsewhere (v4/v5e/v5p/CPU).
    return ("v6" in k) or ("v7" in k) or ("tpu7" in k)


def _batch_semantics():
    k = _device_kind()
    if ("v7" in k) or ("tpu7" in k):
        return (pltpu.CORE_PARALLEL,)      # 2 TCs/chip: split the batch axis
    return ("parallel",)


def _vmem_limit_bytes():
    try:
        cap = int(pltpu.get_tpu_info().vmem_capacity_bytes)
    except Exception:
        cap = 64 * 1024 * 1024
    # ~56 MiB on v7x (64 MiB physical), capped at 100 MiB on v5e/v6e (128 MiB).
    return int(min(int(cap * 0.875), 100 * 1024 * 1024))


# ----------------------------------------------------------------------------
# Fused kernel: cost matrix + Sinkhorn potentials + transport plan + reductions
# for ONE image (one grid step); grid iterates over the batch.
#
# Transposed layout:  C, PI          : (max_m, n_grid)
#                     a, loga, f, F  : (1, n_grid)      (lane-dense)
#                     bmask, logb, g : (max_m, 1)
# ----------------------------------------------------------------------------
def make_gloss_kernel(scale, eps_list, blur, p, scaling,
                      d_point, d_pixel, n_grid, max_m, use_bf16_exp):
    eps_pi = float(blur) ** p
    inv_eps_pi = 1.0 / eps_pi
    inv_scale = 1.0 / scale
    n_iters = len(eps_list)                     # >= 2 always
    eps0 = float(eps_list[0])
    eps1 = float(eps_list[1])
    eps_bl = float(eps_list[-1])                # == blur ** p
    ratio = float(scaling) ** p                 # geometric eps decay (middle iters)
    exp_dt = jnp.bfloat16 if use_bf16_exp else jnp.float32

    def kernel(m_ref, xT_ref, y_ref, a_ref, bm_ref, out_ref, f_sc, g_sc):
        b_idx = pl.program_id(0)
        m_real = m_ref[b_idx].astype(jnp.float32)      # real point count (>= 1)

        xT = xT_ref[...]                               # (8, N)  grid coords (rows 2..7 zero)
        y = y_ref[...]                                 # (M, 8)  GT coords (cols 2..7, pad rows zero)
        a = a_ref[...]                                 # (1, N)  predicted density (lane-dense)
        bm = bm_ref[...]                               # (M, 1)  1.0 real / 0.0 padded

        ones_1m = jnp.ones((1, max_m), jnp.float32)    # MXU sublane-sum vector
        ones_n1 = jnp.ones((n_grid, 1), jnp.float32)   # MXU lane-sum vector

        # ---- exp_cost via the MXU (K = 8) ----------------------------------
        yx = jnp.dot(y, xT, preferred_element_type=jnp.float32)          # (M, N)
        y2 = jnp.sum(y * y, axis=1, keepdims=True)                       # (M, 1)
        x2 = jnp.sum(xT * xT, axis=0, keepdims=True)                     # (1, N)
        dist = jnp.sqrt(jnp.maximum(y2 + x2 - 2.0 * yx, 0.0))            # (M, N)
        C = jnp.exp(dist * inv_scale) - 1.0                              # (M, N)

        loga = jnp.log(jnp.maximum(a, 1e-20))                            # (1, N)
        logb = jnp.where(bm > 0.0, 0.0, NEG_INF)                         # (M, 1)

        # softmins: max-shift in f32, exp in exp_dt (bf16 on v6e/v7x),
        # sum on the MXU with f32 accumulation.
        def softmin_over_points(arg):          # reduce sublane axis M -> (1, N)
            ms = jnp.max(arg, axis=0, keepdims=True)                     # (1, N)
            e = jnp.exp((arg - ms).astype(exp_dt))                       # (M, N)
            s = jnp.dot(ones_1m.astype(e.dtype), e,
                        preferred_element_type=jnp.float32)              # (1, N)
            return ms + jnp.log(s)

        def softmin_over_grid(arg):            # reduce lane axis N -> (M, 1)
            ms = jnp.max(arg, axis=1, keepdims=True)                     # (M, 1)
            e = jnp.exp((arg - ms).astype(exp_dt))                       # (M, N)
            s = jnp.dot(e, ones_n1.astype(e.dtype),
                        preferred_element_type=jnp.float32)              # (M, 1)
            return ms + jnp.log(s)

        # ---- Sinkhorn with epsilon scaling (debias=False, sym-averaged) ----
        inv_e0 = 1.0 / eps0
        f_sc[...] = -eps0 * softmin_over_points(logb - C * inv_e0)       # (1, N)
        g_sc[...] = -eps0 * softmin_over_grid(loga - C * inv_e0)         # (M, 1)
        # NOTE: padded rows of g / G hold finite garbage; every consumer below
        # gates them with logb / bm.  Do not use g/G unmasked.

        def sink_body(it, eps):
            inv_eps = 1.0 / eps
            f = f_sc[...]
            g = g_sc[...]
            ft = -eps * softmin_over_points(logb + (g - C) * inv_eps)
            gt = -eps * softmin_over_grid(loga + (f - C) * inv_eps)
            f_sc[...] = 0.5 * (f + ft)
            g_sc[...] = 0.5 * (g + gt)
            return eps * ratio                      # geometric eps schedule

        # middle iterations (eps_list[1 .. n_iters-2] are exactly geometric)
        lax.fori_loop(1, n_iters - 1, sink_body,
                      jnp.asarray(eps1, dtype=jnp.float32))

        # last averaged iteration at eps = blur**p, then one extrapolation step
        inv_bl = 1.0 / eps_bl
        f = f_sc[...]
        g = g_sc[...]
        ft = -eps_bl * softmin_over_points(logb + (g - C) * inv_bl)
        gt = -eps_bl * softmin_over_grid(loga + (f - C) * inv_bl)
        f = 0.5 * (f + ft)
        g = 0.5 * (g + gt)
        F = -eps_bl * softmin_over_points(logb + (g - C) * inv_bl)       # (1, N)
        G = -eps_bl * softmin_over_grid(loga + (f - C) * inv_bl)         # (M, 1)

        # OT_eps value: <a, F> + <b, G>  (padded rows of G killed by bm)
        loss = (jnp.dot(a * F, ones_n1, preferred_element_type=jnp.float32)
                + jnp.dot(ones_1m, bm * G, preferred_element_type=jnp.float32))  # (1,1)

        # ---- transport plan + analytic entropy ------------------------------
        # log PI already includes logb (padded rows -> -1e30 -> PI exactly 0) and
        # loga; the reference's 1e-20 regularizer only matters where PI ~ 0,
        # where the entropy term is ~1e-20*log(1e-20) ~ 0.
        logPI = (F + G - C) * inv_eps_pi + logb + loga                   # (M, N) f32
        PI = jnp.exp(logPI.astype(exp_dt))                               # (M, N)
        ent_mat = PI * logPI * bm                                        # f32 (promote)
        ent_cols = jnp.dot(ones_1m, ent_mat, preferred_element_type=jnp.float32)  # (1, N)
        ent_sum = jnp.dot(ent_cols, ones_n1, preferred_element_type=jnp.float32)  # (1, 1)
        ent = ent_sum / (float(n_grid) * m_real)     # mean over N * M_real

        # per-point / per-pixel marginals on the MXU
        colT = jnp.dot(PI, ones_n1.astype(PI.dtype),
                       preferred_element_type=jnp.float32)               # (M, 1) = PI.sum(grid)
        row = jnp.dot(ones_1m.astype(PI.dtype), PI,
                      preferred_element_type=jnp.float32)                # (1, N) = PI.sum(points)

        if d_point == 'l1':
            pt_err = jnp.abs(colT - bm)          # padded rows: |0 - 0| = 0
        else:
            pt_err = (colT - bm) ** 2
        ptl = jnp.dot(ones_1m, pt_err, preferred_element_type=jnp.float32)        # (1, 1)

        if d_pixel == 'l1':
            px_err = jnp.abs(row - a)
        else:
            px_err = (row - a) ** 2
        pxl = jnp.dot(px_err, ones_n1, preferred_element_type=jnp.float32)        # (1, 1)

        # lane-dense scalar pack: [loss, entropy, point_loss, pixel_loss, 0...]
        lane = jax.lax.broadcasted_iota(jnp.int32, (1, 128), 1)
        out_ref[...] = (jnp.where(lane == 0, loss, 0.0)
                        + jnp.where(lane == 1, ent, 0.0)
                        + jnp.where(lane == 2, ptl, 0.0)
                        + jnp.where(lane == 3, pxl, 0.0))

    return kernel


# ----------------------------------------------------------------------------
# Batched pallas_call + jitted reduction over the batch.
# ----------------------------------------------------------------------------
_FN_CACHE = {}


def _make_gloss_batched_fn(cfg, n_grid, max_m, n_img):
    eps_list = epsilon_schedule(cfg.p, math.sqrt(2.0), cfg.blur, cfg.scaling)
    use_bf16 = _use_bf16_exp()
    kernel = make_gloss_kernel(cfg.scale, eps_list, cfg.blur, cfg.p, cfg.scaling,
                               cfg.d_point, cfg.d_pixel, n_grid, max_m, use_bf16)

    grid_spec = pltpu.PrefetchScalarGridSpec(
        num_scalar_prefetch=1,                                       # m_real -> SMEM
        grid=(n_img,),
        in_specs=[
            pl.BlockSpec((DPAD, n_grid), lambda b, m: (0, 0)),            # xT (shared)
            pl.BlockSpec((None, max_m, DPAD), lambda b, m: (b, 0, 0)),    # y
            pl.BlockSpec((None, 1, n_grid), lambda b, m: (b, 0, 0)),      # a (lane-dense)
            pl.BlockSpec((None, max_m, 1), lambda b, m: (b, 0, 0)),       # bmask
        ],
        out_specs=pl.BlockSpec((None, 1, 128), lambda b, m: (b, 0, 0)),
        scratch_shapes=[pltpu.VMEM((1, n_grid), jnp.float32),             # f
                        pltpu.VMEM((max_m, 1), jnp.float32)],             # g
    )
    call = pl.pallas_call(
        kernel,
        out_shape=jax.ShapeDtypeStruct((n_img, 1, 128), jnp.float32),
        grid_spec=grid_spec,
        compiler_params=pltpu.CompilerParams(
            dimension_semantics=_batch_semantics(),
            vmem_limit_bytes=_vmem_limit_bytes(),
        ),
    )

    @jax.jit
    def run(m_real, xT, y, a, bmask, valid):
        out = call(m_real, xT, y, a, bmask)             # (n_img, 1, 128)
        out = jnp.where(valid[:, None, None], out, 0.0)  # drop dummy slots
        emd = jnp.sum(out[:, 0, 0])
        ent = jnp.sum(out[:, 0, 1])
        ptl = jnp.sum(out[:, 0, 2])
        pxl = jnp.sum(out[:, 0, 3])
        return emd, ent, ptl, pxl

    return run


def _get_gloss_fn(cfg, n_grid, max_m, n_img):
    key = (n_grid, max_m, n_img, cfg.scale, cfg.blur, cfg.scaling, cfg.p,
           cfg.d_point, cfg.d_pixel)
    fn = _FN_CACHE.get(key)
    if fn is None:
        fn = _make_gloss_batched_fn(cfg, n_grid, max_m, n_img)
        _FN_CACHE[key] = fn
    return fn


# ----------------------------------------------------------------------------
# Plain-JAX / numpy glue reproducing GLoss.forward bookkeeping.
# ----------------------------------------------------------------------------
def _bucket_points(m_real):
    """Pad GT point count to a power-of-two multiple of 128 (lane-dense buckets)."""
    blocks = (max(int(m_real), 1) + 127) // 128
    p2 = 1
    while p2 < blocks:
        p2 *= 2
    return 128 * p2


def make_coord_grid_T(H, W, downsample_ratio, crop_size):
    """(DPAD, H*W) transposed grid coords, normalised to [0,1], rows 2..7 zero."""
    coodx = np.arange(0, W, dtype=np.float32) + 0.5
    coody = np.arange(0, H, dtype=np.float32) + 0.5
    yy, xx = np.meshgrid(coody, coodx, indexing='ij')
    g = np.stack((xx, yy), axis=2).reshape(-1, 2)                       # (N, 2) = (x, y)
    g = (g * downsample_ratio + downsample_ratio / 2.0) / float(crop_size)
    xT = np.zeros((DPAD, g.shape[0]), np.float32)
    xT[:2, :] = g.T
    return xT


def gloss_forward(cfg, outputs, points):
    predict_map = outputs['density_map']                 # (B, 1, H, W)  NCHW
    B, _, H, W = predict_map.shape
    shape0 = 1.0                                          # shape[0] == 1 in reference
    n_grid = H * W

    xT = jnp.asarray(make_coord_grid_T(H, W, cfg.downsample_ratio, cfg.crop_size))

    emd_loss = 0.0
    point_loss = 0.0
    pixel_loss = 0.0
    entropy = 0.0

    with_pts = []
    for i in range(B):
        if int(points[i].shape[0]) < 1:
            d = jnp.abs(0.0 - predict_map[i].sum()) / shape0
            point_loss += d
            pixel_loss += d
            emd_loss += d
        else:
            with_pts.append(i)

    if with_pts:
        n_real = len(with_pts)
        max_m_real = max(int(points[i].shape[0]) for i in with_pts)
        max_m = _bucket_points(max_m_real)
        n_img = n_real + (n_real & 1)          # even batch (v7x core split)

        # numpy host-side padding (no per-image jnp .at[].set chains)
        y_np = np.zeros((n_img, max_m, DPAD), np.float32)
        bm_np = np.zeros((n_img, max_m, 1), np.float32)
        m_np = np.ones((n_img,), np.int32)
        valid_np = np.zeros((n_img,), np.bool_)
        a_rows = []
        for slot, i in enumerate(with_pts):
            p = np.asarray(points[i], np.float32).reshape(-1, 2) / float(cfg.crop_size)
            m = p.shape[0]
            y_np[slot, :m, :2] = p
            bm_np[slot, :m, 0] = 1.0
            m_np[slot] = m
            valid_np[slot] = True
            a_rows.append(predict_map[i].reshape(1, n_grid).astype(jnp.float32))
        for slot in range(n_real, n_img):       # dummy slots: replicate image 0;
            y_np[slot] = y_np[0]                # their outputs are dropped via `valid`
            bm_np[slot] = bm_np[0]
            m_np[slot] = m_np[0]
            a_rows.append(a_rows[0])
        a = jnp.stack(a_rows)                                   # (n_img, 1, N)

        fn = _get_gloss_fn(cfg, n_grid, max_m, n_img)
        emd, ent, ptl, pxl = fn(jnp.asarray(m_np), xT, jnp.asarray(y_np), a,
                                jnp.asarray(bm_np), jnp.asarray(valid_np))
        emd_loss += emd / shape0
        entropy += ent
        point_loss += ptl / shape0
        pixel_loss += pxl / shape0

    counting_loss = emd_loss + cfg.tau * (pixel_loss + point_loss) + cfg.blur * entropy
    return counting_loss, 0


if __name__ == "__main__":
    cfg = SimpleNamespace(cost='exp', blur=0.01, scaling=0.5, reach=None, p=1,
                          scale=0.6, crop_size=32, downsample_ratio=4, tau=0.1,
                          d_point='l1', d_pixel='l1')

    key = jax.random.PRNGKey(0)
    k1, k2, k3 = jax.random.split(key, 3)

    B = 2
    H = W = cfg.crop_size // cfg.downsample_ratio        # 8 -> N = 64 grid points
    predict_map = jax.random.uniform(k1, (B, 1, H, W), jnp.float32,
                                     minval=0.01, maxval=0.2)
    points = [
        jax.random.uniform(k2, (5, 2), jnp.float32, minval=0.0,
                           maxval=float(cfg.crop_size)),
        jax.random.uniform(k3, (7, 2), jnp.float32, minval=0.0,
                           maxval=float(cfg.crop_size)),
    ]

    counting_loss, _ = gloss_forward(cfg, {'density_map': predict_map}, points)
    counting_loss = jax.block_until_ready(counting_loss)
    assert bool(jnp.isfinite(counting_loss)), "non-finite loss"
    print("KERNEL_OK")
</pallas_src>

<mosaic_0001>
module attributes {stable_mosaic.version = 11 : i64} {
  func.func @kernel(%arg0: i32, %arg1: memref<2xi32, #tpu.memory_space<smem>>, %arg2: memref<8x64xf32, #tpu.memory_space<vmem>>, %arg3: memref<1x128x8xf32, #tpu.memory_space<vmem>>, %arg4: memref<1x1x64xf32, #tpu.memory_space<vmem>>, %arg5: memref<1x128x1xf32, #tpu.memory_space<vmem>>, %arg6: memref<1x1x128xf32, #tpu.memory_space<vmem>>, %arg7: memref<1x64xf32, #tpu.memory_space<vmem>>, %arg8: memref<128x1xf32, #tpu.memory_space<vmem>>) attributes {dimension_semantics = [#tpu.dimension_semantics<parallel>], iteration_bounds = array<i64: 2>, scalar_prefetch = 1 : i64, scratch_operands = 2 : i64, tpu.core_type = #tpu.core_type<tc>, window_params = [{pipeline_mode = #tpu.pipeline_mode<synchronous>, transform_indices = @transform_0, window_bounds = array<i64: 8, 64>}, {transform_indices = @transform_1, window_bounds = array<i64: 1, 128, 8>}, {transform_indices = @transform_2, window_bounds = array<i64: 1, 1, 64>}, {transform_indices = @transform_3, window_bounds = array<i64: 1, 128, 1>}, {transform_indices = @transform_4, window_bounds = array<i64: 1, 1, 128>}]} {
    %0 = arith.index_cast %arg0 : i32 to index
    %1 = memref.load %arg1[%0] : memref<2xi32, #tpu.memory_space<smem>>
    %2 = arith.sitofp %1 : i32 to f32
    %c0 = arith.constant 0 : index
    %c0_0 = arith.constant 0 : index
    %3 = vector.load %arg2[%c0, %c0_0] : memref<8x64xf32, #tpu.memory_space<vmem>>, vector<8x64xf32>
    %c0_1 = arith.constant 0 : index
    %c0_2 = arith.constant 0 : index
    %c0_3 = arith.constant 0 : index
    %4 = vector.load %arg3[%c0_1, %c0_2, %c0_3] : memref<1x128x8xf32, #tpu.memory_space<vmem>>, vector<1x128x8xf32>
    %5 = vector.shape_cast %4 : vector<1x128x8xf32> to vector<128x8xf32>
    %c0_4 = arith.constant 0 : index
    %c0_5 = arith.constant 0 : index
    %c0_6 = arith.constant 0 : index
    %6 = vector.load %arg4[%c0_4, %c0_5, %c0_6] : memref<1x1x64xf32, #tpu.memory_space<vmem>>, vector<1x1x64xf32>
    %7 = vector.shape_cast %6 : vector<1x1x64xf32> to vector<1x64xf32>
    %c0_7 = arith.constant 0 : index
    %c0_8 = arith.constant 0 : index
    %c0_9 = arith.constant 0 : index
    %8 = vector.load %arg5[%c0_7, %c0_8, %c0_9] : memref<1x128x1xf32, #tpu.memory_space<vmem>>, vector<1x128x1xf32>
    %9 = vector.shape_cast %8 : vector<1x128x1xf32> to vector<128x1xf32>
    %cst = arith.constant 1.000000e+00 : f32
    %10 = vector.broadcast %cst : f32 to vector<1x128xf32>
    %cst_10 = arith.constant 1.000000e+00 : f32
    %11 = vector.broadcast %cst_10 : f32 to vector<64x1xf32>
    %cst_11 = arith.constant dense<0.000000e+00> : vector<128x64xf32>
    %12 = tpu.matmul %5, %3, %cst_11 {dimension_numbers = #tpu.dot_dimension_numbers<[1], [0], [0], [1], [0, 0, 1, 1], [], []>} : vector<128x8xf32>, vector<8x64xf32>, vector<128x64xf32> -> vector<128x64xf32>
    %13 = arith.mulf %5, %5 : vector<128x8xf32>
    %cst_12 = arith.constant dense<0.000000e+00> : vector<128xf32>
    %14 = vector.multi_reduction <add>, %13, %cst_12 [1] : vector<128x8xf32> to vector<128xf32>
    %15 = vector.shape_cast %14 : vector<128xf32> to vector<128x1xf32>
    %16 = arith.mulf %3, %3 : vector<8x64xf32>
    %cst_13 = arith.constant dense<0.000000e+00> : vector<64xf32>
    %17 = vector.multi_reduction <add>, %16, %cst_13 [0] : vector<8x64xf32> to vector<64xf32>
    %18 = vector.shape_cast %17 : vector<64xf32> to vector<1x64xf32>
    %19 = vector.broadcast %15 : vector<128x1xf32> to vector<128x64xf32>
    %20 = vector.broadcast %18 : vector<1x64xf32> to vector<128x64xf32>
    %21 = arith.addf %19, %20 : vector<128x64xf32>
    %cst_14 = arith.constant 2.000000e+00 : f32
    %22 = vector.broadcast %cst_14 : f32 to vector<128x64xf32>
    %23 = arith.mulf %22, %12 : vector<128x64xf32>
    %24 = arith.subf %21, %23 : vector<128x64xf32>
    %cst_15 = arith.constant 0.000000e+00 : f32
    %25 = vector.broadcast %cst_15 : f32 to vector<128x64xf32>
    %26 = arith.maximumf %24, %25 : vector<128x64xf32>
    %27 = math.sqrt %26 : vector<128x64xf32>
    %cst_16 = arith.constant 1.66666663 : f32
    %28 = vector.broadcast %cst_16 : f32 to vector<128x64xf32>
    %29 = arith.mulf %27, %28 : vector<128x64xf32>
    %30 = math.exp %29 : vector<128x64xf32>
    %cst_17 = arith.constant 1.000000e+00 : f32
    %31 = vector.broadcast %cst_17 : f32 to vector<128x64xf32>
    %32 = arith.subf %30, %31 : vector<128x64xf32>
    %cst_18 = arith.constant 9.99999968E-21 : f32
    %33 = vector.broadcast %cst_18 : f32 to vector<1x64xf32>
    %34 = arith.maximumf %7, %33 : vector<1x64xf32>
    %35 = math.log %34 : vector<1x64xf32>
    %cst_19 = arith.constant 0.000000e+00 : f32
    %36 = vector.broadcast %cst_19 : f32 to vector<128x1xf32>
    %37 = arith.cmpf ogt, %9, %36 : vector<128x1xf32>
    %cst_20 = arith.constant 0.000000e+00 : f32
    %cst_21 = arith.constant -1.000000e+30 : f32
    %38 = vector.broadcast %cst_20 : f32 to vector<128x1xf32>
    %39 = vector.broadcast %cst_21 : f32 to vector<128x1xf32>
    %40 = arith.select %37, %38, %39 : vector<128x1xi1>, vector<128x1xf32>
    %cst_22 = arith.constant 0.707106769 : f32
    %41 = vector.broadcast %cst_22 : f32 to vector<128x64xf32>
    %42 = arith.mulf %32, %41 : vector<128x64xf32>
    %43 = vector.broadcast %40 : vector<128x1xf32> to vector<128x64xf32>
    %44 = arith.subf %43, %42 : vector<128x64xf32>
    %cst_23 = arith.constant dense<0xFF800000> : vector<64xf32>
    %45 = vector.multi_reduction <maximumf>, %44, %cst_23 [0] : vector<128x64xf32> to vector<64xf32>
    %46 = vector.shape_cast %45 : vector<64xf32> to vector<1x64xf32>
    %47 = vector.broadcast %46 : vector<1x64xf32> to vector<128x64xf32>
    %48 = arith.subf %44, %47 : vector<128x64xf32>
    %49 = math.exp %48 : vector<128x64xf32>
    %cst_24 = arith.constant dense<0.000000e+00> : vector<1x64xf32>
    %50 = tpu.matmul %10, %49, %cst_24 {dimension_numbers = #tpu.dot_dimension_numbers<[1], [0], [0], [1], [0, 0, 1, 1], [], []>} : vector<1x128xf32>, vector<128x64xf32>, vector<1x64xf32> -> vector<1x64xf32>
    %51 = math.log %50 : vector<1x64xf32>
    %52 = arith.addf %46, %51 : vector<1x64xf32>
    %cst_25 = arith.constant -1.41421354 : f32
    %53 = vector.broadcast %cst_25 : f32 to vector<1x64xf32>
    %54 = arith.mulf %53, %52 : vector<1x64xf32>
    %c0_26 = arith.constant 0 : index
    %c0_27 = arith.constant 0 : index
    %55 = vector.load %arg7[%c0_26, %c0_27] : memref<1x64xf32, #tpu.memory_space<vmem>>, vector<1x64xf32>
    tpu.vector_store %arg7[%c0_26, %c0_27], %54 {strides = array<i32>} : memref<1x64xf32, #tpu.memory_space<vmem>>, vector<1x64xf32>,
    %cst_28 = arith.constant 0.707106769 : f32
    %56 = vector.broadcast %cst_28 : f32 to vector<128x64xf32>
    %57 = arith.mulf %32, %56 : vector<128x64xf32>
    %58 = vector.broadcast %35 : vector<1x64xf32> to vector<128x64xf32>
    %59 = arith.subf %58, %57 : vector<128x64xf32>
    %cst_29 = arith.constant dense<0xFF800000> : vector<128xf32>
    %60 = vector.multi_reduction <maximumf>, %59, %cst_29 [1] : vector<128x64xf32> to vector<128xf32>
    %61 = vector.shape_cast %60 : vector<128xf32> to vector<128x1xf32>
    %62 = vector.broadcast %61 : vector<128x1xf32> to vector<128x64xf32>
    %63 = arith.subf %59, %62 : vector<128x64xf32>
    %64 = math.exp %63 : vector<128x64xf32>
    %cst_30 = arith.constant dense<0.000000e+00> : vector<128x1xf32>
    %65 = tpu.matmul %64, %11, %cst_30 {dimension_numbers = #tpu.dot_dimension_numbers<[1], [0], [0], [1], [0, 0, 1, 1], [], []>} : vector<128x64xf32>, vector<64x1xf32>, vector<128x1xf32> -> vector<128x1xf32>
    %66 = math.log %65 : vector<128x1xf32>
    %67 = arith.addf %61, %66 : vector<128x1xf32>
    %cst_31 = arith.constant -1.41421354 : f32
    %68 = vector.broadcast %cst_31 : f32 to vector<128x1xf32>
    %69 = arith.mulf %68, %67 : vector<128x1xf32>
    %c0_32 = arith.constant 0 : index
    %c0_33 = arith.constant 0 : index
    %70 = vector.load %arg8[%c0_32, %c0_33] : memref<128x1xf32, #tpu.memory_space<vmem>>, vector<128x1xf32>
    tpu.vector_store %arg8[%c0_32, %c0_33], %69 {strides = array<i32>} : memref<128x1xf32, #tpu.memory_space<vmem>>, vector<128x1xf32>,
    %cst_34 = arith.constant 1.41421354 : f32
    %c0_i32 = arith.constant 0 : i32
    %c8_i32 = arith.constant 8 : i32
    %71 = arith.addi %c0_i32, %c8_i32 : i32
    %c1_i32 = arith.constant 1 : i32
    %72 = scf.for %arg9 = %c0_i32 to %71 step %c1_i32 iter_args(%arg10 = %cst_34) -> (f32)  : i32 {
      %cst_76 = arith.constant 1.000000e+00 : f32
      %208 = arith.divf %cst_76, %arg10 : f32
      %c0_77 = arith.constant 0 : index
      %c0_78 = arith.constant 0 : index
      %209 = vector.load %arg7[%c0_77, %c0_78] : memref<1x64xf32, #tpu.memory_space<vmem>>, vector<1x64xf32>
      %c0_79 = arith.constant 0 : index
      %c0_80 = arith.constant 0 : index
      %210 = vector.load %arg8[%c0_79, %c0_80] : memref<128x1xf32, #tpu.memory_space<vmem>>, vector<128x1xf32>
      %cst_81 = arith.constant 0.000000e+00 : f32
      %211 = arith.subf %cst_81, %arg10 : f32
      %212 = vector.broadcast %210 : vector<128x1xf32> to vector<128x64xf32>
      %213 = arith.subf %212, %32 : vector<128x64xf32>
      %214 = vector.broadcast %208 : f32 to vector<128x64xf32>
      %215 = arith.mulf %213, %214 : vector<128x64xf32>
      %216 = vector.broadcast %40 : vector<128x1xf32> to vector<128x64xf32>
      %217 = arith.addf %216, %215 : vector<128x64xf32>
      %cst_82 = arith.constant dense<0xFF800000> : vector<64xf32>
      %218 = vector.multi_reduction <maximumf>, %217, %cst_82 [0] : vector<128x64xf32> to vector<64xf32>
      %219 = vector.shape_cast %218 : vector<64xf32> to vector<1x64xf32>
      %220 = vector.broadcast %219 : vector<1x64xf32> to vector<128x64xf32>
      %221 = arith.subf %217, %220 : vector<128x64xf32>
      %222 = math.exp %221 : vector<128x64xf32>
      %cst_83 = arith.constant dense<0.000000e+00> : vector<1x64xf32>
      %223 = tpu.matmul %10, %222, %cst_83 {dimension_numbers = #tpu.dot_dimension_numbers<[1], [0], [0], [1], [0, 0, 1, 1], [], []>} : vector<1x128xf32>, vector<128x64xf32>, vector<1x64xf32> -> vector<1x64xf32>
      %224 = math.log %223 : vector<1x64xf32>
      %225 = arith.addf %219, %224 : vector<1x64xf32>
      %226 = vector.broadcast %211 : f32 to vector<1x64xf32>
      %227 = arith.mulf %226, %225 : vector<1x64xf32>
      %cst_84 = arith.constant 0.000000e+00 : f32
      %228 = arith.subf %cst_84, %arg10 : f32
      %229 = vector.broadcast %209 : vector<1x64xf32> to vector<128x64xf32>
      %230 = arith.subf %229, %32 : vector<128x64xf32>
      %231 = vector.broadcast %208 : f32 to vector<128x64xf32>
      %232 = arith.mulf %230, %231 : vector<128x64xf32>
      %233 = vector.broadcast %35 : vector<1x64xf32> to vector<128x64xf32>
      %234 = arith.addf %233, %232 : vector<128x64xf32>
      %cst_85 = arith.constant dense<0xFF800000> : vector<128xf32>
      %235 = vector.multi_reduction <maximumf>, %234, %cst_85 [1] : vector<128x64xf32> to vector<128xf32>
      %236 = vector.shape_cast %235 : vector<128xf32> to vector<128x1xf32>
      %237 = vector.broadcast %236 : vector<128x1xf32> to vector<128x64xf32>
      %238 = arith.subf %234, %237 : vector<128x64xf32>
      %239 = math.exp %238 : vector<128x64xf32>
      %cst_86 = arith.constant dense<0.000000e+00> : vector<128x1xf32>
      %240 = tpu.matmul %239, %11, %cst_86 {dimension_numbers = #tpu.dot_dimension_numbers<[1], [0], [0], [1], [0, 0, 1, 1], [], []>} : vector<128x64xf32>, vector<64x1xf32>, vector<128x1xf32> -> vector<128x1xf32>
      %241 = math.log %240 : vector<128x1xf32>
      %242 = arith.addf %236, %241 : vector<128x1xf32>
      %243 = vector.broadcast %228 : f32 to vector<128x1xf32>
      %244 = arith.mulf %243, %242 : vector<128x1xf32>
      %245 = arith.addf %209, %227 : vector<1x64xf32>
      %cst_87 = arith.constant 5.000000e-01 : f32
      %246 = vector.broadcast %cst_87 : f32 to vector<1x64xf32>
      %247 = arith.mulf %246, %245 : vector<1x64xf32>
      %c0_88 = arith.constant 0 : index
      %c0_89 = arith.constant 0 : index
      %248 = vector.load %arg7[%c0_88, %c0_89] : memref<1x64xf32, #tpu.memory_space<vmem>>, vector<1x64xf32>
      tpu.vector_store %arg7[%c0_88, %c0_89], %247 {strides = array<i32>} : memref<1x64xf32, #tpu.memory_space<vmem>>, vector<1x64xf32>,
      %249 = arith.addf %210, %244 : vector<128x1xf32>
      %cst_90 = arith.constant 5.000000e-01 : f32
      %250 = vector.broadcast %cst_90 : f32 to vector<128x1xf32>
      %251 = arith.mulf %250, %249 : vector<128x1xf32>
      %c0_91 = arith.constant 0 : index
      %c0_92 = arith.constant 0 : index
      %252 = vector.load %arg8[%c0_91, %c0_92] : memref<128x1xf32, #tpu.memory_space<vmem>>, vector<128x1xf32>
      tpu.vector_store %arg8[%c0_91, %c0_92], %251 {strides = array<i32>} : memref<128x1xf32, #tpu.memory_space<vmem>>, vector<128x1xf32>,
      %cst_93 = arith.constant 5.000000e-01 : f32
      %253 = arith.mulf %arg10, %cst_93 : f32
      scf.yield %253 : f32
    }
    %c0_35 = arith.constant 0 : index
    %c0_36 = arith.constant 0 : index
    %73 = vector.load %arg7[%c0_35, %c0_36] : memref<1x64xf32, #tpu.memory_space<vmem>>, vector<1x64xf32>
    %c0_37 = arith.constant 0 : index
    %c0_38 = arith.constant 0 : index
    %74 = vector.load %arg8[%c0_37, %c0_38] : memref<128x1xf32, #tpu.memory_space<vmem>>, vector<128x1xf32>
    %75 = vector.broadcast %74 : vector<128x1xf32> to vector<128x64xf32>
    %76 = arith.subf %75, %32 : vector<128x64xf32>
    %cst_39 = arith.constant 1.000000e+02 : f32
    %77 = vector.broadcast %cst_39 : f32 to vector<128x64xf32>
    %78 = arith.mulf %76, %77 : vector<128x64xf32>
    %79 = vector.broadcast %40 : vector<128x1xf32> to vector<128x64xf32>
    %80 = arith.addf %79, %78 : vector<128x64xf32>
    %cst_40 = arith.constant dense<0xFF800000> : vector<64xf32>
    %81 = vector.multi_reduction <maximumf>, %80, %cst_40 [0] : vector<128x64xf32> to vector<64xf32>
    %82 = vector.shape_cast %81 : vector<64xf32> to vector<1x64xf32>
    %83 = vector.broadcast %82 : vector<1x64xf32> to vector<128x64xf32>
    %84 = arith.subf %80, %83 : vector<128x64xf32>
    %85 = math.exp %84 : vector<128x64xf32>
    %cst_41 = arith.constant dense<0.000000e+00> : vector<1x64xf32>
    %86 = tpu.matmul %10, %85, %cst_41 {dimension_numbers = #tpu.dot_dimension_numbers<[1], [0], [0], [1], [0, 0, 1, 1], [], []>} : vector<1x128xf32>, vector<128x64xf32>, vector<1x64xf32> -> vector<1x64xf32>
    %87 = math.log %86 : vector<1x64xf32>
    %88 = arith.addf %82, %87 : vector<1x64xf32>
    %cst_42 = arith.constant -0.00999999977 : f32
    %89 = vector.broadcast %cst_42 : f32 to vector<1x64xf32>
    %90 = arith.mulf %89, %88 : vector<1x64xf32>
    %91 = vector.broadcast %73 : vector<1x64xf32> to vector<128x64xf32>
    %92 = arith.subf %91, %32 : vector<128x64xf32>
    %cst_43 = arith.constant 1.000000e+02 : f32
    %93 = vector.broadcast %cst_43 : f32 to vector<128x64xf32>
    %94 = arith.mulf %92, %93 : vector<128x64xf32>
    %95 = vector.broadcast %35 : vector<1x64xf32> to vector<128x64xf32>
    %96 = arith.addf %95, %94 : vector<128x64xf32>
    %cst_44 = arith.constant dense<0xFF800000> : vector<128xf32>
    %97 = vector.multi_reduction <maximumf>, %96, %cst_44 [1] : vector<128x64xf32> to vector<128xf32>
    %98 = vector.shape_cast %97 : vector<128xf32> to vector<128x1xf32>
    %99 = vector.broadcast %98 : vector<128x1xf32> to vector<128x64xf32>
    %100 = arith.subf %96, %99 : vector<128x64xf32>
    %101 = math.exp %100 : vector<128x64xf32>
    %cst_45 = arith.constant dense<0.000000e+00> : vector<128x1xf32>
    %102 = tpu.matmul %101, %11, %cst_45 {dimension_numbers = #tpu.dot_dimension_numbers<[1], [0], [0], [1], [0, 0, 1, 1], [], []>} : vector<128x64xf32>, vector<64x1xf32>, vector<128x1xf32> -> vector<128x1xf32>
    %103 = math.log %102 : vector<128x1xf32>
    %104 = arith.addf %98, %103 : vector<128x1xf32>
    %cst_46 = arith.constant -0.00999999977 : f32
    %105 = vector.broadcast %cst_46 : f32 to vector<128x1xf32>
    %106 = arith.mulf %105, %104 : vector<128x1xf32>
    %107 = arith.addf %73, %90 : vector<1x64xf32>
    %cst_47 = arith.constant 5.000000e-01 : f32
    %108 = vector.broadcast %cst_47 : f32 to vector<1x64xf32>
    %109 = arith.mulf %108, %107 : vector<1x64xf32>
    %110 = arith.addf %74, %106 : vector<128x1xf32>
    %cst_48 = arith.constant 5.000000e-01 : f32
    %111 = vector.broadcast %cst_48 : f32 to vector<128x1xf32>
    %112 = arith.mulf %111, %110 : vector<128x1xf32>
    %113 = vector.broadcast %112 : vector<128x1xf32> to vector<128x64xf32>
    %114 = arith.subf %113, %32 : vector<128x64xf32>
    %cst_49 = arith.constant 1.000000e+02 : f32
    %115 = vector.broadcast %cst_49 : f32 to vector<128x64xf32>
    %116 = arith.mulf %114, %115 : vector<128x64xf32>
    %117 = vector.broadcast %40 : vector<128x1xf32> to vector<128x64xf32>
    %118 = arith.addf %117, %116 : vector<128x64xf32>
    %cst_50 = arith.constant dense<0xFF800000> : vector<64xf32>
    %119 = vector.multi_reduction <maximumf>, %118, %cst_50 [0] : vector<128x64xf32> to vector<64xf32>
    %120 = vector.shape_cast %119 : vector<64xf32> to vector<1x64xf32>
    %121 = vector.broadcast %120 : vector<1x64xf32> to vector<128x64xf32>
    %122 = arith.subf %118, %121 : vector<128x64xf32>
    %123 = math.exp %122 : vector<128x64xf32>
    %cst_51 = arith.constant dense<0.000000e+00> : vector<1x64xf32>
    %124 = tpu.matmul %10, %123, %cst_51 {dimension_numbers = #tpu.dot_dimension_numbers<[1], [0], [0], [1], [0, 0, 1, 1], [], []>} : vector<1x128xf32>, vector<128x64xf32>, vector<1x64xf32> -> vector<1x64xf32>
    %125 = math.log %124 : vector<1x64xf32>
    %126 = arith.addf %120, %125 : vector<1x64xf32>
    %cst_52 = arith.constant -0.00999999977 : f32
    %127 = vector.broadcast %cst_52 : f32 to vector<1x64xf32>
    %128 = arith.mulf %127, %126 : vector<1x64xf32>
    %129 = vector.broadcast %109 : vector<1x64xf32> to vector<128x64xf32>
    %130 = arith.subf %129, %32 : vector<128x64xf32>
    %cst_53 = arith.constant 1.000000e+02 : f32
    %131 = vector.broadcast %cst_53 : f32 to vector<128x64xf32>
    %132 = arith.mulf %130, %131 : vector<128x64xf32>
    %133 = vector.broadcast %35 : vector<1x64xf32> to vector<128x64xf32>
    %134 = arith.addf %133, %132 : vector<128x64xf32>
    %cst_54 = arith.constant dense<0xFF800000> : vector<128xf32>
    %135 = vector.multi_reduction <maximumf>, %134, %cst_54 [1] : vector<128x64xf32> to vector<128xf32>
    %136 = vector.shape_cast %135 : vector<128xf32> to vector<128x1xf32>
    %137 = vector.broadcast %136 : vector<128x1xf32> to vector<128x64xf32>
    %138 = arith.subf %134, %137 : vector<128x64xf32>
    %139 = math.exp %138 : vector<128x64xf32>
    %cst_55 = arith.constant dense<0.000000e+00> : vector<128x1xf32>
    %140 = tpu.matmul %139, %11, %cst_55 {dimension_numbers = #tpu.dot_dimension_numbers<[1], [0], [0], [1], [0, 0, 1, 1], [], []>} : vector<128x64xf32>, vector<64x1xf32>, vector<128x1xf32> -> vector<128x1xf32>
    %141 = math.log %140 : vector<128x1xf32>
    %142 = arith.addf %136, %141 : vector<128x1xf32>
    %cst_56 = arith.constant -0.00999999977 : f32
    %143 = vector.broadcast %cst_56 : f32 to vector<128x1xf32>
    %144 = arith.mulf %143, %142 : vector<128x1xf32>
    %145 = arith.mulf %7, %128 : vector<1x64xf32>
    %cst_57 = arith.constant dense<0.000000e+00> : vector<1x1xf32>
    %146 = tpu.matmul %145, %11, %cst_57 {dimension_numbers = #tpu.dot_dimension_numbers<[1], [0], [0], [1], [0, 0, 1, 1], [], []>} : vector<1x64xf32>, vector<64x1xf32>, vector<1x1xf32> -> vector<1x1xf32>
    %147 = arith.mulf %9, %144 : vector<128x1xf32>
    %cst_58 = arith.constant dense<0.000000e+00> : vector<1x1xf32>
    %148 = tpu.matmul %10, %147, %cst_58 {dimension_numbers = #tpu.dot_dimension_numbers<[1], [0], [0], [1], [0, 0, 1, 1], [], []>} : vector<1x128xf32>, vector<128x1xf32>, vector<1x1xf32> -> vector<1x1xf32>
    %149 = arith.addf %146, %148 : vector<1x1xf32>
    %150 = vector.broadcast %128 : vector<1x64xf32> to vector<128x64xf32>
    %151 = vector.broadcast %144 : vector<128x1xf32> to vector<128x64xf32>
    %152 = arith.addf %150, %151 : vector<128x64xf32>
    %153 = arith.subf %152, %32 : vector<128x64xf32>
    %cst_59 = arith.constant 1.000000e+02 : f32
    %154 = vector.broadcast %cst_59 : f32 to vector<128x64xf32>
    %155 = arith.mulf %153, %154 : vector<128x64xf32>
    %156 = vector.broadcast %40 : vector<128x1xf32> to vector<128x64xf32>
    %157 = arith.addf %155, %156 : vector<128x64xf32>
    %158 = vector.broadcast %35 : vector<1x64xf32> to vector<128x64xf32>
    %159 = arith.addf %157, %158 : vector<128x64xf32>
    %160 = math.exp %159 : vector<128x64xf32>
    %161 = arith.mulf %160, %159 : vector<128x64xf32>
    %162 = vector.broadcast %9 : vector<128x1xf32> to vector<128x64xf32>
    %163 = arith.mulf %161, %162 : vector<128x64xf32>
    %cst_60 = arith.constant dense<0.000000e+00> : vector<1x64xf32>
    %164 = tpu.matmul %10, %163, %cst_60 {dimension_numbers = #tpu.dot_dimension_numbers<[1], [0], [0], [1], [0, 0, 1, 1], [], []>} : vector<1x128xf32>, vector<128x64xf32>, vector<1x64xf32> -> vector<1x64xf32>
    %cst_61 = arith.constant dense<0.000000e+00> : vector<1x1xf32>
    %165 = tpu.matmul %164, %11, %cst_61 {dimension_numbers = #tpu.dot_dimension_numbers<[1], [0], [0], [1], [0, 0, 1, 1], [], []>} : vector<1x64xf32>, vector<64x1xf32>, vector<1x1xf32> -> vector<1x1xf32>
    %cst_62 = arith.constant 6.400000e+01 : f32
    %166 = arith.mulf %cst_62, %2 : f32
    %167 = vector.broadcast %166 : f32 to vector<1x1xf32>
    %168 = arith.divf %165, %167 : vector<1x1xf32>
    %cst_63 = arith.constant dense<0.000000e+00> : vector<128x1xf32>
    %169 = tpu.matmul %160, %11, %cst_63 {dimension_numbers = #tpu.dot_dimension_numbers<[1], [0], [0], [1], [0, 0, 1, 1], [], []>} : vector<128x64xf32>, vector<64x1xf32>, vector<128x1xf32> -> vector<128x1xf32>
    %cst_64 = arith.constant dense<0.000000e+00> : vector<1x64xf32>
    %170 = tpu.matmul %10, %160, %cst_64 {dimension_numbers = #tpu.dot_dimension_numbers<[1], [0], [0], [1], [0, 0, 1, 1], [], []>} : vector<1x128xf32>, vector<128x64xf32>, vector<1x64xf32> -> vector<1x64xf32>
    %171 = arith.subf %169, %9 : vector<128x1xf32>
    %172 = math.absf %171 : vector<128x1xf32>
    %cst_65 = arith.constant dense<0.000000e+00> : vector<1x1xf32>
    %173 = tpu.matmul %10, %172, %cst_65 {dimension_numbers = #tpu.dot_dimension_numbers<[1], [0], [0], [1], [0, 0, 1, 1], [], []>} : vector<1x128xf32>, vector<128x1xf32>, vector<1x1xf32> -> vector<1x1xf32>
    %174 = arith.subf %170, %7 : vector<1x64xf32>
    %175 = math.absf %174 : vector<1x64xf32>
    %cst_66 = arith.constant dense<0.000000e+00> : vector<1x1xf32>
    %176 = tpu.matmul %175, %11, %cst_66 {dimension_numbers = #tpu.dot_dimension_numbers<[1], [0], [0], [1], [0, 0, 1, 1], [], []>} : vector<1x64xf32>, vector<64x1xf32>, vector<1x1xf32> -> vector<1x1xf32>
    %177 = tpu.iota {dimensions = array<i32: 1>} : vector<1x128xi32>
    %c0_i32_67 = arith.constant 0 : i32
    %178 = vector.broadcast %c0_i32_67 : i32 to vector<1x128xi32>
    %179 = arith.cmpi eq, %177, %178 : vector<1x128xi32>
    %cst_68 = arith.constant 0.000000e+00 : f32
    %180 = vector.shape_cast %149 : vector<1x1xf32> to vector<1x1xf32>
    %181 = vector.broadcast %180 : vector<1x1xf32> to vector<1x128xf32>
    %182 = vector.broadcast %cst_68 : f32 to vector<1x128xf32>
    %183 = arith.select %179, %181, %182 : vector<1x128xi1>, vector<1x128xf32>
    %c1_i32_69 = arith.constant 1 : i32
    %184 = vector.broadcast %c1_i32_69 : i32 to vector<1x128xi32>
    %185 = arith.cmpi eq, %177, %184 : vector<1x128xi32>
    %cst_70 = arith.constant 0.000000e+00 : f32
    %186 = vector.shape_cast %168 : vector<1x1xf32> to vector<1x1xf32>
    %187 = vector.broadcast %186 : vector<1x1xf32> to vector<1x128xf32>
    %188 = vector.broadcast %cst_70 : f32 to vector<1x128xf32>
    %189 = arith.select %185, %187, %188 : vector<1x128xi1>, vector<1x128xf32>
    %190 = arith.addf %183, %189 : vector<1x128xf32>
    %c2_i32 = arith.constant 2 : i32
    %191 = vector.broadcast %c2_i32 : i32 to vector<1x128xi32>
    %192 = arith.cmpi eq, %177, %191 : vector<1x128xi32>
    %cst_71 = arith.constant 0.000000e+00 : f32
    %193 = vector.shape_cast %173 : vector<1x1xf32> to vector<1x1xf32>
    %194 = vector.broadcast %193 : vector<1x1xf32> to vector<1x128xf32>
    %195 = vector.broadcast %cst_71 : f32 to vector<1x128xf32>
    %196 = arith.select %192, %194, %195 : vector<1x128xi1>, vector<1x128xf32>
    %197 = arith.addf %190, %196 : vector<1x128xf32>
    %c3_i32 = arith.constant 3 : i32
    %198 = vector.broadcast %c3_i32 : i32 to vector<1x128xi32>
    %199 = arith.cmpi eq, %177, %198 : vector<1x128xi32>
    %cst_72 = arith.constant 0.000000e+00 : f32
    %200 = vector.shape_cast %176 : vector<1x1xf32> to vector<1x1xf32>
    %201 = vector.broadcast %200 : vector<1x1xf32> to vector<1x128xf32>
    %202 = vector.broadcast %cst_72 : f32 to vector<1x128xf32>
    %203 = arith.select %199, %201, %202 : vector<1x128xi1>, vector<1x128xf32>
    %204 = arith.addf %197, %203 : vector<1x128xf32>
    %c0_73 = arith.constant 0 : index
    %c0_74 = arith.constant 0 : index
    %c0_75 = arith.constant 0 : index
    %205 = vector.load %arg6[%c0_73, %c0_74, %c0_75] : memref<1x1x128xf32, #tpu.memory_space<vmem>>, vector<1x1x128xf32>
    %206 = vector.shape_cast %205 : vector<1x1x128xf32> to vector<1x128xf32>
    %207 = vector.shape_cast %204 : vector<1x128xf32> to vector<1x1x128xf32>
    tpu.vector_store %arg6[%c0_73, %c0_74, %c0_75], %207 {strides = array<i32>} : memref<1x1x128xf32, #tpu.memory_space<vmem>>, vector<1x1x128xf32>,
    return
  }
  func.func @transform_0(%arg0: i32, %arg1: memref<2xi32, #tpu.memory_space<smem>>) -> (i32, i32) {
    %c0_i32 = arith.constant 0 : i32
    %c0_i32_0 = arith.constant 0 : i32
    %c0_i32_1 = arith.constant 0 : i32
    return %c0_i32, %c0_i32_0 : i32, i32
  }
  func.func @transform_1(%arg0: i32, %arg1: memref<2xi32, #tpu.memory_space<smem>>) -> (i32, i32, i32) {
    %c0_i32 = arith.constant 0 : i32
    %c0_i32_0 = arith.constant 0 : i32
    %c0_i32_1 = arith.constant 0 : i32
    return %arg0, %c0_i32, %c0_i32_0 : i32, i32, i32
  }
  func.func @transform_2(%arg0: i32, %arg1: memref<2xi32, #tpu.memory_space<smem>>) -> (i32, i32, i32) {
    %c0_i32 = arith.constant 0 : i32
    %c0_i32_0 = arith.constant 0 : i32
    %c0_i32_1 = arith.constant 0 : i32
    return %arg0, %c0_i32, %c0_i32_0 : i32, i32, i32
  }
  func.func @transform_3(%arg0: i32, %arg1: memref<2xi32, #tpu.memory_space<smem>>) -> (i32, i32, i32) {
    %c0_i32 = arith.constant 0 : i32
    %c0_i32_0 = arith.constant 0 : i32
    %c0_i32_1 = arith.constant 0 : i32
    return %arg0, %c0_i32, %c0_i32_0 : i32, i32, i32
  }
  func.func @transform_4(%arg0: i32, %arg1: memref<2xi32, #tpu.memory_space<smem>>) -> (i32, i32, i32) {
    %c0_i32 = arith.constant 0 : i32
    %c0_i32_0 = arith.constant 0 : i32
    %c0_i32_1 = arith.constant 0 : i32
    return %arg0, %c0_i32, %c0_i32_0 : i32, i32, i32
  }
}

</mosaic_0001>

<bundles_post_ra>
// kernel: run.1
= control target key start
LH: loop header
LB: loop body
LE: loop exit
PB: predicated region body
PF: predicated region fallthrough
CT: control target
= control target key end

     0   :  { %s9180_s0 = inlined_call_operand.vmem [shape: s32[2], index: 0, kind: input, shape index: {}]   ;;  %s9181_s1 = inlined_call_operand.vmem [shape: f32[8,64], index: 1, kind: input, shape index: {}]   ;;  %s9182_s2 = inlined_call_operand.vmem [shape: f32[2,128,8], index: 2, kind: input, shape index: {}]   ;;  %s9183_s3 = inlined_call_operand.vmem [shape: f32[2,1,64], index: 3, kind: input, shape index: {}]   ;;  %s9184_s4 = inlined_call_operand.vmem [shape: f32[2,128,1], index: 4, kind: input, shape index: {}]   ;;  %s9185_s5 = inlined_call_operand.vmem [shape: f32[2,1,128], index: 5, kind: output, shape index: {}]  }
   0x1   :  { %s10_s20 = sshll.u32 %s9180_s0, 4  ;;  %s11_s20 = int_to_ptr.vmem [resolvable:$true] %s10_s20 }
   0x2   :  { %s6661_s21 = scalar_lea.vmem %s11_s20, 16  ;;  %p6666_p1 = scmp.lt.s32.totalorder %s11_s20, %s11_s20 }
   0x3   :  { %p6662_p0 = scmp.ne.s32.totalorder %s11_s20, %s6661_s21  ;;  %p6667_p2 = scmp.lt.s32.totalorder %s6661_s21, %s6661_s21 }
   0x5   :  { %p6668_p3 = por %p6667_p2, %p6666_p1 }
   0x7   :  { %p6669_p4 = pnand %p6668_p3, %p6662_p0 }
   0x9   :  { %6672 = shalt.err (!%p6669_p4)  }
   0xa   :  { %s6699_s22 = smov [#allocation5]  }
   0xb   :  { %13 = dma.vmem_to_smem %s11_s20, 16, %s6699_s22, [#allocation4] }
   0xc   :  { %6685 = dma.done.wait [#allocation4], 16 }
   0xd   :  { %6686 = vsyncadd [#allocation4], 4294967280 }
   0xe   :  { %15 = sfence }
   0xf   :  { %s6746_s23 = smov 0  }
  0x10 LB: > { %s4858_s0 = sadd.s32 4294967295, %s6689_s23   ;;  %p4862_p5 = scmp.ge.s32.totalorder %s6689_s23, 1  ;;  %s6689_s23 = sphi %s6746_s23, %s21_s23  }
  0x11   : > { %p187_p6 = scmp.lt.s32.totalorder %s6689_s23, 3 }
  0x13   : > { %p188_p7 = pnand %p4862_p5, %p187_p6 }
  0x15   : > { %191 = sbr.rel (%p188_p7) target bundleno = 3170 (0xc62), region = 36 }
  0x1c   : > { %s6754_s24 = sld [smem:[#allocation5 + %s4858_s0]]  ;;  %v6759_v0 = vld [vmem:[%s9181_s1] sm:$0xff]  ;;  %p219_p8 = scmp.lt.s32.totalorder %s4858_s0, 1  ;;  %v9187_v1 = vmov 0   ;;  %vm271_vm0 = vcmask 64512  }
  0x1d   : > { %5286 = vmatprep.subr.mxu1 %v6759_v0  ;;  %6148 = vset.pattern.permute.xlu1 %v9187_v1  ;;  %v6701_v53 = vmov -1e+30   ;;  %s7520_s16 = smov 1.4142135   ;;  %s7522_s17 = smov 0  }
  0x1e   : > { %5287 = vmatpush3.msra.mxu1 %v6759_v0  ;;  %s9609_s0 = smov (!%p219_p8, %s4858_s0), 1  ;;  %6147 = vset.pattern.permute.xlu0 %v9187_v1 }
  0x1f   : > { %s4984_s27 = sshll.u32 %s9609_s0, 7  ;;  %s234_s9 = scalar_lea.vmem %s9185_s5, %s9609_s0 }
  0x20   : > { %s6773_s30 = scalar_lea.vmem %s9182_s2, %s4984_s27  ;;  %s6833_s12 = scalar_lea.vmem %s9184_s4, %s4984_s27 }
  0x21   : > { %v238_v2 = vld [vmem:[%s6773_s30] sm:$0xff]  ;;  %v239_v3 = vld [vmem:[%s6773_s30 + $0x8] sm:$0xff]  ;;  %v240_v4 = vld [vmem:[%s6773_s30 + $0x10] sm:$0xff]  ;;  %s226_s15 = scalar_lea.vmem %s9183_s3, %s9609_s0 }
  0x22   : > { %s236_s6 = scvt.s32.f32 %s6754_s24  ;;  %5288 = vmatprep.mubr.msk.f32.mxu1 %vm271_vm0, %v238_v2  ;;  %v465_v5 = vmul.f32 %v238_v2, %v238_v2  ;;  %v241_v6 = vld [vmem:[%s6773_s30 + $0x18] sm:$0xff]  ;;  %v467_v7 = vmul.f32 %v240_v4, %v240_v4  ;;  %v466_v8 = vmul.f32 %v239_v3, %v239_v3  ;;  %v242_v12 = vld [vmem:[%s6773_s30 + $0x20] sm:$0xff]  ;;  %v243_v13 = vld [vmem:[%s6773_s30 + $0x28] sm:$0xff] }
  0x23   : > { %5289 = vmatmul.mubr.msk.f32.vlgmr.msra.gmra.mrb[0].mxu1 %vm271_vm0, %v239_v3  ;;  %v468_v9 = vmul.f32 %v241_v6, %v241_v6  ;;  %v470_v16 = vmul.f32 %v243_v13, %v243_v13  ;;  %v469_v17 = vmul.f32 %v242_v12, %v242_v12  ;;  %v244_v18 = vld [vmem:[%s6773_s30 + $0x30] sm:$0xff]  ;;  %v245_v19 = vld [vmem:[%s6773_s30 + $0x38] sm:$0xff]  ;;  %v246_v24 = vld [vmem:[%s6773_s30 + $0x40] sm:$0xff] }
  0x24   : > { %5291 = vmatprep.mubr.msk.f32.mxu1 %vm271_vm0, %v240_v4  ;;  %v487_v10 = vsel %vm271_vm0, %v467_v7, 0.0  ;;  %v481_v11 = vsel %vm271_vm0, %v465_v5, 0.0  ;;  %v484_v15 = vsel %vm271_vm0, %v466_v8, 0.0  ;;  %v472_v21 = vmul.f32 %v245_v19, %v245_v19  ;;  %v247_v25 = vld [vmem:[%s6773_s30 + $0x48] sm:$0xff]  ;;  %v248_v30 = vld [vmem:[%s6773_s30 + $0x50] sm:$0xff]  ;;  %v249_v31 = vld [vmem:[%s6773_s30 + $0x58] sm:$0xff] }
  0x25   : > { %488 = vadd.xlane.f32.xlu1 %v487_v10  ;;  %482 = vadd.xlane.f32.xlu0 %v481_v11  ;;  %v490_v14 = vsel %vm271_vm0, %v468_v9, 0.0  ;;  %v496_v20 = vsel %vm271_vm0, %v470_v16, 0.0  ;;  %v493_v22 = vsel %vm271_vm0, %v469_v17, 0.0  ;;  %v471_v23 = vmul.f32 %v244_v18, %v244_v18  ;;  %v250_v36 = vld [vmem:[%s6773_s30 + $0x60] sm:$0xff]  ;;  %v251_v37 = vld [vmem:[%s6773_s30 + $0x68] sm:$0xff]  ;;  %v252_v42 = vld [vmem:[%s6773_s30 + $0x70] sm:$0xff] }
  0x26   : > { %v502_v26 = vsel %vm271_vm0, %v472_v21, 0.0  ;;  %v474_v27 = vmul.f32 %v247_v25, %v247_v25  ;;  %v473_v29 = vmul.f32 %v246_v24, %v246_v24  ;;  %v476_v33 = vmul.f32 %v249_v31, %v249_v31  ;;  %v253_v43 = vld [vmem:[%s6773_s30 + $0x78] sm:$0xff]  ;;  %v6836_v50 = vld [vmem:[%s6833_s12 + $0x8] sm:$0xff]  ;;  %v6840_v51 = vld [vmem:[%s6833_s12 + $0x10] sm:$0xff] }
  0x27   : > { %5292 = vmatmul.mubr.msk.f32.gmra.mrb[2].mxu1 %vm271_vm0, %v241_v6  ;;  %v499_v28 = vsel %vm271_vm0, %v471_v23, 0.0  ;;  %v475_v35 = vmul.f32 %v248_v30, %v248_v30  ;;  %v478_v39 = vmul.f32 %v251_v37, %v251_v37  ;;  %v477_v41 = vmul.f32 %v250_v36, %v250_v36  ;;  %9371 = vst [vmem:[#allocation7_spill] sm:$0xff] %v6836_v50  ;;  %v6843_v52 = vld [vmem:[%s6833_s12] sm:$0xff]  ;;  %v6847_v55 = vld [vmem:[%s6833_s12 + $0x18] sm:$0xff]  ;;  %v6851_v56 = vld [vmem:[%s6833_s12 + $0x48] sm:$0xff] }
  0x28   : > { %5294 = vmatprep.mubr.msk.f32.mxu1 %vm271_vm0, %v242_v12  ;;  %v508_v32 = vsel %vm271_vm0, %v474_v27, 0.0  ;;  %v505_v34 = vsel %vm271_vm0, %v473_v29, 0.0  ;;  %v514_v38 = vsel %vm271_vm0, %v476_v33, 0.0  ;;  %v480_v45 = vmul.f32 %v253_v43, %v253_v43  ;;  %9372 = vst [vmem:[#allocation8_spill] sm:$0xff] %v6840_v51  ;;  %9373 = vst [vmem:[#allocation9_spill] sm:$0xff] %v6843_v52  ;;  %v6855_v59 = vld [vmem:[%s6833_s12 + $0x20] sm:$0xff] }
  0x29   : > { %491 = vadd.xlane.f32.xlu1 %v490_v14  ;;  %485 = vadd.xlane.f32.xlu0 %v484_v15  ;;  %v511_v40 = vsel %vm271_vm0, %v475_v35, 0.0  ;;  %v520_v44 = vsel %vm271_vm0, %v478_v39, 0.0  ;;  %v517_v46 = vsel %vm271_vm0, %v477_v41, 0.0  ;;  %v479_v47 = vmul.f32 %v252_v42, %v252_v42  ;;  %9374 = vst [vmem:[#allocation10_spill] sm:$0xff] %v6847_v55  ;;  %9375 = vst [vmem:[#allocation11_spill] sm:$0xff] %v6851_v56  ;;  %v6859_v60 = vld [vmem:[%s6833_s12 + $0x58] sm:$0xff] }
  0x2a   : > { %v526_v48 = vsel %vm271_vm0, %v480_v45, 0.0  ;;  %vm782_vm1 = vcmp.gt.f32.partialorder %v6836_v50, 0.0  ;;  %vm783_vm2 = vcmp.gt.f32.partialorder %v6840_v51, 0.0  ;;  %vm781_vm3 = vcmp.gt.f32.partialorder %v6843_v52, 0.0  ;;  %9376 = vst [vmem:[#allocation12_spill] sm:$0xff] %v6855_v59  ;;  %9377 = vst [vmem:[#allocation13_spill] sm:$0xff] %v6859_v60 }
  0x2b   : > { %5295 = vmatmul.mubr.msk.f32.gmra.mrb[4].mxu1 %vm271_vm0, %v243_v13  ;;  %v523_v49 = vsel %vm271_vm0, %v479_v47, 0.0  ;;  %v798_v54 = vsel %vm782_vm1, 0.0, %v6701_v53  ;;  %v799_v57 = vsel %vm783_vm2, 0.0, %v6701_v53  ;;  %vm784_vm4 = vcmp.gt.f32.partialorder %v6847_v55, 0.0  ;;  %v6863_v63 = vld [vmem:[%s6833_s12 + $0x28] sm:$0xff]  ;;  %v6871_v5 = vld [vmem:[%s6833_s12 + $0x30] sm:$0xff] }
  0x2c   : > { %5297 = vmatprep.mubr.msk.f32.mxu1 %vm271_vm0, %v244_v18  ;;  %v797_v58 = vsel %vm781_vm3, 0.0, %v6701_v53  ;;  %vm790_vm5 = vcmp.gt.f32.partialorder %v6851_v56, 0.0  ;;  %v800_v61 = vsel %vm784_vm4, 0.0, %v6701_v53  ;;  %vm785_vm6 = vcmp.gt.f32.partialorder %v6855_v59, 0.0  ;;  %9378 = vst [vmem:[#allocation14_spill] sm:$0xff] %v6863_v63  ;;  %v6867_v2 = vld [vmem:[%s6833_s12 + $0x68] sm:$0xff] }
  0x2d   : > { %497 = vadd.xlane.f32.xlu1 %v496_v20  ;;  %494 = vadd.xlane.f32.xlu0 %v493_v22  ;;  %v806_v62 = vsel %vm790_vm5, 0.0, %v6701_v53  ;;  %vm792_vm7 = vcmp.gt.f32.partialorder %v6859_v60, 0.0  ;;  %9379 = vst [vmem:[#allocation15_spill] sm:$0xff] %v6867_v2  ;;  %v801_v3 = vsel %vm785_vm6, 0.0, %v6701_v53  ;;  %vm786_vm8 = vcmp.gt.f32.partialorder %v6863_v63, 0.0  ;;  %9380 = vst [vmem:[#allocation16_spill] sm:$0xff] %v6871_v5 }
  0x2e   : > { %v808_v4 = vsel %vm792_vm7, 0.0, %v6701_v53  ;;  %vm794_vm9 = vcmp.gt.f32.partialorder %v6867_v2, 0.0  ;;  %v6875_v6 = vld [vmem:[%s6833_s12 + $0x78] sm:$0xff]  ;;  %v802_v7 = vsel %vm786_vm8, 0.0, %v6701_v53  ;;  %vm787_vm10 = vcmp.gt.f32.partialorder %v6871_v5, 0.0  ;;  %v6884_v12 = vld [vmem:[%s6833_s12 + $0x40] sm:$0xff] }
  0x2f   : > { %5298 = vmatmul.mubr.msk.f32.gmra.mrb[6].mxu1 %vm271_vm0, %v245_v19  ;;  %9381 = vst [vmem:[#allocation17_spill] sm:$0xff] %v6875_v6  ;;  %v810_v8 = vsel %vm794_vm9, 0.0, %v6701_v53  ;;  %v6879_v9 = vld [vmem:[%s6833_s12 + $0x38] sm:$0xff]  ;;  %vm796_vm11 = vcmp.gt.f32.partialorder %v6875_v6, 0.0  ;;  %v803_v10 = vsel %vm787_vm10, 0.0, %v6701_v53  ;;  %9383 = vst [vmem:[#allocation19_spill] sm:$0xff] %v6884_v12  ;;  %v529_v23 = vmul.f32 %v6759_v0, %v6759_v0 }
  0x30   : > { %5300 = vmatprep.mubr.msk.f32.mxu1 %vm271_vm0, %v246_v24  ;;  %9382 = vst [vmem:[#allocation18_spill] sm:$0xff] %v6879_v9  ;;  %vm788_vm12 = vcmp.gt.f32.partialorder %v6879_v9, 0.0  ;;  %v812_v11 = vsel %vm796_vm11, 0.0, %v6701_v53  ;;  %vm789_vm13 = vcmp.gt.f32.partialorder %v6884_v12, 0.0  ;;  %v6888_v14 = vld [vmem:[%s6833_s12 + $0x50] sm:$0xff]  ;;  %v6892_v16 = vld [vmem:[%s6833_s12 + $0x60] sm:$0xff] }
  0x31   : > { %503 = vadd.xlane.f32.xlu1 %v502_v26  ;;  %500 = vadd.xlane.f32.xlu0 %v499_v28  ;;  %v804_v13 = vsel %vm788_vm12, 0.0, %v6701_v53  ;;  %9384 = vst [vmem:[#allocation20_spill] sm:$0xff] %v6888_v14  ;;  %v805_v15 = vsel %vm789_vm13, 0.0, %v6701_v53  ;;  %vm791_vm14 = vcmp.gt.f32.partialorder %v6888_v14, 0.0  ;;  %9385 = vst [vmem:[#allocation21_spill] sm:$0xff] %v6892_v16  ;;  %vm793_vm15 = vcmp.gt.f32.partialorder %v6892_v16, 0.0 }
  0x32   : > { %v807_v17 = vsel %vm791_vm14, 0.0, %v6701_v53  ;;  %v6896_v18 = vld [vmem:[%s6833_s12 + $0x70] sm:$0xff]  ;;  %v809_v19 = vsel %vm793_vm15, 0.0, %v6701_v53  ;;  %vm530_vm1 = vcmask 523264  }
  0x33   : > { %5301 = vmatmul.mubr.msk.f32.gmra.mrb[8].mxu1 %vm271_vm0, %v247_v25  ;;  %9386 = vst [vmem:[#allocation22_spill] sm:$0xff] %v6896_v18  ;;  %v531_v24 = vsel %vm530_vm1, %v529_v23, 0.0 }
  0x34   : > { %5303 = vmatprep.mubr.msk.f32.mxu1 %vm271_vm0, %v248_v30  ;;  %v532_v27 = vrot.slane %v531_v24, 4 }
  0x35   : > { %509 = vadd.xlane.f32.xlu1 %v508_v32  ;;  %506 = vadd.xlane.f32.xlu0 %v505_v34 }
  0x36   : > { %v533_v30 = vadd.f32 %v532_v27, %v531_v24 }
  0x37   : > { %5304 = vmatmul.mubr.msk.f32.gmra.mrb[10].mxu1 %vm271_vm0, %v249_v31  ;;  %v6906_v31 = vld [vmem:[%s226_s15] sm:$0x1] }
  0x38   : > { %5306 = vmatprep.mubr.msk.f32.mxu1 %vm271_vm0, %v250_v36  ;;  %9387 = vst [vmem:[#allocation23_spill] sm:$0xff] %v6906_v31  ;;  %v778_v32 = vmax.f32 %v6906_v31, 1e-20  ;;  %v534_v33 = vrot.slane %v533_v30, 2  ;;  %v9189_v36 = vmov 0.0|0.0  }
  0x39   : > { %515 = vadd.xlane.f32.xlu1 %v514_v38  ;;  %512 = vadd.xlane.f32.xlu0 %v511_v40  ;;  %v9186_v40 = vlaneseq }
  0x3a   : > { %6149 = vlog2.f32 %v778_v32  ;;  %v535_v35 = vadd.f32 %v534_v33, %v533_v30  ;;  %5849 = vmatprep.subr.bf16.mxu1 %v9189_v36 }
  0x3b   : > { %5307 = vmatmul.mubr.msk.f32.gmra.mrb[12].mxu1 %vm271_vm0, %v251_v37 }
  0x3c   : > { %5309 = vmatprep.mubr.msk.f32.mxu1 %vm271_vm0, %v252_v42  ;;  %v536_v39 = vrot.slane %v535_v35, 1  ;;  %v1088_v42 = vshrl.u32 %v9186_v40, 7 }
  0x3d   : > { %521 = vadd.xlane.f32.xlu1 %v520_v44  ;;  %518 = vadd.xlane.f32.xlu0 %v517_v46 }
  0x3e   : > { %v537_v41 = vadd.f32 %v536_v39, %v535_v35 }
  0x3f   : > { %5310 = vmatmul.mubr.msk.f32.gmra.mrb[14].mxu1 %vm271_vm0, %v253_v43  ;;  %vm795_vm0 = vcmp.gt.f32.partialorder %v6896_v18, 0.0 }
  0x40   : > { %v811_v20 = vsel %vm795_vm0, 0.0, %v6701_v53 }
  0x41   : > { %527 = vadd.xlane.f32.xlu1 %v526_v48  ;;  %524 = vadd.xlane.f32.xlu0 %v523_v49  ;;  %v6911_v49 = vsub.s32 0, %v1088_v42 }
  0x43   : > { %9388 = vst [vmem:[#allocation24_spill] sm:$0xff] %v6911_v49 }
  0x44   : > { %v6150_v44 = vpop.eup %6149 }
  0x45   : > { %v780_v48 = vmul.f32 0.6931472, %v6150_v44 }
  0x52   : > { %836 = vperm.xlu1 %6148, %v798_v54  }
  0x56   : > { %841 = vperm.xlu1 %6148, %v799_v57  }
  0x57   : > { %831 = vperm.xlu0 %6147, %v797_v58  }
  0x5a   : > { %846 = vperm.xlu1 %6148, %v800_v61  }
  0x5b   : > { %876 = vperm.xlu0 %6147, %v806_v62  }
  0x5e   : > { %851 = vperm.xlu1 %6148, %v801_v3  }
  0x5f   : > { %886 = vperm.xlu0 %6147, %v808_v4  }
  0x62   : > { %856 = vperm.xlu1 %6148, %v802_v7  }
  0x63   : > { %896 = vperm.xlu0 %6147, %v810_v8  }
  0x66   : > { %861 = vperm.xlu1 %6148, %v803_v10   ;;  %v6914_v10 = vrot.slane %v780_v48, %v6911_v49 }
  0x67   : > { %906 = vperm.xlu0 %6147, %v812_v11  }
  0x68   : > { %9389 = vst [vmem:[#allocation25_spill] sm:$0xff] %v6914_v10 }
  0x6a   : > { %866 = vperm.xlu1 %6148, %v804_v13  }
  0x6e   : > { %871 = vperm.xlu1 %6148, %v805_v15  }
  0x72   : > { %881 = vperm.xlu1 %6148, %v807_v17  }
  0x76   : > { %891 = vperm.xlu1 %6148, %v809_v19  }
  0x7a   : > { %901 = vperm.xlu1 %6148, %v811_v20  }
  0xb2   : > { %v489_v21 = vpop.xlane.xlu1 %488  ;;  %v483_v22 = vpop.xlane.xlu0 %482 }
  0xb3   : > { %v538_v57 = vadd.f32 %v537_v41, %v483_v22  ;;  %v540_v17 = vadd.f32 %v537_v41, %v489_v21 }
  0xb6   : > { %v492_v25 = vpop.xlane.xlu1 %491  ;;  %v486_v26 = vpop.xlane.xlu0 %485 }
  0xb7   : > { %v539_v46 = vadd.f32 %v537_v41, %v486_v26  ;;  %v541_v61 = vadd.f32 %v537_v41, %v492_v25 }
  0xba   : > { %v495_v28 = vpop.xlane.xlu0 %494  ;;  %v498_v29 = vpop.xlane.xlu1 %497 }
  0xbb   : > { %v543_v20 = vadd.f32 %v537_v41, %v498_v29  ;;  %v542_v25 = vadd.f32 %v537_v41, %v495_v28 }
  0xbe   : > { %v501_v34 = vpop.xlane.xlu0 %500  ;;  %v504_v0 = vpop.xlane.xlu1 %503 }
  0xbf   : > { %v545_v24 = vadd.f32 %v537_v41, %v504_v0  ;;  %v544_v32 = vadd.f32 %v537_v41, %v501_v34 }
  0xc2   : > { %v507_v37 = vpop.xlane.xlu0 %506  ;;  %v510_v38 = vpop.xlane.xlu1 %509 }
  0xc3   : > { %v547_v30 = vadd.f32 %v537_v41, %v510_v38  ;;  %v6926_v42 = vadd.f32 %v537_v41, %v507_v37 }
  0xc6   : > { %v513_v43 = vpop.xlane.xlu0 %512  ;;  %v516_v45 = vpop.xlane.xlu1 %515 }
  0xc7   : > { %v6924_v21 = vadd.f32 %v537_v41, %v516_v45  ;;  %v6932_v28 = vadd.f32 %v537_v41, %v513_v43 }
  0xca   : > { %v519_v3 = vpop.xlane.xlu0 %518  ;;  %v522_v8 = vpop.xlane.xlu1 %521 }
  0xcb   : > { %v6930_v0 = vadd.f32 %v537_v41, %v522_v8  ;;  %v6937_v48 = vadd.f32 %v537_v41, %v519_v3 }
  0xce   : > { %v525_v29 = vpop.xlane.xlu0 %524 }
  0xf6   : > { %v5290_v47 = vpop.f32.mrb[0].mxu1 }
  0xf7   : > { %v555_v53 = vmul.f32 2.0, %v5290_v47  ;;  %v386_v54 = vpop.f32.mrb[1].mxu1  ;;  %v528_v47 = vpop.xlane.xlu1 %527 }
  0xf8   : > { %v554_v58 = vmul.f32 2.0, %v386_v54  ;;  %v6935_v38 = vadd.f32 %v537_v41, %v528_v47 }
  0xf9   : > { %v571_v62 = vsub.f32 %v539_v46, %v555_v53  ;;  %v6941_v53 = vadd.f32 %v537_v41, %v525_v29 }
  0xfa   : > { %v570_v4 = vsub.f32 %v538_v57, %v554_v58  ;;  %v5293_v7 = vpop.f32.mrb[2].mxu1 }
  0xfb   : > { %v6916_v11 = vmax.f32 %v571_v62, 0.0  ;;  %v557_v13 = vmul.f32 2.0, %v5293_v7  ;;  %v396_v15 = vpop.f32.mrb[3].mxu1 }
  0xfc   : > { %v6918_v19 = vmax.f32 %v570_v4, 0.0  ;;  %v556_v23 = vmul.f32 2.0, %v396_v15 }
  0xfd   : > { %6151 = vrsqrt.f32 %v6916_v11  ;;  %v573_v22 = vsub.f32 %v541_v61, %v557_v13  ;;  %vm611_vm2 = vcmp.eq.f32.partialorder %v6916_v11, inf  ;;  %vm613_vm3 = vcmp.eq.f32.partialorder %v6916_v11, 0.0 }
  0xfe   : > { %6153 = vrsqrt.f32 %v6918_v19  ;;  %v572_v26 = vsub.f32 %v540_v17, %v556_v23  ;;  %v5296_v27 = vpop.f32.mrb[4].mxu1  ;;  %v614_v58 = vand.u32 2147483648, %v6916_v11  ;;  %vm604_vm4 = vcmp.eq.f32.partialorder %v6918_v19, inf }
  0xff   : > { %v6922_v33 = vmax.f32 %v573_v22, 0.0  ;;  %v559_v35 = vmul.f32 2.0, %v5296_v27  ;;  %v406_v39 = vpop.f32.mrb[5].mxu1  ;;  %vm606_vm5 = vcmp.eq.f32.partialorder %v6918_v19, 0.0  ;;  %v607_v41 = vand.u32 2147483648, %v6918_v19 }
 0x100   : > { %v6928_v44 = vmax.f32 %v572_v26, 0.0  ;;  %v558_v46 = vmul.f32 2.0, %v406_v39 }
 0x101   : > { %6155 = vrsqrt.f32 %v6922_v33  ;;  %v575_v34 = vsub.f32 %v543_v20, %v559_v35  ;;  %vm625_vm6 = vcmp.eq.f32.partialorder %v6922_v33, inf  ;;  %vm627_vm8 = vcmp.eq.f32.partialorder %v6922_v33, 0.0 }
 0x102   : > { %6157 = vrsqrt.f32 %v6928_v44  ;;  %v574_v37 = vsub.f32 %v542_v25, %v558_v46  ;;  %v5299_v45 = vpop.f32.mrb[6].mxu1  ;;  %vm618_vm7 = vcmp.eq.f32.partialorder %v6928_v44, inf  ;;  %vm620_vm9 = vcmp.eq.f32.partialorder %v6928_v44, 0.0  ;;  %v6970_v46 = vpop.permute.xlu1 %836 }
 0x103   : > { %v6943_v54 = vmax.f32 %v575_v34, 0.0  ;;  %v561_v43 = vmul.f32 2.0, %v5299_v45  ;;  %v416_v57 = vpop.f32.mrb[7].mxu1  ;;  %v621_v20 = vand.u32 2147483648, %v6928_v44  ;;  %v628_v26 = vand.u32 2147483648, %v6922_v33  ;;  %9390 = vst [vmem:[#allocation26_spill] sm:$0xff] %v6970_v46 }
 0x104   : > { %v6947_v61 = vmax.f32 %v574_v37, 0.0  ;;  %v560_v62 = vmul.f32 2.0, %v416_v57 }
 0x105   : > { %6159 = vrsqrt.f32 %v6943_v54  ;;  %v577_v3 = vsub.f32 %v545_v24, %v561_v43  ;;  %v642_v34 = vand.u32 2147483648, %v6943_v54  ;;  %vm639_vm12 = vcmp.eq.f32.partialorder %v6943_v54, inf }
 0x106   : > { %6161 = vrsqrt.f32 %v6947_v61  ;;  %v576_v4 = vsub.f32 %v544_v32, %v560_v62  ;;  %v5302_v7 = vpop.f32.mrb[8].mxu1  ;;  %v635_v32 = vand.u32 2147483648, %v6947_v61  ;;  %vm632_vm10 = vcmp.eq.f32.partialorder %v6947_v61, inf }
 0x107   : > { %v6152_v8 = vpop.eup %6151  ;;  %v6957_v13 = vmax.f32 %v577_v3, 0.0  ;;  %v563_v15 = vmul.f32 2.0, %v5302_v7  ;;  %v426_v17 = vpop.f32.mrb[9].mxu1  ;;  %vm634_vm11 = vcmp.eq.f32.partialorder %v6947_v61, 0.0  ;;  %vm641_vm13 = vcmp.eq.f32.partialorder %v6943_v54, 0.0 }
 0x108   : > { %v6154_v23 = vpop.eup %6153  ;;  %v6961_v22 = vmax.f32 %v576_v4, 0.0  ;;  %v562_v24 = vmul.f32 2.0, %v426_v17  ;;  %v610_v25 = vmul.f32 %v6152_v8, %v6916_v11 }
 0x109   : > { %6163 = vrsqrt.f32 %v6957_v13  ;;  %v579_v27 = vsub.f32 %v547_v30, %v563_v15  ;;  %v603_v35 = vmul.f32 %v6154_v23, %v6918_v19  ;;  %vm653_vm14 = vcmp.eq.f32.partialorder %v6957_v13, inf }
 0x10a   : > { %6165 = vrsqrt.f32 %v6961_v22  ;;  %v578_v39 = vsub.f32 %v6926_v42, %v562_v24  ;;  %v5305_v29 = vpop.f32.mrb[10].mxu1  ;;  %v612_v47 = vsel %vm611_vm2, %v6916_v11, %v610_v25  ;;  %vm646_vm15 = vcmp.eq.f32.partialorder %v6961_v22, inf }
 0x10b   : > { %v6156_v37 = vpop.eup %6155  ;;  %v6976_v45 = vmax.f32 %v579_v27, 0.0  ;;  %v565_v30 = vmul.f32 2.0, %v5305_v29  ;;  %v436_v43 = vpop.f32.mrb[11].mxu1  ;;  %v615_v57 = vsel %vm613_vm3, %v614_v58, %v612_v47  ;;  %v605_v42 = vsel %vm604_vm4, %v6918_v19, %v603_v35 }
 0x10c   : > { %v6158_v62 = vpop.eup %6157  ;;  %v6984_v3 = vmax.f32 %v578_v39, 0.0  ;;  %v564_v4 = vmul.f32 2.0, %v436_v43  ;;  %v715_v7 = vmul.f32 1.6666666, %v615_v57  ;;  %v624_v8 = vmul.f32 %v6156_v37, %v6922_v33  ;;  %v7009_v37 = vpop.permute.xlu1 %841 }
 0x10d   : > { %6167 = vrsqrt.f32 %v6976_v45  ;;  %v581_v11 = vsub.f32 %v6924_v21, %v565_v30  ;;  %v617_v58 = vmul.f32 %v6158_v62, %v6928_v44  ;;  %v608_v15 = vsel %vm606_vm5, %v607_v41, %v605_v42  ;;  %9391 = vst [vmem:[#allocation27_spill] sm:$0xff] %v7009_v37 }
 0x10e   : > { %6169 = vrsqrt.f32 %v6984_v3  ;;  %v580_v17 = vsub.f32 %v6932_v28, %v564_v4  ;;  %v5308_v23 = vpop.f32.mrb[12].mxu1  ;;  %v732_v24 = vmul.f32 1.442695, %v715_v7  ;;  %v626_v25 = vsel %vm625_vm6, %v6922_v33, %v624_v8 }
 0x10f   : > { %v6160_v21 = vpop.eup %6159  ;;  %v7000_v27 = vmax.f32 %v581_v11, 0.0  ;;  %v567_v35 = vmul.f32 2.0, %v5308_v23  ;;  %v446_v19 = vpop.f32.mrb[13].mxu1  ;;  %v619_v41 = vsel %vm618_vm7, %v6928_v44, %v617_v58  ;;  %v629_v28 = vsel %vm627_vm8, %v628_v26, %v626_v25 }
 0x110   : > { %v6162_v39 = vpop.eup %6161  ;;  %v7007_v29 = vmax.f32 %v580_v17, 0.0  ;;  %v566_v47 = vmul.f32 2.0, %v446_v19  ;;  %6171 = vpow2.f32 %v732_v24  ;;  %v622_v30 = vsel %vm620_vm9, %v621_v20, %v619_v41 }
 0x111   : > { %6173 = vrsqrt.f32 %v7000_v27  ;;  %v583_v43 = vsub.f32 %v6930_v0, %v567_v35  ;;  %v716_v57 = vmul.f32 1.6666666, %v622_v30  ;;  %v717_v42 = vmul.f32 1.6666666, %v629_v28  ;;  %v7036_v35 = vpop.permute.xlu1 %846 }
 0x112   : > { %6175 = vrsqrt.f32 %v7007_v29  ;;  %v582_v33 = vsub.f32 %v6937_v48, %v566_v47  ;;  %v5311_v26 = vpop.f32.mrb[14].mxu1  ;;  %v631_v62 = vmul.f32 %v6162_v39, %v6947_v61  ;;  %v714_v4 = vmul.f32 1.6666666, %v608_v15  ;;  %9392 = vst [vmem:[#allocation28_spill] sm:$0xff] %v7036_v35 }
 0x113   : > { %v6164_v7 = vpop.eup %6163  ;;  %v7018_v8 = vmax.f32 %v583_v43, 0.0  ;;  %v569_v11 = vmul.f32 2.0, %v5311_v26  ;;  %v456_v44 = vpop.f32.mrb[15].mxu1  ;;  %v734_v20 = vmul.f32 1.442695, %v716_v57  ;;  %v638_v58 = vmul.f32 %v6160_v21, %v6943_v54 }
 0x114   : > { %v6166_v0 = vpop.eup %6165  ;;  %v7022_v17 = vmax.f32 %v582_v33, 0.0  ;;  %v568_v23 = vmul.f32 2.0, %v456_v44  ;;  %v736_v24 = vmul.f32 1.442695, %v717_v42  ;;  %v633_v48 = vsel %vm632_vm10, %v6947_v61, %v631_v62 }
 0x115   : > { %6177 = vrsqrt.f32 %v7018_v8  ;;  %v585_v15 = vsub.f32 %v6935_v38, %v569_v11  ;;  %v636_v25 = vsel %vm634_vm11, %v635_v32, %v633_v48  ;;  %v640_v41 = vsel %vm639_vm12, %v6943_v54, %v638_v58 }
 0x116   : > { %6179 = vrsqrt.f32 %v7022_v17  ;;  %v584_v21 = vsub.f32 %v6941_v53, %v568_v23  ;;  %v718_v19 = vmul.f32 1.6666666, %v636_v25  ;;  %v643_v61 = vsel %vm641_vm13, %v642_v34, %v640_v41 }
 0x117   : > { %v6168_v28 = vpop.eup %6167  ;;  %v7041_v38 = vmax.f32 %v585_v15, 0.0  ;;  %6181 = vpow2.f32 %v734_v20  ;;  %v645_v32 = vmul.f32 %v6166_v0, %v6961_v22  ;;  %v730_v47 = vmul.f32 1.442695, %v714_v4  ;;  %v7061_v20 = vpop.permute.xlu1 %851 }
 0x118   : > { %v6170_v39 = vpop.eup %6169  ;;  %6183 = vpow2.f32 %v736_v24  ;;  %v738_v53 = vmul.f32 1.442695, %v718_v19  ;;  %v719_v30 = vmul.f32 1.6666666, %v643_v61  ;;  %v7049_v43 = vmax.f32 %v584_v21, 0.0  ;;  %9394 = vst [vmem:[#allocation30_spill] sm:$0xff] %v7061_v20 }
 0x119   : > { %6185 = vrsqrt.f32 %v7041_v38  ;;  %v647_v57 = vsel %vm646_vm15, %v6961_v22, %v645_v32  ;;  %v649_v42 = vand.u32 2147483648, %v6961_v22  ;;  %vm648_vm0 = vcmp.eq.f32.partialorder %v6961_v22, 0.0 }
 0x11a   : > { %v6172_v33 = vpop.eup %6171  ;;  %v740_v54 = vmul.f32 1.442695, %v719_v30  ;;  %v652_v34 = vmul.f32 %v6164_v7, %v6957_v13  ;;  %vm655_vm2 = vcmp.eq.f32.partialorder %v6957_v13, 0.0  ;;  %6187 = vpow2.f32 %v738_v53 }
 0x11b   : > { %v6174_v26 = vpop.eup %6173  ;;  %v7058_v62 = vadd.f32 -1.0, %v6172_v33  ;;  %v650_v4 = vsel %vm648_vm0, %v649_v42, %v647_v57  ;;  %v656_v11 = vand.u32 2147483648, %v6957_v13  ;;  %6189 = vpow2.f32 %v730_v47 }
 0x11c   : > { %v6176_v44 = vpop.eup %6175  ;;  %v720_v58 = vmul.f32 1.6666666, %v650_v4  ;;  %v654_v22 = vsel %vm653_vm14, %v6957_v13, %v652_v34  ;;  %v666_v7 = vmul.f32 %v6168_v28, %v6976_v45  ;;  %6191 = vpow2.f32 %v740_v54 }
 0x11d   : > { %9393 = vst [vmem:[#allocation29_spill] sm:$0xff] %v7058_v62  ;;  %v814_v0 = vmul.f32 0.70710677, %v7058_v62  ;;  %v657_v23 = vsel %vm655_vm2, %v656_v11, %v654_v22  ;;  %vm667_vm3 = vcmp.eq.f32.partialorder %v6976_v45, inf  ;;  %6193 = vrsqrt.f32 %v7049_v43 }
 0x11e   : > { %v742_v24 = vmul.f32 1.442695, %v720_v58  ;;  %v721_v48 = vmul.f32 1.6666666, %v657_v23  ;;  %v668_v15 = vsel %vm667_vm3, %v6976_v45, %v666_v7  ;;  %v670_v19 = vand.u32 2147483648, %v6976_v45 }
 0x11f   : > { %v7071_v25 = vpop.eup %6177  ;;  %v7074_v21 = vsub.f32 %v6970_v46, %v814_v0  ;;  %v7077_v13 = vsub.f32 %v6914_v10, %v814_v0  ;;  %v659_v41 = vmul.f32 %v6170_v39, %v6984_v3  ;;  %vm669_vm4 = vcmp.eq.f32.partialorder %v6976_v45, 0.0  ;;  %v7091_v39 = vpop.permute.xlu1 %856 }
 0x120   : > { %v7081_v28 = vpop.eup %6179  ;;  %6195 = vpow2.f32 %v742_v24  ;;  %v744_v61 = vmul.f32 1.442695, %v721_v48  ;;  %vm660_vm5 = vcmp.eq.f32.partialorder %v6984_v3, inf  ;;  %v671_v47 = vsel %vm669_vm4, %v670_v19, %v668_v15  ;;  %9396 = vst [vmem:[#allocation32_spill] sm:$0xff] %v7091_v39 }
 0x121   : > { %v6182_v32 = vpop.eup %6181  ;;  %v1111_v53 = vsel %vm530_vm1, %v7077_v13, -inf  ;;  %v661_v30 = vsel %vm660_vm5, %v6984_v3, %v659_v41  ;;  %vm662_vm6 = vcmp.eq.f32.partialorder %v6984_v3, 0.0  ;;  %v723_v33 = vmul.f32 1.6666666, %v671_v47 }
 0x122   : > { %v6184_v57 = vpop.eup %6183  ;;  %v7089_v42 = vadd.f32 -1.0, %v6182_v32  ;;  %1112 = vmax.xlane.f32.xlu0 %v1111_v53  ;;  %6197 = vpow2.f32 %v744_v61  ;;  %v663_v45 = vand.u32 2147483648, %v6984_v3  ;;  %v926_v34 = vsel %vm530_vm1, %v7074_v21, -inf }
 0x123   : > { %v7094_v54 = vpop.eup %6185  ;;  %v7098_v4 = vadd.f32 -1.0, %v6184_v57  ;;  %v680_v11 = vmul.f32 %v6174_v26, %v7000_v27  ;;  %vm681_vm7 = vcmp.eq.f32.partialorder %v7000_v27, inf  ;;  %v748_v22 = vmul.f32 1.442695, %v723_v33 }
 0x124   : > { %9395 = vst [vmem:[#allocation31_spill] sm:$0xff] %v7089_v42  ;;  %v815_v58 = vmul.f32 0.70710677, %v7089_v42  ;;  %v664_v7 = vsel %vm662_vm6, %v663_v45, %v661_v30  ;;  %v684_v0 = vand.u32 2147483648, %v7000_v27  ;;  %v6188_v23 = vpop.eup %6187  ;;  %vm683_vm8 = vcmp.eq.f32.partialorder %v7000_v27, 0.0 }
 0x125   : > { %9397 = vst [vmem:[#allocation33_spill] sm:$0xff] %v7098_v4  ;;  %v816_v3 = vmul.f32 0.70710677, %v7098_v4  ;;  %v722_v24 = vmul.f32 1.6666666, %v664_v7  ;;  %v682_v48 = vsel %vm681_vm7, %v7000_v27, %v680_v11  ;;  %v7108_v15 = vmul.f32 %v6176_v44, %v7007_v29  ;;  %v6190_v26 = vpop.eup %6189  ;;  %v7131_v11 = vpop.permute.xlu0 %831 }
 0x126   : > { %v7111_v19 = vsub.f32 %v7009_v37, %v815_v58  ;;  %v7113_v41 = vadd.f32 -1.0, %v6188_v23  ;;  %v7116_v61 = vsub.f32 %v6914_v10, %v815_v58  ;;  %6199 = vpow2.f32 %v748_v22  ;;  %v6192_v32 = vpop.eup %6191  ;;  %9400 = vst [vmem:[#allocation36_spill] sm:$0xff] %v7131_v11  ;;  %v7135_v22 = vpop.permute.xlu1 %861 }
 0x127   : > { %v7119_v53 = vsub.f32 %v7036_v35, %v816_v3  ;;  %v7121_v47 = vadd.f32 -1.0, %v6190_v26  ;;  %v7124_v30 = vsub.f32 %v6914_v10, %v816_v3  ;;  %v746_v44 = vmul.f32 1.442695, %v722_v24  ;;  %v7126_v57 = vpop.eup %6193  ;;  %9402 = vst [vmem:[#allocation38_spill] sm:$0xff] %v7135_v22 }
 0x128   : > { %9398 = vst [vmem:[#allocation34_spill] sm:$0xff] %v7113_v41  ;;  %v927_v33 = vsel %vm530_vm1, %v7111_v19, -inf  ;;  %v817_v45 = vmul.f32 0.70710677, %v7113_v41  ;;  %v7133_v58 = vadd.f32 -1.0, %v6192_v32  ;;  %v1114_v7 = vsel %vm530_vm1, %v7116_v61, -inf }
 0x129   : > { %9399 = vst [vmem:[#allocation35_spill] sm:$0xff] %v7121_v47  ;;  %v932_v23 = vmax.f32 %v926_v34, %v927_v33  ;;  %v928_v3 = vsel %vm530_vm1, %v7119_v53, -inf  ;;  %v813_v24 = vmul.f32 0.70710677, %v7121_v47  ;;  %v1117_v26 = vsel %vm530_vm1, %v7124_v30, -inf  ;;  %1115 = vmax.xlane.f32.xlu0 %v1114_v7 }
 0x12a   : > { %9401 = vst [vmem:[#allocation37_spill] sm:$0xff] %v7133_v58  ;;  %v6196_v40 = vpop.eup %6195  ;;  %v7145_v1 = vsub.f32 %v7061_v20, %v817_v45  ;;  %v818_v32 = vmul.f32 0.70710677, %v7133_v58  ;;  %v7149_v36 = vsub.f32 %v6914_v10, %v817_v45  ;;  %6201 = vpow2.f32 %v746_v44 }
 0x12b   : > { %v934_v34 = vmax.f32 %v928_v3, %v932_v23  ;;  %v7152_v33 = vsub.f32 %v7131_v11, %v813_v24  ;;  %v7155_v31 = vsub.f32 %v6914_v10, %v813_v24  ;;  %v7157_v18 = vadd.f32 -1.0, %v6196_v40 }
 0x12c   : > { %v6198_v7 = vpop.eup %6197  ;;  %v929_v6 = vsel %vm530_vm1, %v7145_v1, -inf  ;;  %v7162_v16 = vsub.f32 %v7091_v39, %v818_v32  ;;  %v7165_v45 = vsub.f32 %v6914_v10, %v818_v32  ;;  %v1120_v44 = vsel %vm530_vm1, %v7149_v36, -inf  ;;  %v7178_v32 = vpop.permute.xlu1 %866 }
 0x12d   : > { %9403 = vst [vmem:[#allocation39_spill] sm:$0xff] %v7157_v18  ;;  %v925_v23 = vsel %vm530_vm1, %v7152_v33, -inf  ;;  %v1108_v40 = vsel %vm530_vm1, %v7155_v31, -inf  ;;  %v819_v3 = vmul.f32 0.70710677, %v7157_v18  ;;  %v7174_v24 = vadd.f32 -1.0, %v6198_v7  ;;  %1121 = vmax.xlane.f32.xlu0 %v1120_v44 }
 0x12e   : > { %v930_v2 = vmax.f32 %v925_v23, %v929_v6  ;;  %v931_v14 = vsel %vm530_vm1, %v7162_v16, -inf  ;;  %1109 = vmax.xlane.f32.xlu1 %v1108_v40  ;;  %9405 = vst [vmem:[#allocation41_spill] sm:$0xff] %v7178_v32  ;;  %v1123_v60 = vsel %vm530_vm1, %v7165_v45, -inf  ;;  %v685_v12 = vsel %vm683_vm8, %v684_v0, %v682_v48 }
 0x12f   : > { %9404 = vst [vmem:[#allocation40_spill] sm:$0xff] %v7174_v24  ;;  %v7185_v56 = vsub.f32 %v7135_v22, %v819_v3  ;;  %v820_v7 = vmul.f32 0.70710677, %v7174_v24  ;;  %v7189_v44 = vsub.f32 %v6914_v10, %v819_v3  ;;  %v725_v6 = vmul.f32 1.6666666, %v685_v12 }
 0x130   : > { %v6200_v23 = vpop.eup %6199  ;;  %v936_v5 = vmax.f32 %v930_v2, %v934_v34  ;;  %vm674_vm9 = vcmp.eq.f32.partialorder %v7007_v29, inf  ;;  %vm676_vm10 = vcmp.eq.f32.partialorder %v7007_v29, 0.0  ;;  %v677_v40 = vand.u32 2147483648, %v7007_v29  ;;  %v7204_v2 = vpop.permute.xlu0 %876 }
 0x131   : > { %v933_v27 = vsel %vm530_vm1, %v7185_v56, -inf  ;;  %v7197_v0 = vsub.f32 %v7178_v32, %v820_v7  ;;  %v7199_v48 = vadd.f32 -1.0, %v6200_v23  ;;  %v7202_v3 = vsub.f32 %v6914_v10, %v820_v7  ;;  %9407 = vst [vmem:[#allocation43_spill] sm:$0xff] %v7204_v2 }
 0x132   : > { %v940_v12 = vmax.f32 %v931_v14, %v936_v5  ;;  %1118 = vmax.xlane.f32.xlu1 %v1117_v26  ;;  %v1126_v34 = vsel %vm530_vm1, %v7189_v44, -inf  ;;  %v752_v9 = vmul.f32 1.442695, %v725_v6  ;;  %v675_v59 = vsel %vm674_vm9, %v7007_v29, %v7108_v15 }
 0x133   : > { %9406 = vst [vmem:[#allocation42_spill] sm:$0xff] %v7199_v48  ;;  %v935_v63 = vsel %vm530_vm1, %v7197_v0, -inf  ;;  %v822_v23 = vmul.f32 0.70710677, %v7199_v48  ;;  %v1129_v7 = vsel %vm530_vm1, %v7202_v3, -inf  ;;  %1127 = vmax.xlane.f32.xlu0 %v1126_v34  ;;  %v678_v5 = vsel %vm676_vm10, %v677_v40, %v675_v59  ;;  %v7228_v59 = vpop.permute.xlu1 %871 }
 0x134   : > { %v6202_v14 = vpop.eup %6201  ;;  %v938_v26 = vmax.f32 %v933_v27, %v940_v12  ;;  %6203 = vpow2.f32 %v752_v9  ;;  %v724_v51 = vmul.f32 1.6666666, %v678_v5  ;;  %v694_v6 = vmul.f32 %v7071_v25, %v7018_v8  ;;  %9409 = vst [vmem:[#allocation45_spill] sm:$0xff] %v7228_v59 }
 0x135   : > { %v7220_v15 = vsub.f32 %v7204_v2, %v822_v23  ;;  %v7222_v55 = vadd.f32 -1.0, %v6202_v14  ;;  %v7225_v52 = vsub.f32 %v6914_v10, %v822_v23  ;;  %vm695_vm11 = vcmp.eq.f32.partialorder %v7018_v8, inf }
 0x136   : > { %v944_v34 = vmax.f32 %v935_v63, %v938_v26  ;;  %1124 = vmax.xlane.f32.xlu1 %v1123_v60  ;;  %v750_v29 = vmul.f32 1.442695, %v724_v51  ;;  %v696_v9 = vsel %vm695_vm11, %v7018_v8, %v694_v6  ;;  %vm697_vm12 = vcmp.eq.f32.partialorder %v7018_v8, 0.0 }
 0x137   : > { %9408 = vst [vmem:[#allocation44_spill] sm:$0xff] %v7222_v55  ;;  %v939_v25 = vsel %vm530_vm1, %v7220_v15, -inf  ;;  %v821_v40 = vmul.f32 0.70710677, %v7222_v55  ;;  %v1135_v27 = vsel %vm530_vm1, %v7225_v52, -inf  ;;  %v698_v12 = vand.u32 2147483648, %v7018_v8 }
 0x138   : > { %v942_v23 = vmax.f32 %v939_v25, %v944_v34  ;;  %6205 = vpow2.f32 %v750_v29  ;;  %v687_v60 = vmul.f32 %v7081_v28, %v7022_v17  ;;  %vm688_vm13 = vcmp.eq.f32.partialorder %v7022_v17, inf }
 0x139   : > { %v7242_v51 = vsub.f32 %v7228_v59, %v821_v40  ;;  %v7245_v63 = vsub.f32 %v6914_v10, %v821_v40  ;;  %v699_v5 = vsel %vm697_vm12, %v698_v12, %v696_v9  ;;  %vm690_vm14 = vcmp.eq.f32.partialorder %v7022_v17, 0.0 }
 0x13a   : > { %1130 = vmax.xlane.f32.xlu1 %v1129_v7  ;;  %v727_v14 = vmul.f32 1.6666666, %v699_v5  ;;  %v689_v8 = vsel %vm688_vm13, %v7022_v17, %v687_v60  ;;  %v691_v26 = vand.u32 2147483648, %v7022_v17  ;;  %v708_v28 = vmul.f32 %v7094_v54, %v7041_v38 }
 0x13b   : > { %v937_v6 = vsel %vm530_vm1, %v7242_v51, -inf  ;;  %v1132_v34 = vsel %vm530_vm1, %v7245_v63, -inf  ;;  %vm709_vm15 = vcmp.eq.f32.partialorder %v7041_v38, inf  ;;  %vm711_vm0 = vcmp.eq.f32.partialorder %v7041_v38, 0.0 }
 0x13c   : > { %v948_v29 = vmax.f32 %v937_v6, %v942_v23  ;;  %1133 = vmax.xlane.f32.xlu0 %v1132_v34  ;;  %v756_v7 = vmul.f32 1.442695, %v727_v14  ;;  %v692_v9 = vsel %vm690_vm14, %v691_v26, %v689_v8  ;;  %v710_v25 = vsel %vm709_vm15, %v7041_v38, %v708_v28  ;;  %v7270_v26 = vpop.permute.xlu0 %886 }
 0x13d   : > { %v726_v17 = vmul.f32 1.6666666, %v692_v9  ;;  %v712_v40 = vand.u32 2147483648, %v7041_v38  ;;  %v701_v54 = vmul.f32 %v7126_v57, %v7049_v43  ;;  %vm702_vm2 = vcmp.eq.f32.partialorder %v7049_v43, inf  ;;  %9411 = vst [vmem:[#allocation47_spill] sm:$0xff] %v7270_v26 }
 0x13e   : > { %v6204_v12 = vpop.eup %6203  ;;  %1136 = vmax.xlane.f32.xlu1 %v1135_v27  ;;  %6207 = vpow2.f32 %v756_v7  ;;  %vm704_vm3 = vcmp.eq.f32.partialorder %v7049_v43, 0.0  ;;  %v705_v23 = vand.u32 2147483648, %v7049_v43  ;;  %vm6703_vm4 = vmmov 0  }
 0x13f   : > { %v7265_v60 = vadd.f32 -1.0, %v6204_v12  ;;  %v754_v5 = vmul.f32 1.442695, %v726_v17  ;;  %v713_v14 = vsel %vm711_vm0, %v712_v40, %v710_v25  ;;  %v703_v8 = vsel %vm702_vm2, %v7049_v43, %v701_v54  ;;  %v7285_v54 = vpop.permute.xlu1 %881 }
 0x140   : > { %v729_v57 = vmul.f32 1.6666666, %v713_v14  ;;  %v706_v28 = vsel %vm704_vm3, %v705_v23, %v703_v8  ;;  %v9224_v34 = vmov 0.0   ;;  %v9242_v17 = vmov 1.0|1.0   ;;  %9413 = vst [vmem:[#allocation49_spill] sm:$0xff] %v7285_v54 }
 0x141   : > { %9410 = vst [vmem:[#allocation46_spill] sm:$0xff] %v7265_v60  ;;  %v824_v6 = vmul.f32 0.70710677, %v7265_v60  ;;  %6209 = vpow2.f32 %v754_v5  ;;  %v728_v27 = vmul.f32 1.6666666, %v706_v28  ;;  %5344 = vmatprep.mubr.msk.f32.mxu1 %vm6703_vm4, %v9224_v34  ;;  %5873 = vmatprep.subr.bf16.mxu0 %v9242_v17  ;;  %vm1084_vm5 = vcmask 516096  }
 0x142   : > { %v6206_v7 = vpop.eup %6205  ;;  %v760_v9 = vmul.f32 1.442695, %v729_v57  ;;  %5874 = vmatpush3.bf16.msra.mxu0 %v9242_v17  ;;  %vm1461_vm6 = vcmask 7168  }
 0x143   : > { %v7277_v38 = vsub.f32 %v7270_v26, %v824_v6  ;;  %v7279_v43 = vadd.f32 -1.0, %v6206_v7  ;;  %v7282_v25 = vsub.f32 %v6914_v10, %v824_v6  ;;  %v758_v40 = vmul.f32 1.442695, %v728_v27  ;;  %5875 = vmatprep.subr.bf16.mxu0 %v9242_v17 }
 0x144   : > { %6211 = vpow2.f32 %v760_v9  ;;  %v7307_v9 = vpop.permute.xlu0 %896 }
 0x145   : > { %9412 = vst [vmem:[#allocation48_spill] sm:$0xff] %v7279_v43  ;;  %v943_v12 = vsel %vm530_vm1, %v7277_v38, -inf  ;;  %v823_v23 = vmul.f32 0.70710677, %v7279_v43  ;;  %v1141_v5 = vsel %vm530_vm1, %v7282_v25, -inf  ;;  %6213 = vpow2.f32 %v758_v40  ;;  %9415 = vst [vmem:[#allocation51_spill] sm:$0xff] %v7307_v9 }
 0x146   : > { %v946_v14 = vmax.f32 %v943_v12, %v948_v29  ;;  %1142 = vmax.xlane.f32.xlu1 %v1141_v5  ;;  %5876 = vmatpush3.bf16.msra.mxu0 %v9242_v17 }
 0x147   : > { %v7294_v8 = vsub.f32 %v7285_v54, %v823_v23  ;;  %v7297_v57 = vsub.f32 %v6914_v10, %v823_v23  ;;  %5877 = vmatprep.subr.bf16.mxu0 %v9242_v17  ;;  %v7310_v23 = vpop.permute.xlu1 %891 }
 0x148   : > { %v6208_v28 = vpop.eup %6207  ;;  %9416 = vst [vmem:[#allocation52_spill] sm:$0xff] %v7310_v23 }
 0x149   : > { %v941_v6 = vsel %vm530_vm1, %v7294_v8, -inf  ;;  %v7303_v27 = vadd.f32 -1.0, %v6208_v28  ;;  %v1138_v29 = vsel %vm530_vm1, %v7297_v57, -inf }
 0x14a   : > { %v953_v7 = vmax.f32 %v946_v14, %v941_v6  ;;  %1139 = vmax.xlane.f32.xlu0 %v1138_v29  ;;  %5878 = vmatpush3.bf16.msra.mxu0 %v9242_v17 }
 0x14b   : > { %9414 = vst [vmem:[#allocation50_spill] sm:$0xff] %v7303_v27  ;;  %v6210_v40 = vpop.eup %6209  ;;  %v826_v12 = vmul.f32 0.70710677, %v7303_v27  ;;  %5879 = vmatprep.subr.bf16.mxu0 %v9242_v17  ;;  %v7341_v22 = vpop.permute.xlu1 %901 }
 0x14c   : > { %v7313_v5 = vadd.f32 -1.0, %v6210_v40  ;;  %9421 = vst [vmem:[#allocation57_spill] sm:$0xff] %v7341_v22 }
 0x14d   : > { %v7317_v28 = vsub.f32 %v7307_v9, %v826_v12  ;;  %v7320_v34 = vsub.f32 %v6914_v10, %v826_v12  ;;  %v7333_v12 = vpop.permute.xlu0 %906 }
 0x14e   : > { %9417 = vst [vmem:[#allocation53_spill] sm:$0xff] %v7313_v5  ;;  %v6212_v14 = vpop.eup %6211  ;;  %v825_v6 = vmul.f32 0.70710677, %v7313_v5  ;;  %5880 = vmatpush3.bf16.msra.mxu0 %v9242_v17  ;;  %9419 = vst [vmem:[#allocation55_spill] sm:$0xff] %v7333_v12 }
 0x14f   : > { %v6214_v29 = vpop.eup %6213  ;;  %v947_v50 = vsel %vm530_vm1, %v7317_v28, -inf  ;;  %v7325_v54 = vadd.f32 -1.0, %v6212_v14  ;;  %v1147_v40 = vsel %vm530_vm1, %v7320_v34, -inf }
 0x150   : > { %v952_v26 = vmax.f32 %v947_v50, %v953_v7  ;;  %v7331_v9 = vsub.f32 %v7310_v23, %v825_v6  ;;  %v7335_v59 = vadd.f32 -1.0, %v6214_v29  ;;  %1148 = vmax.xlane.f32.xlu1 %v1147_v40  ;;  %v7338_v2 = vsub.f32 %v6914_v10, %v825_v6 }
 0x151   : > { %9418 = vst [vmem:[#allocation54_spill] sm:$0xff] %v7325_v54  ;;  %v828_v14 = vmul.f32 0.70710677, %v7325_v54 }
 0x152   : > { %9420 = vst [vmem:[#allocation56_spill] sm:$0xff] %v7335_v59  ;;  %v945_v32 = vsel %vm530_vm1, %v7331_v9, -inf  ;;  %v827_v50 = vmul.f32 0.70710677, %v7335_v59  ;;  %v1144_v7 = vsel %vm530_vm1, %v7338_v2, -inf }
 0x153   : > { %v950_v17 = vmax.f32 %v945_v32, %v952_v26  ;;  %v7349_v29 = vsub.f32 %v7333_v12, %v828_v14  ;;  %1145 = vmax.xlane.f32.xlu0 %v1144_v7  ;;  %v7352_v6 = vsub.f32 %v6914_v10, %v828_v14 }
 0x154   : > { %v923_v40 = vsub.f32 %v7341_v22, %v827_v50  ;;  %v7356_v23 = vsub.f32 %v6914_v10, %v827_v50 }
 0x155   : > { %v951_v20 = vsel %vm530_vm1, %v7349_v29, -inf  ;;  %v1153_v39 = vsel %vm530_vm1, %v7352_v6, -inf }
 0x156   : > { %v954_v46 = vmax.f32 %v950_v17, %v951_v20  ;;  %1154 = vmax.xlane.f32.xlu1 %v1153_v39  ;;  %v1150_v32 = vsel %vm530_vm1, %v7356_v23, -inf  ;;  %v949_v26 = vsel %vm530_vm1, %v923_v40, -inf }
 0x157   : > { %1151 = vmax.xlane.f32.xlu0 %v1150_v32 }
 0x158   : > { %v955_v14 = vmax.f32 %v949_v26, %v954_v46 }
 0x15a   : > { %v956_v7 = vrot.slane %v955_v14, 4 }
 0x15c   : > { %v957_v22 = vmax.f32 %v955_v14, %v956_v7 }
 0x15e   : > { %v958_v12 = vrot.slane %v957_v22, 2 }
 0x160   : > { %v959_v50 = vmax.f32 %v957_v22, %v958_v12 }
 0x162   : > { %v960_v35 = vrot.slane %v959_v50, 1 }
 0x164   : > { %v7365_v11 = vmax.f32 %v959_v50, %v960_v35 }
 0x166   : > { %v976_v37 = vsub.f32 %v923_v40, %v7365_v11  ;;  %v962_v20 = vsub.f32 %v7152_v33, %v7365_v11  ;;  %v963_v39 = vsub.f32 %v7074_v21, %v7365_v11  ;;  %v964_v17 = vsub.f32 %v7111_v19, %v7365_v11 }
 0x167   : > { %v965_v46 = vsub.f32 %v7119_v53, %v7365_v11  ;;  %v966_v22 = vsub.f32 %v7145_v1, %v7365_v11  ;;  %v967_v40 = vsub.f32 %v7162_v16, %v7365_v11  ;;  %v968_v33 = vsub.f32 %v7185_v56, %v7365_v11 }
 0x168   : > { %v1006_v12 = vmul.f32 1.442695, %v976_v37  ;;  %v978_v35 = vmul.f32 1.442695, %v962_v20  ;;  %v980_v32 = vmul.f32 1.442695, %v963_v39  ;;  %v969_v19 = vsub.f32 %v7197_v0, %v7365_v11 }
 0x169   : > { %v982_v26 = vmul.f32 1.442695, %v964_v17  ;;  %v984_v21 = vmul.f32 1.442695, %v965_v46  ;;  %v986_v53 = vmul.f32 1.442695, %v966_v22  ;;  %v970_v1 = vsub.f32 %v7242_v51, %v7365_v11 }
 0x16a   : > { %6215 = vpow2.f32 %v1006_v12  ;;  %v988_v37 = vmul.f32 1.442695, %v967_v40  ;;  %v971_v14 = vsub.f32 %v7220_v15, %v7365_v11  ;;  %v990_v16 = vmul.f32 1.442695, %v968_v33 }
 0x16b   : > { %6217 = vpow2.f32 %v978_v35  ;;  %v972_v56 = vsub.f32 %v7294_v8, %v7365_v11  ;;  %v992_v7 = vmul.f32 1.442695, %v969_v19  ;;  %v973_v0 = vsub.f32 %v7277_v38, %v7365_v11 }
 0x16c   : > { %6219 = vpow2.f32 %v980_v32  ;;  %v994_v50 = vmul.f32 1.442695, %v970_v1  ;;  %v974_v51 = vsub.f32 %v7331_v9, %v7365_v11  ;;  %v996_v20 = vmul.f32 1.442695, %v971_v14 }
 0x16d   : > { %6221 = vpow2.f32 %v982_v26  ;;  %v975_v15 = vsub.f32 %v7317_v28, %v7365_v11  ;;  %v998_v39 = vmul.f32 1.442695, %v972_v56  ;;  %v977_v8 = vsub.f32 %v7349_v29, %v7365_v11 }
 0x16e   : > { %6223 = vpow2.f32 %v984_v21  ;;  %v1000_v17 = vmul.f32 1.442695, %v973_v0  ;;  %v1002_v46 = vmul.f32 1.442695, %v974_v51  ;;  %v9422_v21 = vmov 0.0|0.0  }
 0x16f   : > { %6225 = vpow2.f32 %v986_v53  ;;  %v1004_v22 = vmul.f32 1.442695, %v975_v15  ;;  %v1008_v9 = vmul.f32 1.442695, %v977_v8 }
 0x170   : > { %6227 = vpow2.f32 %v988_v37 }
 0x171   : > { %6229 = vpow2.f32 %v990_v16 }
 0x172   : > { %6231 = vpow2.f32 %v992_v7 }
 0x173   : > { %6233 = vpow2.f32 %v994_v50 }
 0x174   : > { %v6216_v38 = vpop.eup %6215  ;;  %6235 = vpow2.f32 %v996_v20 }
 0x175   : > { %v6218_v12 = vpop.eup %6217  ;;  %6237 = vpow2.f32 %v998_v39 }
 0x176   : > { %v6220_v35 = vpop.eup %6219  ;;  %6239 = vpow2.f32 %v1000_v17  ;;  %v9262_v17 = vmov 1.0  }
 0x177   : > { %v6222_v32 = vpop.eup %6221  ;;  %v5850_v40 = vpack.c.bf16 %v6220_v35, %v6218_v12  ;;  %6241 = vpow2.f32 %v1002_v46 }
 0x178   : > { %v6224_v28 = vpop.eup %6223  ;;  %6243 = vpow2.f32 %v1004_v22 }
 0x179   : > { %v6226_v26 = vpop.eup %6225  ;;  %5851 = vmatpush3.bf16.msra.mxu1 %v5850_v40  ;;  %v5853_v29 = vpack.c.bf16 %v6224_v28, %v6222_v32  ;;  %6245 = vpow2.f32 %v1008_v9 }
 0x17a   : > { %v6228_v33 = vpop.eup %6227  ;;  %5852 = vmatprep.subr.bf16.mxu1 %v9422_v21 }
 0x17b   : > { %v6230_v19 = vpop.eup %6229  ;;  %v5856_v53 = vpack.c.bf16 %v6228_v33, %v6226_v26 }
 0x17c   : > { %v6232_v1 = vpop.eup %6231 }
 0x17d   : > { %v6234_v37 = vpop.eup %6233  ;;  %5854 = vmatpush3.bf16.msra.mxu1 %v5853_v29  ;;  %v5859_v14 = vpack.c.bf16 %v6232_v1, %v6230_v19 }
 0x17e   : > { %v6236_v16 = vpop.eup %6235  ;;  %5855 = vmatprep.subr.bf16.mxu1 %v9422_v21 }
 0x17f   : > { %v6238_v56 = vpop.eup %6237  ;;  %v5862_v7 = vpack.c.bf16 %v6236_v16, %v6234_v37 }
 0x180   : > { %v6240_v0 = vpop.eup %6239 }
 0x181   : > { %v6242_v50 = vpop.eup %6241  ;;  %5857 = vmatpush3.bf16.msra.mxu1 %v5856_v53  ;;  %v5865_v51 = vpack.c.bf16 %v6240_v0, %v6238_v56 }
 0x182   : > { %v6244_v20 = vpop.eup %6243  ;;  %5858 = vmatprep.subr.bf16.mxu1 %v9422_v21 }
 0x183   : > { %v6246_v15 = vpop.eup %6245  ;;  %v5868_v39 = vpack.c.bf16 %v6244_v20, %v6242_v50 }
 0x184   : > { %v5871_v8 = vpack.c.bf16 %v6246_v15, %v6216_v38 }
 0x185   : > { %5860 = vmatpush3.bf16.msra.mxu1 %v5859_v14 }
 0x186   : > { %5861 = vmatprep.subr.bf16.mxu1 %v9422_v21 }
 0x189   : > { %5863 = vmatpush3.bf16.msra.mxu1 %v5862_v7 }
 0x18a   : > { %5864 = vmatprep.subr.bf16.mxu1 %v9422_v21 }
 0x18d   : > { %5866 = vmatpush3.bf16.msra.mxu1 %v5865_v51 }
 0x18e   : > { %5867 = vmatprep.subr.bf16.mxu1 %v9422_v21 }
 0x191   : > { %5869 = vmatpush3.bf16.msra.mxu1 %v5868_v39 }
 0x192   : > { %5870 = vmatprep.subr.bf16.mxu1 %v9422_v21 }
 0x195   : > { %5872 = vmatpush3.bf16.msra.mxu1 %v5871_v8 }
 0x198   : > { %5345 = vmatmul.mubr.f32.vlgmr.msra.gmra.mrb[16].mxu1 %v9262_v17 }
 0x1af   : > { %v7406_v46 = vpop.xlane.xlu0 %1112 }
 0x1b0   : > { %v1157_v12 = vsub.f32 %v7077_v13, %v7406_v46 }
 0x1b2   : > { %v1174_v26 = vmul.f32 1.442695, %v1157_v12 }
 0x1b6   : > { %v7408_v22 = vpop.xlane.xlu0 %1115 }
 0x1b7   : > { %v1158_v38 = vsub.f32 %v7116_v61, %v7408_v22 }
 0x1b9   : > { %v1176_v32 = vmul.f32 1.442695, %v1158_v38 }
 0x1ba   : > { %v7414_v9 = vpop.xlane.xlu0 %1121 }
 0x1bb   : > { %v7416_v35 = vpop.xlane.xlu1 %1109  ;;  %v1160_v40 = vsub.f32 %v7149_v36, %v7414_v9  ;;  %6247 = vpow2.f32 %v1176_v32 }
 0x1bc   : > { %v1156_v28 = vsub.f32 %v7155_v31, %v7416_v35 }
 0x1bd   : > { %v1180_v61 = vmul.f32 1.442695, %v1160_v40 }
 0x1be   : > { %v1172_v29 = vmul.f32 1.442695, %v1156_v28 }
 0x1bf   : > { %v7422_v33 = vpop.xlane.xlu1 %1118 }
 0x1c0   : > { %6249 = vpow2.f32 %v1172_v29  ;;  %v1159_v13 = vsub.f32 %v7124_v30, %v7422_v33  ;;  %v7426_v21 = vpop.xlane.xlu0 %1127 }
 0x1c1   : > { %6251 = vpow2.f32 %v1174_v26  ;;  %v1162_v19 = vsub.f32 %v7189_v44, %v7426_v21 }
 0x1c2   : > { %v1178_v36 = vmul.f32 1.442695, %v1159_v13  ;;  %6253 = vpow2.f32 %v1180_v61 }
 0x1c3   : > { %v7430_v53 = vpop.xlane.xlu1 %1124  ;;  %v1184_v31 = vmul.f32 1.442695, %v1162_v19 }
 0x1c4   : > { %6255 = vpow2.f32 %v1178_v36  ;;  %v1161_v1 = vsub.f32 %v7165_v45, %v7430_v53 }
 0x1c5   : > { %6257 = vpow2.f32 %v1184_v31  ;;  %v6248_v16 = vpop.eup %6247 }
 0x1c6   : > { %v1182_v37 = vmul.f32 1.442695, %v1161_v1 }
 0x1c7   : > { %v7434_v14 = vpop.xlane.xlu1 %1130 }
 0x1c8   : > { %6259 = vpow2.f32 %v1182_v37  ;;  %v1163_v30 = vsub.f32 %v7202_v3, %v7434_v14 }
 0x1c9   : > { %v7438_v56 = vpop.xlane.xlu0 %1133 }
 0x1ca   : > { %v6250_v44 = vpop.eup %6249  ;;  %v1186_v7 = vmul.f32 1.442695, %v1163_v30  ;;  %v1164_v0 = vsub.f32 %v7245_v63, %v7438_v56 }
 0x1cb   : > { %v6252_v50 = vpop.eup %6251  ;;  %5363 = vmatprep.mubr.msk.f32.mxu0 %vm530_vm1, %v6250_v44  ;;  %v7443_v45 = vpop.xlane.xlu1 %1136 }
 0x1cc   : > { %6261 = vpow2.f32 %v1186_v7  ;;  %v1165_v51 = vsub.f32 %v7225_v52, %v7443_v45  ;;  %v1188_v20 = vmul.f32 1.442695, %v1164_v0  ;;  %5364 = vmatmul.mubr.msk.f32.vlgmr.msra.gmra.mrb[0].mxu0 %vm530_vm1, %v6252_v50  ;;  %v6254_v3 = vpop.eup %6253 }
 0x1cd   : > { %5366 = vmatprep.mubr.msk.f32.mxu0 %vm530_vm1, %v6248_v16 }
 0x1ce   : > { %v6256_v15 = vpop.eup %6255  ;;  %v1190_v39 = vmul.f32 1.442695, %v1165_v51  ;;  %6263 = vpow2.f32 %v1188_v20 }
 0x1cf   : > { %v6258_v63 = vpop.eup %6257 }
 0x1d0   : > { %6265 = vpow2.f32 %v1190_v39  ;;  %5367 = vmatmul.mubr.msk.f32.gmra.mrb[2].mxu0 %vm530_vm1, %v6256_v15 }
 0x1d1   : > { %5369 = vmatprep.mubr.msk.f32.mxu0 %vm530_vm1, %v6254_v3 }
 0x1d2   : > { %v6260_v8 = vpop.eup %6259 }
 0x1d3   : > { %v7451_v38 = vpop.xlane.xlu1 %1142 }
 0x1d4   : > { %v1167_v52 = vsub.f32 %v7282_v25, %v7451_v38  ;;  %5370 = vmatmul.mubr.msk.f32.gmra.mrb[4].mxu0 %vm530_vm1, %v6260_v8 }
 0x1d5   : > { %5372 = vmatprep.mubr.msk.f32.mxu0 %vm530_vm1, %v6258_v63 }
 0x1d6   : > { %v6262_v12 = vpop.eup %6261  ;;  %v1194_v32 = vmul.f32 1.442695, %v1167_v52 }
 0x1d7   : > { %v7457_v40 = vpop.xlane.xlu0 %1139 }
 0x1d8   : > { %v6264_v28 = vpop.eup %6263  ;;  %v1166_v26 = vsub.f32 %v7297_v57, %v7457_v40  ;;  %5373 = vmatmul.mubr.msk.f32.gmra.mrb[6].mxu0 %vm530_vm1, %v6262_v12  ;;  %6267 = vpow2.f32 %v1194_v32 }
 0x1d9   : > { %5375 = vmatprep.mubr.msk.f32.mxu0 %vm530_vm1, %v6264_v28 }
 0x1da   : > { %v6266_v29 = vpop.eup %6265  ;;  %v1192_v61 = vmul.f32 1.442695, %v1166_v26 }
 0x1dc   : > { %6269 = vpow2.f32 %v1192_v61  ;;  %5376 = vmatmul.mubr.msk.f32.gmra.mrb[8].mxu0 %vm530_vm1, %v6266_v29 }
 0x1dd   : > { %v7464_v25 = vpop.xlane.xlu1 %1148 }
 0x1de   : > { %v1169_v13 = vsub.f32 %v7320_v34, %v7464_v25 }
 0x1e0   : > { %v1198_v19 = vmul.f32 1.442695, %v1169_v13  ;;  %v7468_v36 = vpop.xlane.xlu0 %1145 }
 0x1e1   : > { %v1168_v57 = vsub.f32 %v7338_v2, %v7468_v36 }
 0x1e2   : > { %6271 = vpow2.f32 %v1198_v19  ;;  %v6268_v16 = vpop.eup %6267 }
 0x1e3   : > { %v1196_v31 = vmul.f32 1.442695, %v1168_v57  ;;  %v7472_v1 = vpop.xlane.xlu1 %1154 }
 0x1e4   : > { %v1171_v37 = vsub.f32 %v7352_v6, %v7472_v1  ;;  %v7476_v30 = vpop.xlane.xlu0 %1151 }
 0x1e5   : > { %6273 = vpow2.f32 %v1196_v31  ;;  %v1170_v34 = vsub.f32 %v7356_v23, %v7476_v30 }
 0x1e6   : > { %v6270_v44 = vpop.eup %6269  ;;  %v1202_v7 = vmul.f32 1.442695, %v1171_v37 }
 0x1e7   : > { %v1200_v0 = vmul.f32 1.442695, %v1170_v34  ;;  %5378 = vmatprep.mubr.msk.f32.mxu0 %vm530_vm1, %v6270_v44 }
 0x1e8   : > { %6275 = vpow2.f32 %v1202_v7  ;;  %5379 = vmatmul.mubr.msk.f32.gmra.mrb[10].mxu0 %vm530_vm1, %v6268_v16 }
 0x1e9   : > { %6277 = vpow2.f32 %v1200_v0 }
 0x1ec   : > { %v6272_v2 = vpop.eup %6271 }
 0x1ef   : > { %v6274_v50 = vpop.eup %6273 }
 0x1f0   : > { %5381 = vmatprep.mubr.msk.f32.mxu0 %vm530_vm1, %v6274_v50 }
 0x1f1   : > { %5382 = vmatmul.mubr.msk.f32.gmra.mrb[12].mxu0 %vm530_vm1, %v6272_v2 }
 0x1f2   : > { %v6276_v6 = vpop.eup %6275 }
 0x1f3   : > { %v6278_v51 = vpop.eup %6277 }
 0x1f4   : > { %5384 = vmatprep.mubr.msk.f32.mxu0 %vm530_vm1, %v6278_v51 }
 0x1f5   : > { %5385 = vmatmul.mubr.msk.f32.gmra.mrb[14].mxu0 %vm530_vm1, %v6276_v6 }
 0x26b   : > { %v1076_v23 = vpop.f32.mrb[16].mxu1 }
 0x26c   : > { %6279 = vlog2.f32 %v1076_v23  ;;  %v5346_v20 = vpop.f32.mrb[17].mxu1 }
 0x276   : > { %v6280_v3 = vpop.eup %6279 }
 0x277   : > { %v1081_v15 = vmul.f32 0.6931472, %v6280_v3 }
 0x279   : > { %v1082_v39 = vadd.f32 %v1081_v15, %v7365_v11 }
 0x27b   : > { %v1083_v63 = vmul.f32 -1.4142135, %v1082_v39 }
 0x27d   : > { %1085 = vst.msk [vmem:[#allocation2] sm:$0x1] %vm1084_vm5, %v1083_v63 }
 0x29f   : > { %v5365_v8 = vpop.f32.mrb[0].mxu0 }
 0x2a0   : > { %6281 = vlog2.f32 %v5365_v8  ;;  %v1318_v52 = vpop.f32.mrb[1].mxu0 }
 0x2a1   : > { %6283 = vlog2.f32 %v1318_v52 }
 0x2a3   : > { %v5368_v12 = vpop.f32.mrb[2].mxu0 }
 0x2a4   : > { %6285 = vlog2.f32 %v5368_v12  ;;  %v1328_v32 = vpop.f32.mrb[3].mxu0 }
 0x2a5   : > { %6287 = vlog2.f32 %v1328_v32 }
 0x2a7   : > { %v5371_v28 = vpop.f32.mrb[4].mxu0 }
 0x2a8   : > { %6289 = vlog2.f32 %v5371_v28  ;;  %v1338_v26 = vpop.f32.mrb[5].mxu0 }
 0x2a9   : > { %6291 = vlog2.f32 %v1338_v26 }
 0x2aa   : > { %v6282_v29 = vpop.eup %6281 }
 0x2ab   : > { %v6284_v61 = vpop.eup %6283  ;;  %v1400_v13 = vmul.f32 0.6931472, %v6282_v29  ;;  %v5374_v11 = vpop.f32.mrb[6].mxu0 }
 0x2ac   : > { %v1398_v19 = vmul.f32 0.6931472, %v6284_v61  ;;  %6293 = vlog2.f32 %v5374_v11  ;;  %v1348_v57 = vpop.f32.mrb[7].mxu0 }
 0x2ad   : > { %v1430_v31 = vadd.f32 %v1400_v13, %v7406_v46  ;;  %6295 = vlog2.f32 %v1348_v57 }
 0x2ae   : > { %v6286_v37 = vpop.eup %6285  ;;  %v1429_v16 = vadd.f32 %v1398_v19, %v7416_v35 }
 0x2af   : > { %v6288_v34 = vpop.eup %6287  ;;  %v1446_v44 = vmul.f32 -1.4142135, %v1430_v31  ;;  %v1404_v7 = vmul.f32 0.6931472, %v6286_v37  ;;  %v5377_v0 = vpop.f32.mrb[8].mxu0 }
 0x2b0   : > { %v1445_v2 = vmul.f32 -1.4142135, %v1429_v16  ;;  %v1402_v50 = vmul.f32 0.6931472, %v6288_v34  ;;  %6297 = vlog2.f32 %v5377_v0  ;;  %v1358_v6 = vpop.f32.mrb[9].mxu0 }
 0x2b1   : > { %1463 = vst.msk [vmem:[#allocation3 + $0x8] sm:$0xff] %vm1461_vm6, %v1446_v44  ;;  %v1432_v51 = vadd.f32 %v1404_v7, %v7422_v33  ;;  %6299 = vlog2.f32 %v1358_v6 }
 0x2b2   : > { %v6290_v23 = vpop.eup %6289  ;;  %1462 = vst.msk [vmem:[#allocation3] sm:$0xff] %vm1461_vm6, %v1445_v2  ;;  %v1431_v46 = vadd.f32 %v1402_v50, %v7408_v22 }
 0x2b3   : > { %v6292_v20 = vpop.eup %6291  ;;  %v1448_v35 = vmul.f32 -1.4142135, %v1432_v51  ;;  %v1408_v3 = vmul.f32 0.6931472, %v6290_v23 }
 0x2b4   : > { %v1447_v15 = vmul.f32 -1.4142135, %v1431_v46  ;;  %v1406_v39 = vmul.f32 0.6931472, %v6292_v20 }
 0x2b5   : > { %1465 = vst.msk [vmem:[#allocation3 + $0x18] sm:$0xff] %vm1461_vm6, %v1448_v35  ;;  %v1434_v63 = vadd.f32 %v1408_v3, %v7430_v53 }
 0x2b6   : > { %v6294_v8 = vpop.eup %6293  ;;  %1464 = vst.msk [vmem:[#allocation3 + $0x10] sm:$0xff] %vm1461_vm6, %v1447_v15  ;;  %v1433_v33 = vadd.f32 %v1406_v39, %v7414_v9 }
 0x2b7   : > { %v6296_v52 = vpop.eup %6295  ;;  %v1450_v12 = vmul.f32 -1.4142135, %v1434_v63  ;;  %v1412_v32 = vmul.f32 0.6931472, %v6294_v8 }
 0x2b8   : > { %v1449_v28 = vmul.f32 -1.4142135, %v1433_v33  ;;  %v1410_v26 = vmul.f32 0.6931472, %v6296_v52 }
 0x2b9   : > { %1467 = vst.msk [vmem:[#allocation3 + $0x28] sm:$0xff] %vm1461_vm6, %v1450_v12  ;;  %v1436_v22 = vadd.f32 %v1412_v32, %v7434_v14 }
 0x2ba   : > { %v6298_v29 = vpop.eup %6297  ;;  %1466 = vst.msk [vmem:[#allocation3 + $0x20] sm:$0xff] %vm1461_vm6, %v1449_v28  ;;  %v1435_v61 = vadd.f32 %v1410_v26, %v7426_v21 }
 0x2bb   : > { %v6300_v53 = vpop.eup %6299  ;;  %v1452_v13 = vmul.f32 -1.4142135, %v1436_v22  ;;  %v1416_v11 = vmul.f32 0.6931472, %v6298_v29  ;;  %v5380_v19 = vpop.f32.mrb[10].mxu0 }
 0x2bc   : > { %v1451_v57 = vmul.f32 -1.4142135, %v1435_v61  ;;  %v1414_v9 = vmul.f32 0.6931472, %v6300_v53  ;;  %6301 = vlog2.f32 %v5380_v19  ;;  %v1368_v31 = vpop.f32.mrb[11].mxu0 }
 0x2bd   : > { %1469 = vst.msk [vmem:[#allocation3 + $0x38] sm:$0xff] %vm1461_vm6, %v1452_v13  ;;  %v1438_v37 = vadd.f32 %v1416_v11, %v7443_v45  ;;  %6303 = vlog2.f32 %v1368_v31 }
 0x2be   : > { %1468 = vst.msk [vmem:[#allocation3 + $0x30] sm:$0xff] %vm1461_vm6, %v1451_v57  ;;  %v1437_v14 = vadd.f32 %v1414_v9, %v7438_v56 }
 0x2bf   : > { %v1454_v16 = vmul.f32 -1.4142135, %v1438_v37 }
 0x2c0   : > { %v1453_v34 = vmul.f32 -1.4142135, %v1437_v14 }
 0x2c1   : > { %1471 = vst.msk [vmem:[#allocation3 + $0x48] sm:$0xff] %vm1461_vm6, %v1454_v16 }
 0x2c2   : > { %1470 = vst.msk [vmem:[#allocation3 + $0x40] sm:$0xff] %vm1461_vm6, %v1453_v34 }
 0x2c4   : > { %v5383_v21 = vpop.f32.mrb[12].mxu0 }
 0x2c5   : > { %6305 = vlog2.f32 %v5383_v21  ;;  %v1378_v44 = vpop.f32.mrb[13].mxu0 }
 0x2c6   : > { %v6302_v7 = vpop.eup %6301  ;;  %6307 = vlog2.f32 %v1378_v44 }
 0x2c7   : > { %v6304_v0 = vpop.eup %6303  ;;  %v1420_v2 = vmul.f32 0.6931472, %v6302_v7 }
 0x2c8   : > { %v1418_v50 = vmul.f32 0.6931472, %v6304_v0  ;;  %v5386_v45 = vpop.f32.mrb[14].mxu0 }
 0x2c9   : > { %v1440_v6 = vadd.f32 %v1420_v2, %v7451_v38  ;;  %6309 = vlog2.f32 %v5386_v45  ;;  %v1388_v51 = vpop.f32.mrb[15].mxu0 }
 0x2ca   : > { %v1439_v56 = vadd.f32 %v1418_v50, %v7457_v40  ;;  %6311 = vlog2.f32 %v1388_v51 }
 0x2cb   : > { %v1456_v23 = vmul.f32 -1.4142135, %v1440_v6 }
 0x2cc   : > { %v1455_v46 = vmul.f32 -1.4142135, %v1439_v56 }
 0x2cd   : > { %1473 = vst.msk [vmem:[#allocation3 + $0x58] sm:$0xff] %vm1461_vm6, %v1456_v23 }
 0x2ce   : > { %1472 = vst.msk [vmem:[#allocation3 + $0x50] sm:$0xff] %vm1461_vm6, %v1455_v46 }
 0x2cf   : > { %v6306_v20 = vpop.eup %6305 }
 0x2d0   : > { %v6308_v35 = vpop.eup %6307  ;;  %v1424_v3 = vmul.f32 0.6931472, %v6306_v20 }
 0x2d1   : > { %v1422_v15 = vmul.f32 0.6931472, %v6308_v35 }
 0x2d2   : > { %v1442_v39 = vadd.f32 %v1424_v3, %v7464_v25 }
 0x2d3   : > { %v6310_v63 = vpop.eup %6309  ;;  %v1441_v38 = vadd.f32 %v1422_v15, %v7468_v36 }
 0x2d4   : > { %v6312_v8 = vpop.eup %6311  ;;  %v1458_v33 = vmul.f32 -1.4142135, %v1442_v39  ;;  %v1428_v52 = vmul.f32 0.6931472, %v6310_v63 }
 0x2d5   : > { %v1457_v40 = vmul.f32 -1.4142135, %v1441_v38  ;;  %v1426_v12 = vmul.f32 0.6931472, %v6312_v8 }
 0x2d6   : > { %1475 = vst.msk [vmem:[#allocation3 + $0x68] sm:$0xff] %vm1461_vm6, %v1458_v33  ;;  %v1444_v32 = vadd.f32 %v1428_v52, %v7472_v1 }
 0x2d7   : > { %1474 = vst.msk [vmem:[#allocation3 + $0x60] sm:$0xff] %vm1461_vm6, %v1457_v40  ;;  %v1443_v28 = vadd.f32 %v1426_v12, %v7476_v30 }
 0x2d8   : > { %v1460_v26 = vmul.f32 -1.4142135, %v1444_v32 }
 0x2d9   : > { %v1459_v22 = vmul.f32 -1.4142135, %v1443_v28 }
 0x2da   : > { %1477 = vst.msk [vmem:[#allocation3 + $0x78] sm:$0xff] %vm1461_vm6, %v1460_v26 }
 0x2db   : > { %1476 = vst.msk [vmem:[#allocation3 + $0x70] sm:$0xff] %vm1461_vm6, %v1459_v22 }
 0x2dc LB: >> { %v9423_v59 = vld [vmem:[#allocation56_spill] sm:$0xff]  ;;  %v9424_v54 = vld [vmem:[#allocation54_spill] sm:$0xff]  ;;  %v9425_v47 = vld [vmem:[#allocation35_spill] sm:$0xff]  ;;  %v6707_v1 = vmov 0   ;;  %v1485_v30 = vstv %s6693_s16  ;;  %s2253_s18 = smul.f32 0.5, %s6693_s16   ;;  %v9264_v2 = vmov 0.0|0.0   ;;  %s6693_s16 = sphi %s7520_s16, %s9470_s16   ;;  %s6697_s17 = sphi %s7522_s17, %s1483_s17  }
 0x2dd   : >> { %v9426_v42 = vld [vmem:[#allocation31_spill] sm:$0xff]  ;;  %v9427_v62 = vld [vmem:[#allocation29_spill] sm:$0xff]  ;;  %v9430_v43 = vld [vmem:[#allocation48_spill] sm:$0xff]  ;;  %6314 = vset.pattern.permute.xlu1 %v6707_v1  ;;  %6313 = vset.pattern.permute.xlu0 %v6707_v1  ;;  %6315 = vrcp.f32 %v1485_v30  ;;  %vm6710_vm7 = vmmov 0   ;;  %s1505_s20 = ssub.f32 0.0, %s6693_s16  ;;  %s1483_s17 = sadd.s32 1, %s6697_s17  }
 0x2de   : >> { %v9428_v10 = vld [vmem:[#allocation25_spill] sm:$0xff]  ;;  %v9431_v60 = vld [vmem:[#allocation46_spill] sm:$0xff]  ;;  %v9436_v18 = vld [vmem:[#allocation39_spill] sm:$0xff]  ;;  %5881 = vmatprep.subr.bf16.mxu0 %v9264_v2  ;;  %p1480_p9 = scmp.ge.s32.totalorder %s1483_s17, 8   ;;  %s9470_s16 = smov %s2253_s18 }
 0x2df   : >> { %v9429_v4 = vld [vmem:[#allocation33_spill] sm:$0xff]  ;;  %v9433_v27 = vld [vmem:[#allocation50_spill] sm:$0xff]  ;;  %v9437_v55 = vld [vmem:[#allocation44_spill] sm:$0xff]  ;;  %s4304_s21 = smul.f32 (%p1480_p9), 64.0, %s236_s6 }
 0x2e0   : >> { %v9432_v5 = vld [vmem:[#allocation53_spill] sm:$0xff]  ;;  %v9434_v41 = vld [vmem:[#allocation34_spill] sm:$0xff]  ;;  %v9439_v24 = vld [vmem:[#allocation40_spill] sm:$0xff] }
 0x2e1   : >> { %v9435_v58 = vld [vmem:[#allocation37_spill] sm:$0xff]  ;;  %v9438_v48 = vld [vmem:[#allocation42_spill] sm:$0xff]  ;;  %v7532_v36 = vld [vmem:[#allocation3] sm:$0xff] }
 0x2e2   : >> { %v7530_v25 = vld [vmem:[#allocation3 + $0x10] sm:$0xff]  ;;  %1508 = vperm.xlu0 %6313, %v7532_v36   ;;  %v7538_v29 = vld [vmem:[#allocation3 + $0x18] sm:$0xff]  ;;  %v7540_v61 = vld [vmem:[#allocation3 + $0x8] sm:$0xff] }
 0x2e3   : >> { %9440 = vst [vmem:[#allocation58_spill] sm:$0xff] %v7530_v25  ;;  %1518 = vperm.xlu1 %6314, %v7530_v25   ;;  %v7544_v53 = vld [vmem:[#allocation3 + $0x28] sm:$0xff]  ;;  %v7546_v13 = vld [vmem:[#allocation3 + $0x20] sm:$0xff]  ;;  %v7550_v11 = vld [vmem:[#allocation3 + $0x38] sm:$0xff] }
 0x2e4   : >> { %9441 = vst [vmem:[#allocation59_spill] sm:$0xff] %v7544_v53  ;;  %9442 = vst [vmem:[#allocation60_spill] sm:$0xff] %v7546_v13  ;;  %v7552_v19 = vld [vmem:[#allocation3 + $0x30] sm:$0xff]  ;;  %v7556_v9 = vld [vmem:[#allocation3 + $0x48] sm:$0xff] }
 0x2e5   : >> { %9443 = vst [vmem:[#allocation61_spill] sm:$0xff] %v7550_v11  ;;  %9444 = vst [vmem:[#allocation62_spill] sm:$0xff] %v7552_v19  ;;  %v1497_v31 = vld [vmem:[#allocation3 + $0x40] sm:$0xff]  ;;  %v1500_v37 = vld [vmem:[#allocation3 + $0x58] sm:$0xff] }
 0x2e6   : >> { %1513 = vperm.xlu0 %6313, %v7540_v61   ;;  %9445 = vst [vmem:[#allocation63_spill] sm:$0xff] %v7556_v9  ;;  %v1499_v14 = vld [vmem:[#allocation3 + $0x50] sm:$0xff]  ;;  %v1502_v16 = vld [vmem:[#allocation3 + $0x68] sm:$0xff]  ;;  %v1501_v34 = vld [vmem:[#allocation3 + $0x60] sm:$0xff] }
 0x2e7   : >> { %1523 = vperm.xlu1 %6314, %v7538_v29   ;;  %v6316_v57 = vpop.eup %6315  ;;  %v1504_v21 = vld [vmem:[#allocation3 + $0x78] sm:$0xff]  ;;  %v1503_v44 = vld [vmem:[#allocation3 + $0x70] sm:$0xff]  ;;  %v9446_v49 = vld [vmem:[#allocation24_spill] sm:$0xff] }
 0x2e8   : >> { %6107 = vpush %v6316_v57  ;;  %v7559_v7 = vld [vmem:[#allocation2] sm:$0x1] }
 0x2e9   : >> { %v7563_v0 = vrot.slane %v7559_v7, %v9446_v49 }
 0x2ea   : >> { %1528 = vperm.xlu0 %6313, %v7546_v13  }
 0x2eb   : >> { %1533 = vperm.xlu1 %6314, %v7544_v53   ;;  %v1802_v50 = vsub.f32 %v7563_v0, %v9427_v62  ;;  %v1801_v45 = vsub.f32 %v7563_v0, %v9425_v47  ;;  %v1805_v6 = vsub.f32 %v7563_v0, %v9434_v41  ;;  %v1803_v51 = vsub.f32 %v7563_v0, %v9426_v42 }
 0x2ec   : >> { %v1807_v23 = vsub.f32 %v7563_v0, %v9436_v18  ;;  %v1804_v46 = vsub.f32 %v7563_v0, %v9429_v4  ;;  %v1809_v33 = vsub.f32 %v7563_v0, %v9437_v55  ;;  %v1806_v52 = vsub.f32 %v7563_v0, %v9435_v58 }
 0x2ed   : >> { %v1811_v1 = vsub.f32 %v7563_v0, %v9430_v43  ;;  %v1808_v30 = vsub.f32 %v7563_v0, %v9439_v24 }
 0x2ee   : >> { %1538 = vperm.xlu0 %6313, %v7552_v19  }
 0x2ef   : >> { %1543 = vperm.xlu1 %6314, %v7550_v11  }
 0x2f2   : >> { %1548 = vperm.xlu0 %6313, %v1497_v31  }
 0x2f3   : >> { %1553 = vperm.xlu1 %6314, %v7556_v9  }
 0x2f6   : >> { %1558 = vperm.xlu0 %6313, %v1499_v14  }
 0x2f7   : >> { %1563 = vperm.xlu1 %6314, %v1500_v37  }
 0x2fa   : >> { %1568 = vperm.xlu0 %6313, %v1501_v34  }
 0x2fb   : >> { %1573 = vperm.xlu1 %6314, %v1502_v16  }
 0x2fe   : >> { %1578 = vperm.xlu0 %6313, %v1503_v44   ;;  %v1810_v44 = vsub.f32 %v7563_v0, %v9438_v48 }
 0x2ff   : >> { %1583 = vperm.xlu1 %6314, %v1504_v21   ;;  %v1813_v21 = vsub.f32 %v7563_v0, %v9432_v5 }
 0x319   : >> { %s6108_s19 = spop %6107 }
 0x31a   : >> { %v7574_v56 = vstv %s6108_s19 }
 0x31b   : >> { %v1818_v20 = vmul.f32 %v1802_v50, %v7574_v56  ;;  %v1817_v35 = vmul.f32 %v1801_v45, %v7574_v56  ;;  %v1821_v3 = vmul.f32 %v1805_v6, %v7574_v56  ;;  %v1819_v15 = vmul.f32 %v1803_v51, %v7574_v56 }
 0x31c   : >> { %v1823_v38 = vmul.f32 %v1807_v23, %v7574_v56  ;;  %v1820_v8 = vmul.f32 %v1804_v46, %v7574_v56  ;;  %v1825_v26 = vmul.f32 %v1809_v33, %v7574_v56  ;;  %v1822_v22 = vmul.f32 %v1806_v52, %v7574_v56 }
 0x31d   : >> { %v7585_v39 = vadd.f32 %v1818_v20, %v9428_v10  ;;  %v7588_v63 = vadd.f32 %v1817_v35, %v9428_v10  ;;  %v7601_v32 = vadd.f32 %v1821_v3, %v9428_v10  ;;  %v7604_v28 = vadd.f32 %v1819_v15, %v9428_v10 }
 0x31e   : >> { %v7617_v37 = vadd.f32 %v1823_v38, %v9428_v10  ;;  %v7620_v14 = vadd.f32 %v1820_v8, %v9428_v10  ;;  %v7623_v16 = vadd.f32 %v1825_v26, %v9428_v10  ;;  %v7626_v34 = vadd.f32 %v1822_v22, %v9428_v10 }
 0x31f   : >> { %v1852_v40 = vsel %vm530_vm1, %v7585_v39, -inf  ;;  %v1849_v12 = vsel %vm530_vm1, %v7588_v63, -inf  ;;  %v1861_v57 = vsel %vm530_vm1, %v7601_v32, -inf  ;;  %v1855_v31 = vsel %vm530_vm1, %v7604_v28, -inf }
 0x320   : >> { %1850 = vmax.xlane.f32.xlu0 %v1849_v12  ;;  %v1867_v50 = vsel %vm530_vm1, %v7617_v37, -inf  ;;  %v1858_v45 = vsel %vm530_vm1, %v7620_v14, -inf  ;;  %v1827_v6 = vmul.f32 %v1811_v1, %v7574_v56  ;;  %v1824_v51 = vmul.f32 %v1808_v30, %v7574_v56 }
 0x321   : >> { %v1873_v23 = vsel %vm530_vm1, %v7623_v16, -inf  ;;  %v1864_v46 = vsel %vm530_vm1, %v7626_v34, -inf  ;;  %v1815_v20 = vsub.f32 %v7563_v0, %v9423_v59  ;;  %v1812_v35 = vsub.f32 %v7563_v0, %v9431_v60 }
 0x322   : >> { %v7647_v3 = vadd.f32 %v1827_v6, %v9428_v10  ;;  %v7650_v15 = vadd.f32 %v1824_v51, %v9428_v10  ;;  %v1829_v38 = vmul.f32 %v1813_v21, %v7574_v56  ;;  %v1826_v8 = vmul.f32 %v1810_v44, %v7574_v56 }
 0x323   : >> { %1853 = vmax.xlane.f32.xlu1 %v1852_v40  ;;  %v1831_v33 = vmul.f32 %v1815_v20, %v7574_v56  ;;  %v1828_v52 = vmul.f32 %v1812_v35, %v7574_v56  ;;  %v1814_v40 = vsub.f32 %v7563_v0, %v9433_v27 }
 0x324   : >> { %1856 = vmax.xlane.f32.xlu0 %v1855_v31  ;;  %v1879_v12 = vsel %vm530_vm1, %v7647_v3, -inf  ;;  %v1870_v26 = vsel %vm530_vm1, %v7650_v15, -inf  ;;  %v7663_v22 = vadd.f32 %v1829_v38, %v9428_v10  ;;  %v7666_v1 = vadd.f32 %v1826_v8, %v9428_v10 }
 0x325   : >> { %v1830_v30 = vmul.f32 %v1814_v40, %v7574_v56  ;;  %v7676_v44 = vadd.f32 %v1831_v33, %v9428_v10  ;;  %v6711_v38 = vmov 0.0  }
 0x326   : >> { %v1885_v31 = vsel %vm530_vm1, %v7663_v22, -inf  ;;  %v1876_v21 = vsel %vm530_vm1, %v7666_v1, -inf  ;;  %5419 = vmatprep.mubr.msk.f32.mxu0 %vm6710_vm7, %v6711_v38 }
 0x327   : >> { %1862 = vmax.xlane.f32.xlu1 %v1861_v57  ;;  %v1816_v57 = vsub.f32 %v7563_v0, %v9424_v54  ;;  %v1891_v0 = vsel %vm530_vm1, %v7676_v44, -inf  ;;  %v7686_v51 = vadd.f32 %v1830_v30, %v9428_v10 }
 0x328   : >> { %1859 = vmax.xlane.f32.xlu0 %v1858_v45  ;;  %v6709_v45 = vmov 1.0|1.0  }
 0x329   : >> { %5905 = vmatprep.subr.bf16.mxu1 %v6709_v45 }
 0x32a   : >> { %5906 = vmatpush3.bf16.msra.mxu1 %v6709_v45 }
 0x32b   : >> { %1868 = vmax.xlane.f32.xlu1 %v1867_v50  ;;  %v7679_v50 = vadd.f32 %v1828_v52, %v9428_v10  ;;  %5907 = vmatprep.subr.bf16.mxu1 %v6709_v45 }
 0x32c   : >> { %1865 = vmax.xlane.f32.xlu0 %v1864_v46  ;;  %v1888_v46 = vsel %vm530_vm1, %v7686_v51, -inf }
 0x32d   : >> { %v1882_v6 = vsel %vm530_vm1, %v7679_v50, -inf }
 0x32e   : >> { %5908 = vmatpush3.bf16.msra.mxu1 %v6709_v45 }
 0x32f   : >> { %1874 = vmax.xlane.f32.xlu1 %v1873_v23  ;;  %v1832_v23 = vmul.f32 %v1816_v57, %v7574_v56  ;;  %5909 = vmatprep.subr.bf16.mxu1 %v6709_v45 }
 0x330   : >> { %1871 = vmax.xlane.f32.xlu0 %v1870_v26 }
 0x331   : >> { %v7692_v20 = vadd.f32 %v1832_v23, %v9428_v10 }
 0x332   : >> { %5910 = vmatpush3.bf16.msra.mxu1 %v6709_v45 }
 0x333   : >> { %1880 = vmax.xlane.f32.xlu1 %v1879_v12  ;;  %5911 = vmatprep.subr.bf16.mxu1 %v6709_v45  ;;  %v1894_v35 = vsel %vm530_vm1, %v7692_v20, -inf }
 0x334   : >> { %1877 = vmax.xlane.f32.xlu0 %v1876_v21 }
 0x336   : >> { %5912 = vmatpush3.bf16.msra.mxu1 %v6709_v45 }
 0x337   : >> { %1886 = vmax.xlane.f32.xlu1 %v1885_v31 }
 0x338   : >> { %1883 = vmax.xlane.f32.xlu0 %v1882_v6 }
 0x33b   : >> { %1892 = vmax.xlane.f32.xlu1 %v1891_v0 }
 0x33c   : >> { %1889 = vmax.xlane.f32.xlu0 %v1888_v46 }
 0x340   : >> { %1895 = vmax.xlane.f32.xlu0 %v1894_v35 }
 0x361   : >> { %v1509_v33 = vpop.permute.xlu0 %1508 }
 0x362   : >> { %v1519_v8 = vpop.permute.xlu1 %1518  ;;  %v1586_v21 = vsub.f32 %v1509_v33, %v9425_v47 }
 0x363   : >> { %v1588_v31 = vsub.f32 %v1519_v8, %v9426_v42 }
 0x364   : >> { %v1603_v8 = vmul.f32 %v7574_v56, %v1586_v21 }
 0x365   : >> { %v1514_v40 = vpop.permute.xlu0 %1513  ;;  %v1605_v2 = vmul.f32 %v7574_v56, %v1588_v31 }
 0x366   : >> { %v1524_v52 = vpop.permute.xlu1 %1523  ;;  %v1587_v6 = vsub.f32 %v1514_v40, %v9427_v62 }
 0x367   : >> { %v1589_v0 = vsub.f32 %v1524_v52, %v9429_v4 }
 0x369   : >> { %v1529_v26 = vpop.permute.xlu0 %1528  ;;  %v1606_v40 = vmul.f32 %v7574_v56, %v1589_v0  ;;  %v9448_v0 = vld [vmem:[#allocation36_spill] sm:$0xff] }
 0x36a   : >> { %v1534_v12 = vpop.permute.xlu1 %1533  ;;  %v1590_v23 = vsub.f32 %v1529_v26, %v9434_v41 }
 0x36b   : >> { %v1591_v45 = vsub.f32 %v1534_v12, %v9435_v58  ;;  %v1604_v12 = vmul.f32 %v7574_v56, %v1587_v6  ;;  %v9452_v58 = vld [vmem:[#allocation30_spill] sm:$0xff] }
 0x36d   : >> { %v1539_v57 = vpop.permute.xlu0 %1538  ;;  %v1608_v26 = vmul.f32 %v7574_v56, %v1591_v45 }
 0x36e   : >> { %v1544_v30 = vpop.permute.xlu1 %1543  ;;  %v1592_v35 = vsub.f32 %v1539_v57, %v9436_v18 }
 0x36f   : >> { %v1593_v46 = vsub.f32 %v1544_v30, %v9439_v24  ;;  %v1607_v30 = vmul.f32 %v7574_v56, %v1590_v23  ;;  %v9449_v23 = vld [vmem:[#allocation28_spill] sm:$0xff] }
 0x370   : >> { %v1609_v49 = vmul.f32 %v7574_v56, %v1592_v35  ;;  %v9450_v35 = vld [vmem:[#allocation26_spill] sm:$0xff] }
 0x371   : >> { %v1549_v17 = vpop.permute.xlu0 %1548  ;;  %v1610_v57 = vmul.f32 %v7574_v56, %v1593_v46  ;;  %v7725_v46 = vadd.f32 %v1606_v40, %v9449_v23  ;;  %v7728_v18 = vadd.f32 %v1604_v12, %v9450_v35  ;;  %v7734_v41 = vadd.f32 %v1607_v30, %v9452_v58  ;;  %v9455_v40 = vld [vmem:[#allocation43_spill] sm:$0xff]  ;;  %v9456_v12 = vld [vmem:[#allocation45_spill] sm:$0xff] }
 0x372   : >> { %v1554_v38 = vpop.permute.xlu1 %1553  ;;  %v1594_v52 = vsub.f32 %v1549_v17, %v9437_v55  ;;  %v7720_v55 = vadd.f32 %v1603_v8, %v9448_v0  ;;  %v9453_v8 = vld [vmem:[#allocation41_spill] sm:$0xff] }
 0x373   : >> { %v1595_v33 = vsub.f32 %v1554_v38, %v9438_v48  ;;  %v9447_v48 = vld [vmem:[#allocation27_spill] sm:$0xff] }
 0x374   : >> { %v1611_v21 = vmul.f32 %v7574_v56, %v1594_v52  ;;  %v7717_v17 = vadd.f32 %v1605_v2, %v9447_v48  ;;  %v1635_v30 = vsel %vm530_vm1, %v7720_v55, -inf }
 0x375   : >> { %v1612_v31 = vmul.f32 %v7574_v56, %v1595_v33  ;;  %v1559_v38 = vpop.permute.xlu0 %1558  ;;  %v9451_v33 = vld [vmem:[#allocation32_spill] sm:$0xff] }
 0x376   : >> { %v1564_v24 = vpop.permute.xlu1 %1563  ;;  %v1596_v45 = vsub.f32 %v1559_v38, %v9430_v43  ;;  %v7731_v52 = vadd.f32 %v1608_v26, %v9451_v33  ;;  %v9454_v38 = vld [vmem:[#allocation38_spill] sm:$0xff]  ;;  %v7748_v35 = vadd.f32 %v1611_v21, %v9456_v12  ;;  %v1637_v58 = vsel %vm530_vm1, %v7717_v17, -inf  ;;  %v9457_v21 = vld [vmem:[#allocation47_spill] sm:$0xff] }
 0x377   : >> { %v1597_v6 = vsub.f32 %v1564_v24, %v9431_v60  ;;  %v7739_v24 = vadd.f32 %v1610_v57, %v9453_v8  ;;  %v7742_v0 = vadd.f32 %v1609_v49, %v9454_v38  ;;  %v7745_v23 = vadd.f32 %v1612_v31, %v9455_v40  ;;  %v9458_v8 = vld [vmem:[#allocation49_spill] sm:$0xff]  ;;  %v9459_v60 = vld [vmem:[#allocation51_spill] sm:$0xff] }
 0x378   : >> { %v1613_v2 = vmul.f32 %v7574_v56, %v1596_v45  ;;  %v1638_v49 = vsel %vm530_vm1, %v7725_v46, -inf  ;;  %v1636_v31 = vsel %vm530_vm1, %v7728_v18, -inf  ;;  %v1641_v40 = vsel %vm530_vm1, %v7731_v52, -inf }
 0x379   : >> { %v1614_v48 = vmul.f32 %v7574_v56, %v1597_v6  ;;  %v1569_v33 = vpop.permute.xlu0 %1568  ;;  %v1639_v12 = vsel %vm530_vm1, %v7734_v41, -inf  ;;  %v1642_v62 = vmax.f32 %v1636_v31, %v1641_v40  ;;  %v9461_v40 = vld [vmem:[#allocation55_spill] sm:$0xff] }
 0x37a   : >> { %v1574_v26 = vpop.permute.xlu1 %1573  ;;  %v1598_v6 = vsub.f32 %v1569_v33, %v9432_v5  ;;  %v7764_v38 = vadd.f32 %v1613_v2, %v9458_v8  ;;  %v1649_v2 = vsel %vm530_vm1, %v7745_v23, -inf  ;;  %v1640_v42 = vmax.f32 %v1635_v30, %v1639_v12 }
 0x37b   : >> { %v1599_v57 = vsub.f32 %v1574_v26, %v9433_v27  ;;  %v7761_v45 = vadd.f32 %v1614_v48, %v9457_v21  ;;  %v1645_v27 = vsel %vm530_vm1, %v7739_v24, -inf  ;;  %v1643_v48 = vsel %vm530_vm1, %v7742_v0, -inf }
 0x37c   : >> { %v1615_v33 = vmul.f32 %v7574_v56, %v1598_v6  ;;  %v1647_v21 = vsel %vm530_vm1, %v7748_v35, -inf  ;;  %v1651_v9 = vsel %vm530_vm1, %v7764_v38, -inf  ;;  %v1650_v31 = vmax.f32 %v1642_v62, %v1649_v2 }
 0x37d   : >> { %v1616_v26 = vmul.f32 %v7574_v56, %v1599_v57  ;;  %v1579_v5 = vpop.permute.xlu0 %1578  ;;  %v9460_v57 = vld [vmem:[#allocation52_spill] sm:$0xff]  ;;  %v1653_v47 = vsel %vm530_vm1, %v7761_v45, -inf  ;;  %v1648_v30 = vmax.f32 %v1640_v42, %v1647_v21 }
 0x37e   : >> { %v1584_v8 = vpop.permute.xlu1 %1583  ;;  %v7784_v4 = vadd.f32 %v1615_v33, %v9460_v57  ;;  %v1600_v10 = vsub.f32 %v1579_v5, %v9423_v59  ;;  %v1644_v5 = vmax.f32 %v1637_v58, %v1643_v48  ;;  %v9462_v57 = vld [vmem:[#allocation57_spill] sm:$0xff] }
 0x37f   : >> { %v7781_v43 = vadd.f32 %v1616_v26, %v9459_v60  ;;  %v1601_v6 = vsub.f32 %v1584_v8, %v9424_v54  ;;  %v1646_v8 = vmax.f32 %v1638_v49, %v1645_v27 }
 0x380   : >> { %v1655_v60 = vsel %vm530_vm1, %v7784_v4, -inf  ;;  %v1617_v33 = vmul.f32 %v7574_v56, %v1600_v10  ;;  %v1652_v11 = vmax.f32 %v1644_v5, %v1651_v9 }
 0x381   : >> { %v1657_v19 = vsel %vm530_vm1, %v7781_v43, -inf  ;;  %v1618_v26 = vmul.f32 %v7574_v56, %v1601_v6  ;;  %v1654_v59 = vmax.f32 %v1646_v8, %v1653_v47  ;;  %v1656_v53 = vmax.f32 %v1648_v30, %v1655_v60 }
 0x382   : >> { %v7802_v54 = vadd.f32 %v1617_v33, %v9462_v57  ;;  %v1658_v13 = vmax.f32 %v1650_v31, %v1657_v19 }
 0x383   : >> { %v7799_v12 = vadd.f32 %v1618_v26, %v9461_v40 }
 0x384   : >> { %v1659_v10 = vsel %vm530_vm1, %v7802_v54, -inf  ;;  %v1663_v62 = vmax.f32 %v1656_v53, %v1658_v13 }
 0x385   : >> { %v1661_v25 = vsel %vm530_vm1, %v7799_v12, -inf  ;;  %v1660_v56 = vmax.f32 %v1652_v11, %v1659_v10 }
 0x386   : >> { %v1662_v27 = vmax.f32 %v1654_v59, %v1661_v25 }
 0x388   : >> { %v1664_v42 = vmax.f32 %v1660_v56, %v1662_v27 }
 0x38a   : >> { %v1665_v58 = vmax.f32 %v1663_v62, %v1664_v42  ;;  %v9463_v62 = vmov 0.0|0.0  }
 0x38c   : >> { %v1666_v49 = vrot.slane %v1665_v58, 4 }
 0x38e   : >> { %v1667_v48 = vmax.f32 %v1665_v58, %v1666_v49 }
 0x390   : >> { %v1668_v2 = vrot.slane %v1667_v48, 2 }
 0x392   : >> { %v1669_v21 = vmax.f32 %v1667_v48, %v1668_v2 }
 0x394   : >> { %v1670_v6 = vrot.slane %v1669_v21, 1 }
 0x396   : >> { %v7808_v47 = vmax.f32 %v1669_v21, %v1670_v6 }
 0x398   : >> { %v1672_v19 = vsub.f32 %v7720_v55, %v7808_v47  ;;  %v1673_v9 = vsub.f32 %v7728_v18, %v7808_v47  ;;  %v1674_v59 = vsub.f32 %v7717_v17, %v7808_v47  ;;  %v1675_v25 = vsub.f32 %v7725_v46, %v7808_v47 }
 0x399   : >> { %v1676_v60 = vsub.f32 %v7734_v41, %v7808_v47  ;;  %v1677_v33 = vsub.f32 %v7731_v52, %v7808_v47  ;;  %v1678_v18 = vsub.f32 %v7742_v0, %v7808_v47  ;;  %v1679_v46 = vsub.f32 %v7739_v24, %v7808_v47 }
 0x39a   : >> { %v1688_v53 = vmul.f32 1.442695, %v1672_v19  ;;  %v1690_v13 = vmul.f32 1.442695, %v1673_v9  ;;  %v1692_v11 = vmul.f32 1.442695, %v1674_v59  ;;  %v1680_v41 = vsub.f32 %v7748_v35, %v7808_v47 }
 0x39b   : >> { %v1694_v26 = vmul.f32 1.442695, %v1675_v25  ;;  %v1696_v55 = vmul.f32 1.442695, %v1676_v60  ;;  %v1698_v17 = vmul.f32 1.442695, %v1677_v33  ;;  %v1681_v52 = vsub.f32 %v7745_v23, %v7808_v47 }
 0x39c   : >> { %6317 = vpow2.f32 %v1688_v53  ;;  %v1700_v8 = vmul.f32 1.442695, %v1678_v18  ;;  %v1702_v5 = vmul.f32 1.442695, %v1679_v46  ;;  %v1704_v30 = vmul.f32 1.442695, %v1680_v41 }
 0x39d   : >> { %6319 = vpow2.f32 %v1690_v13  ;;  %v1682_v0 = vsub.f32 %v7764_v38, %v7808_v47  ;;  %v1706_v57 = vmul.f32 1.442695, %v1681_v52  ;;  %v1683_v24 = vsub.f32 %v7761_v45, %v7808_v47 }
 0x39e   : >> { %6321 = vpow2.f32 %v1692_v11  ;;  %v1684_v23 = vsub.f32 %v7784_v4, %v7808_v47  ;;  %v1685_v38 = vsub.f32 %v7781_v43, %v7808_v47  ;;  %v1686_v45 = vsub.f32 %v7802_v54, %v7808_v47 }
 0x39f   : >> { %6323 = vpow2.f32 %v1694_v26  ;;  %v1708_v56 = vmul.f32 1.442695, %v1682_v0  ;;  %v1710_v42 = vmul.f32 1.442695, %v1683_v24  ;;  %v1687_v21 = vsub.f32 %v7799_v12, %v7808_v47 }
 0x3a0   : >> { %6325 = vpow2.f32 %v1696_v55  ;;  %v1712_v2 = vmul.f32 1.442695, %v1684_v23  ;;  %v1714_v4 = vmul.f32 1.442695, %v1685_v38  ;;  %v1716_v43 = vmul.f32 1.442695, %v1686_v45 }
 0x3a1   : >> { %6327 = vpow2.f32 %v1698_v17  ;;  %v1718_v54 = vmul.f32 1.442695, %v1687_v21 }
 0x3a2   : >> { %6329 = vpow2.f32 %v1700_v8 }
 0x3a3   : >> { %6331 = vpow2.f32 %v1702_v5 }
 0x3a4   : >> { %6333 = vpow2.f32 %v1704_v30 }
 0x3a5   : >> { %6335 = vpow2.f32 %v1706_v57 }
 0x3a6   : >> { %v6318_v31 = vpop.eup %6317  ;;  %6337 = vpow2.f32 %v1708_v56 }
 0x3a7   : >> { %v6320_v40 = vpop.eup %6319  ;;  %6339 = vpow2.f32 %v1710_v42 }
 0x3a8   : >> { %v6322_v10 = vpop.eup %6321  ;;  %v5882_v27 = vpack.c.bf16 %v6320_v40, %v6318_v31  ;;  %6341 = vpow2.f32 %v1712_v2 }
 0x3a9   : >> { %v6324_v35 = vpop.eup %6323  ;;  %6343 = vpow2.f32 %v1714_v4 }
 0x3aa   : >> { %5883 = vmatpush3.bf16.msra.mxu0 %v5882_v27  ;;  %v6326_v58 = vpop.eup %6325  ;;  %v5885_v49 = vpack.c.bf16 %v6324_v35, %v6322_v10  ;;  %6345 = vpow2.f32 %v1716_v43 }
 0x3ab   : >> { %5884 = vmatprep.subr.bf16.mxu0 %v9463_v62  ;;  %v6328_v48 = vpop.eup %6327  ;;  %6347 = vpow2.f32 %v1718_v54 }
 0x3ac   : >> { %v6330_v6 = vpop.eup %6329  ;;  %v5888_v19 = vpack.c.bf16 %v6328_v48, %v6326_v58 }
 0x3ad   : >> { %v6332_v9 = vpop.eup %6331  ;;  %v7846_v25 = vpop.xlane.xlu0 %1850 }
 0x3ae   : >> { %5886 = vmatpush3.bf16.msra.mxu0 %v5885_v49  ;;  %v6334_v53 = vpop.eup %6333  ;;  %v1897_v12 = vsub.f32 %v7588_v63, %v7846_v25  ;;  %v5891_v11 = vpack.c.bf16 %v6332_v9, %v6330_v6 }
 0x3af   : >> { %5887 = vmatprep.subr.bf16.mxu0 %v9463_v62  ;;  %v6336_v60 = vpop.eup %6335 }
 0x3b0   : >> { %v7844_v59 = vpop.xlane.xlu1 %1853  ;;  %v1913_v33 = vmul.f32 1.442695, %v1897_v12  ;;  %v6338_v17 = vpop.eup %6337  ;;  %v5894_v46 = vpack.c.bf16 %v6336_v60, %v6334_v53 }
 0x3b1   : >> { %v1898_v13 = vsub.f32 %v7585_v39, %v7844_v59  ;;  %v7855_v18 = vpop.xlane.xlu0 %1856  ;;  %v6340_v63 = vpop.eup %6339 }
 0x3b2   : >> { %5889 = vmatpush3.bf16.msra.mxu0 %v5888_v19  ;;  %v1899_v39 = vsub.f32 %v7604_v28, %v7855_v18  ;;  %v6342_v31 = vpop.eup %6341  ;;  %v5897_v0 = vpack.c.bf16 %v6340_v63, %v6338_v17  ;;  %v6712_v19 = vmov 1.0  }
 0x3b3   : >> { %5890 = vmatprep.subr.bf16.mxu0 %v9463_v62  ;;  %v1915_v26 = vmul.f32 1.442695, %v1898_v13  ;;  %v6344_v28 = vpop.eup %6343 }
 0x3b4   : >> { %v7853_v55 = vpop.xlane.xlu1 %1862  ;;  %v1917_v41 = vmul.f32 1.442695, %v1899_v39  ;;  %v6346_v27 = vpop.eup %6345 }
 0x3b5   : >> { %6349 = vpow2.f32 %v1915_v26  ;;  %v1901_v8 = vsub.f32 %v7601_v32, %v7853_v55  ;;  %v7864_v52 = vpop.xlane.xlu0 %1859  ;;  %v6348_v56 = vpop.eup %6347 }
 0x3b6   : >> { %5892 = vmatpush3.bf16.msra.mxu0 %v5891_v11  ;;  %6351 = vpow2.f32 %v1913_v33  ;;  %v1900_v30 = vsub.f32 %v7620_v14, %v7864_v52  ;;  %v5900_v14 = vpack.c.bf16 %v6344_v28, %v6342_v31  ;;  %v5903_v45 = vpack.c.bf16 %v6348_v56, %v6346_v27 }
 0x3b7   : >> { %5893 = vmatprep.subr.bf16.mxu0 %v9463_v62  ;;  %6353 = vpow2.f32 %v1917_v41  ;;  %v1921_v40 = vmul.f32 1.442695, %v1901_v8 }
 0x3b8   : >> { %v7862_v5 = vpop.xlane.xlu1 %1868  ;;  %v1919_v32 = vmul.f32 1.442695, %v1900_v30 }
 0x3b9   : >> { %v1903_v57 = vsub.f32 %v7617_v37, %v7862_v5  ;;  %v7873_v10 = vpop.xlane.xlu0 %1865 }
 0x3ba   : >> { %5895 = vmatpush3.bf16.msra.mxu0 %v5894_v46  ;;  %v1902_v35 = vsub.f32 %v7626_v34, %v7873_v10  ;;  %6355 = vpow2.f32 %v1919_v32 }
 0x3bb   : >> { %5896 = vmatprep.subr.bf16.mxu0 %v9463_v62  ;;  %6357 = vpow2.f32 %v1921_v40  ;;  %v1925_v42 = vmul.f32 1.442695, %v1903_v57 }
 0x3bc   : >> { %v7871_v24 = vpop.xlane.xlu1 %1874  ;;  %v1923_v38 = vmul.f32 1.442695, %v1902_v35 }
 0x3bd   : >> { %v1905_v37 = vsub.f32 %v7623_v16, %v7871_v24  ;;  %v7882_v48 = vpop.xlane.xlu0 %1871 }
 0x3be   : >> { %5898 = vmatpush3.bf16.msra.mxu0 %v5897_v0  ;;  %v1904_v34 = vsub.f32 %v7650_v15, %v7882_v48  ;;  %6359 = vpow2.f32 %v1923_v38 }
 0x3bf   : >> { %5899 = vmatprep.subr.bf16.mxu0 %v9463_v62  ;;  %v6350_v23 = vpop.eup %6349  ;;  %6361 = vpow2.f32 %v1925_v42  ;;  %v1929_v16 = vmul.f32 1.442695, %v1905_v37 }
 0x3c0   : >> { %v6352_v58 = vpop.eup %6351  ;;  %v7880_v49 = vpop.xlane.xlu1 %1880  ;;  %v1927_v4 = vmul.f32 1.442695, %v1904_v34 }
 0x3c1   : >> { %5438 = vmatprep.mubr.msk.f32.mxu1 %vm530_vm1, %v6352_v58  ;;  %v1907_v2 = vsub.f32 %v7647_v3, %v7880_v49  ;;  %v6354_v21 = vpop.eup %6353 }
 0x3c2   : >> { %5901 = vmatpush3.bf16.msra.mxu0 %v5900_v14  ;;  %5439 = vmatmul.mubr.msk.f32.vlgmr.msra.gmra.mrb[0].mxu1 %vm530_vm1, %v6350_v23  ;;  %6363 = vpow2.f32 %v1927_v4 }
 0x3c3   : >> { %5902 = vmatprep.subr.bf16.mxu0 %v9463_v62  ;;  %v7893_v62 = vpop.xlane.xlu0 %1877  ;;  %5441 = vmatprep.mubr.msk.f32.mxu1 %vm530_vm1, %v6354_v21  ;;  %6365 = vpow2.f32 %v1929_v16  ;;  %v1933_v9 = vmul.f32 1.442695, %v1907_v2 }
 0x3c4   : >> { %v7891_v6 = vpop.xlane.xlu1 %1886  ;;  %v1906_v15 = vsub.f32 %v7666_v1, %v7893_v62  ;;  %v6356_v54 = vpop.eup %6355 }
 0x3c5   : >> { %v1909_v3 = vsub.f32 %v7663_v22, %v7891_v6  ;;  %v6358_v12 = vpop.eup %6357 }
 0x3c6   : >> { %5904 = vmatpush3.bf16.msra.mxu0 %v5903_v45  ;;  %v1931_v43 = vmul.f32 1.442695, %v1906_v15  ;;  %5442 = vmatmul.mubr.msk.f32.gmra.mrb[2].mxu1 %vm530_vm1, %v6356_v54  ;;  %v7930_v45 = vstv %s1505_s20 }
 0x3c7   : >> { %v7902_v13 = vpop.xlane.xlu0 %1883  ;;  %5444 = vmatprep.mubr.msk.f32.mxu1 %vm530_vm1, %v6358_v12  ;;  %v1937_v11 = vmul.f32 1.442695, %v1909_v3 }
 0x3c8   : >> { %v7900_v53 = vpop.xlane.xlu1 %1892  ;;  %v1908_v1 = vsub.f32 %v7679_v50, %v7902_v13  ;;  %6367 = vpow2.f32 %v1931_v43  ;;  %v6360_v26 = vpop.eup %6359 }
 0x3c9   : >> { %5420 = vmatmul.mubr.f32.vlgmr.msra.gmra.mrb[0].mxu0 %v6712_v19  ;;  %6369 = vpow2.f32 %v1933_v9  ;;  %v1911_v22 = vsub.f32 %v7676_v44, %v7900_v53  ;;  %v6362_v17 = vpop.eup %6361 }
 0x3ca   : >> { %v1935_v60 = vmul.f32 1.442695, %v1908_v1  ;;  %5445 = vmatmul.mubr.msk.f32.gmra.mrb[4].mxu1 %vm530_vm1, %v6360_v26 }
 0x3cb   : >> { %v7910_v33 = vpop.xlane.xlu0 %1889  ;;  %5447 = vmatprep.mubr.msk.f32.mxu1 %vm530_vm1, %v6362_v17  ;;  %v1941_v50 = vmul.f32 1.442695, %v1911_v22 }
 0x3cc   : >> { %v1910_v39 = vsub.f32 %v7686_v51, %v7910_v33  ;;  %6371 = vpow2.f32 %v1935_v60  ;;  %v6364_v63 = vpop.eup %6363 }
 0x3cd   : >> { %6373 = vpow2.f32 %v1937_v11  ;;  %v6366_v44 = vpop.eup %6365 }
 0x3ce   : >> { %v1939_v46 = vmul.f32 1.442695, %v1910_v39  ;;  %5448 = vmatmul.mubr.msk.f32.gmra.mrb[6].mxu1 %vm530_vm1, %v6364_v63 }
 0x3cf   : >> { %v7916_v8 = vpop.xlane.xlu0 %1895  ;;  %5450 = vmatprep.mubr.msk.f32.mxu1 %vm530_vm1, %v6366_v44 }
 0x3d0   : >> { %6375 = vpow2.f32 %v1939_v46  ;;  %v1912_v41 = vsub.f32 %v7692_v20, %v7916_v8 }
 0x3d1   : >> { %6377 = vpow2.f32 %v1941_v50 }
 0x3d2   : >> { %v1943_v51 = vmul.f32 1.442695, %v1912_v41  ;;  %v6368_v31 = vpop.eup %6367 }
 0x3d3   : >> { %v6370_v30 = vpop.eup %6369  ;;  %5451 = vmatmul.mubr.msk.f32.gmra.mrb[8].mxu1 %vm530_vm1, %v6368_v31 }
 0x3d4   : >> { %6379 = vpow2.f32 %v1943_v51  ;;  %5453 = vmatprep.mubr.msk.f32.mxu1 %vm530_vm1, %v6370_v30 }
 0x3d6   : >> { %v6372_v0 = vpop.eup %6371 }
 0x3d7   : >> { %v6374_v28 = vpop.eup %6373  ;;  %5454 = vmatmul.mubr.msk.f32.gmra.mrb[10].mxu1 %vm530_vm1, %v6372_v0 }
 0x3d8   : >> { %5456 = vmatprep.mubr.msk.f32.mxu1 %vm530_vm1, %v6374_v28 }
 0x3da   : >> { %v6376_v40 = vpop.eup %6375 }
 0x3db   : >> { %v6378_v20 = vpop.eup %6377  ;;  %5457 = vmatmul.mubr.msk.f32.gmra.mrb[12].mxu1 %vm530_vm1, %v6376_v40 }
 0x3dc   : >> { %5459 = vmatprep.mubr.msk.f32.mxu1 %vm530_vm1, %v6378_v20 }
 0x3de   : >> { %v6380_v57 = vpop.eup %6379 }
 0x3df   : >> { %5460 = vmatmul.mubr.msk.f32.gmra.mrb[14].mxu1 %vm530_vm1, %v6380_v57 }
 0x495   : >> { %v5440_v32 = vpop.f32.mrb[0].mxu1 }
 0x496   : >> { %6381 = vlog2.f32 %v5440_v32  ;;  %v2059_v27 = vpop.f32.mrb[1].mxu1 }
 0x497   : >> { %6383 = vlog2.f32 %v2059_v27 }
 0x499   : >> { %v5443_v56 = vpop.f32.mrb[2].mxu1 }
 0x49a   : >> { %v2069_v23 = vpop.f32.mrb[3].mxu1 }
 0x49c   : >> { %v1786_v35 = vpop.f32.mrb[0].mxu0 }
 0x49d   : >> { %6385 = vlog2.f32 %v1786_v35  ;;  %v5421_v14 = vpop.f32.mrb[1].mxu0  ;;  %v5446_v37 = vpop.f32.mrb[4].mxu1 }
 0x49e   : >> { %6387 = vlog2.f32 %v5443_v56  ;;  %v2079_v34 = vpop.f32.mrb[5].mxu1 }
 0x49f   : >> { %6389 = vlog2.f32 %v2069_v23 }
 0x4a0   : >> { %v6382_v42 = vpop.eup %6381  ;;  %6391 = vlog2.f32 %v5446_v37  ;;  %v9465_v37 = vld [vmem:[#allocation59_spill] sm:$0xff] }
 0x4a1   : >> { %v6384_v38 = vpop.eup %6383  ;;  %v2141_v58 = vmul.f32 0.6931472, %v6382_v42  ;;  %6393 = vlog2.f32 %v2079_v34  ;;  %v5449_v15 = vpop.f32.mrb[6].mxu1  ;;  %v9466_v34 = vld [vmem:[#allocation60_spill] sm:$0xff] }
 0x4a2   : >> { %v2139_v16 = vmul.f32 0.6931472, %v6384_v38  ;;  %6395 = vlog2.f32 %v5449_v15  ;;  %v2089_v3 = vpop.f32.mrb[7].mxu1 }
 0x4a3   : >> { %v2171_v2 = vadd.f32 %v2141_v58, %v7844_v59  ;;  %6397 = vlog2.f32 %v2089_v3 }
 0x4a4   : >> { %v2170_v21 = vadd.f32 %v2139_v16, %v7846_v25 }
 0x4a5   : >> { %v2187_v19 = vmul.f32 %v2171_v2, %v7930_v45 }
 0x4a6   : >> { %v2186_v43 = vmul.f32 %v2170_v21, %v7930_v45  ;;  %v5452_v60 = vpop.f32.mrb[8].mxu1 }
 0x4a7   : >> { %v6386_v4 = vpop.eup %6385  ;;  %v2206_v12 = vadd.f32 %v2187_v19, %v7540_v61  ;;  %6399 = vlog2.f32 %v5452_v60  ;;  %v2099_v39 = vpop.f32.mrb[9].mxu1 }
 0x4a8   : >> { %v1791_v9 = vmul.f32 0.6931472, %v6386_v4  ;;  %v6388_v54 = vpop.eup %6387  ;;  %v2205_v59 = vadd.f32 %v2186_v43, %v7532_v36  ;;  %6401 = vlog2.f32 %v2099_v39 }
 0x4a9   : >> { %v6390_v11 = vpop.eup %6389  ;;  %v2145_v22 = vmul.f32 0.6931472, %v6388_v54  ;;  %v2222_v25 = vmul.f32 0.5, %v2206_v12  ;;  %v9467_v12 = vld [vmem:[#allocation61_spill] sm:$0xff] }
 0x4aa   : >> { %v1792_v1 = vadd.f32 %v1791_v9, %v7808_v47  ;;  %v2143_v17 = vmul.f32 0.6931472, %v6390_v11  ;;  %v2221_v50 = vmul.f32 0.5, %v2205_v59  ;;  %v6392_v63 = vpop.eup %6391  ;;  %v5455_v51 = vpop.f32.mrb[10].mxu1  ;;  %v9468_v59 = vld [vmem:[#allocation62_spill] sm:$0xff] }
 0x4ab   : >> { %v2173_v46 = vadd.f32 %v2145_v22, %v7864_v52  ;;  %2238 = vst.msk [vmem:[#allocation3 + $0x8] sm:$0xff] %vm1461_vm6, %v2222_v25  ;;  %v6394_v36 = vpop.eup %6393  ;;  %v2149_v41 = vmul.f32 0.6931472, %v6392_v63  ;;  %6403 = vlog2.f32 %v5455_v51  ;;  %v2109_v52 = vpop.f32.mrb[11].mxu1 }
 0x4ac   : >> { %v1794_v26 = vmul.f32 %v7930_v45, %v1792_v1  ;;  %v2172_v47 = vadd.f32 %v2143_v17, %v7855_v18  ;;  %2237 = vst.msk [vmem:[#allocation3] sm:$0xff] %vm1461_vm6, %v2221_v50  ;;  %v2147_v0 = vmul.f32 0.6931472, %v6394_v36  ;;  %6405 = vlog2.f32 %v2109_v52  ;;  %v9464_v18 = vld [vmem:[#allocation58_spill] sm:$0xff] }
 0x4ad   : >> { %v2189_v44 = vmul.f32 %v2173_v46, %v7930_v45  ;;  %v2175_v40 = vadd.f32 %v2149_v41, %v7873_v10 }
 0x4ae   : >> { %v2202_v61 = vadd.f32 %v1794_v26, %v7559_v7  ;;  %v2188_v30 = vmul.f32 %v2172_v47, %v7930_v45  ;;  %v6396_v7 = vpop.eup %6395  ;;  %v2174_v57 = vadd.f32 %v2147_v0, %v7853_v55  ;;  %v5458_v56 = vpop.f32.mrb[12].mxu1 }
 0x4af   : >> { %v2208_v28 = vadd.f32 %v2189_v44, %v7538_v29  ;;  %v6398_v32 = vpop.eup %6397  ;;  %v2191_v35 = vmul.f32 %v2175_v40, %v7930_v45  ;;  %v2153_v14 = vmul.f32 0.6931472, %v6396_v7  ;;  %6407 = vlog2.f32 %v5458_v56  ;;  %v2119_v10 = vpop.f32.mrb[13].mxu1  ;;  %v6415_v44 = vld [vmem:[#allocation3 + $0x40] sm:$0xff]  ;;  %v6416_v7 = vld [vmem:[#allocation3 + $0x58] sm:$0xff] }
 0x4b0   : >> { %v2203_v31 = vmul.f32 0.5, %v2202_v61  ;;  %v2207_v20 = vadd.f32 %v2188_v30, %v9464_v18  ;;  %v2190_v42 = vmul.f32 %v2174_v57, %v7930_v45  ;;  %v2151_v29 = vmul.f32 0.6931472, %v6398_v32  ;;  %v6417_v57 = vld [vmem:[#allocation3 + $0x50] sm:$0xff] }
 0x4b1   : >> { %v2224_v27 = vmul.f32 0.5, %v2208_v28  ;;  %v2210_v38 = vadd.f32 %v2191_v35, %v9465_v37  ;;  %v2177_v58 = vadd.f32 %v2153_v14, %v7882_v48  ;;  %6409 = vlog2.f32 %v2119_v10  ;;  %v6400_v55 = vpop.eup %6399  ;;  %v6418_v10 = vld [vmem:[#allocation3 + $0x68] sm:$0xff] }
 0x4b2   : >> { %2204 = vst.msk [vmem:[#allocation2] sm:$0x1] %vm1084_vm5, %v2203_v31  ;;  %v2223_v23 = vmul.f32 0.5, %v2207_v20  ;;  %v2209_v16 = vadd.f32 %v2190_v42, %v9466_v34  ;;  %v2176_v2 = vadd.f32 %v2151_v29, %v7862_v5  ;;  %v6402_v4 = vpop.eup %6401  ;;  %v2157_v19 = vmul.f32 0.6931472, %v6400_v55  ;;  %v5461_v9 = vpop.f32.mrb[14].mxu1 }
 0x4b3   : >> { %2240 = vst.msk [vmem:[#allocation3 + $0x18] sm:$0xff] %vm1461_vm6, %v2224_v27  ;;  %v2226_v21 = vmul.f32 0.5, %v2210_v38  ;;  %v2193_v15 = vmul.f32 %v2177_v58, %v7930_v45  ;;  %v2155_v54 = vmul.f32 0.6931472, %v6402_v4  ;;  %6411 = vlog2.f32 %v5461_v9  ;;  %v2129_v48 = vpop.f32.mrb[15].mxu1  ;;  %v6419_v38 = vld [vmem:[#allocation3 + $0x60] sm:$0xff] }
 0x4b4   : >> { %2239 = vst.msk [vmem:[#allocation3 + $0x10] sm:$0xff] %vm1461_vm6, %v2223_v23  ;;  %v2225_v3 = vmul.f32 0.5, %v2209_v16  ;;  %v2192_v43 = vmul.f32 %v2176_v2, %v7930_v45  ;;  %v2179_v11 = vadd.f32 %v2157_v19, %v7893_v62  ;;  %6413 = vlog2.f32 %v2129_v48  ;;  %v9469_v62 = vld [vmem:[#allocation63_spill] sm:$0xff]  ;;  %v6420_v4 = vld [vmem:[#allocation3 + $0x78] sm:$0xff] }
 0x4b5   : >> { %2242 = vst.msk [vmem:[#allocation3 + $0x28] sm:$0xff] %vm1461_vm6, %v2226_v21  ;;  %v2212_v1 = vadd.f32 %v2193_v15, %v9467_v12  ;;  %v6404_v5 = vpop.eup %6403  ;;  %v2178_v60 = vadd.f32 %v2155_v54, %v7871_v24  ;;  %v6421_v15 = vld [vmem:[#allocation3 + $0x70] sm:$0xff]  ;;  %v8010_v54 = vld [vmem:[#allocation3 + $0x8] sm:$0xff] (%p1480_p9)  ;;  %v9474_v48 = vmov (%p1480_p9), 0.0|0.0   ;;  %v9475_v12 = vmov (%p1480_p9), 1.0|1.0  }
 0x4b6   : >> { %2241 = vst.msk [vmem:[#allocation3 + $0x20] sm:$0xff] %vm1461_vm6, %v2225_v3  ;;  %v2211_v22 = vadd.f32 %v2192_v43, %v9468_v59  ;;  %v6406_v25 = vpop.eup %6405  ;;  %v2195_v17 = vmul.f32 %v2179_v11, %v7930_v45  ;;  %v2161_v39 = vmul.f32 0.6931472, %v6404_v5  ;;  %v8004_v3 = vld [vmem:[#allocation3] sm:$0xff] (%p1480_p9)  ;;  %5913 = vmatprep.subr.bf16.mxu0 (%p1480_p9), %v9474_v48  ;;  %5937 = vmatprep.subr.bf16.mxu1 (%p1480_p9), %v9475_v12 }
 0x4b7   : >> { %v2228_v26 = vmul.f32 0.5, %v2212_v1  ;;  %v2194_v46 = vmul.f32 %v2178_v60, %v7930_v45  ;;  %v2159_v63 = vmul.f32 0.6931472, %v6406_v25  ;;  %5938 = vmatpush3.bf16.msra.mxu1 (%p1480_p9), %v9475_v12  ;;  %v9476_v1 = vmov (%p1480_p9), 0.0  }
 0x4b8   : >> { %v2227_v50 = vmul.f32 0.5, %v2211_v22  ;;  %v2214_v61 = vadd.f32 %v2195_v17, %v9469_v62  ;;  %v2181_v47 = vadd.f32 %v2161_v39, %v7902_v13  ;;  %5494 = vmatprep.mubr.msk.f32.mxu0 (%p1480_p9), %vm6703_vm4, %v9476_v1  ;;  %5939 = vmatprep.subr.bf16.mxu1 (%p1480_p9), %v9475_v12 }
 0x4b9   : >> { %2244 = vst.msk [vmem:[#allocation3 + $0x38] sm:$0xff] %vm1461_vm6, %v2228_v26  ;;  %v6408_v36 = vpop.eup %6407  ;;  %v2213_v24 = vadd.f32 %v6415_v44, %v2194_v46  ;;  %v2180_v41 = vadd.f32 %v2159_v63, %v7880_v49  ;;  %v8047_v62 = vld [vmem:[#allocation2] ss:$0 sm:$0xff] (%p1480_p9)  ;;  %v9485_v44 = vld [vmem:[#allocation31_spill] sm:$0xff] (%p1480_p9) }
 0x4ba   : >> { %2243 = vst.msk [vmem:[#allocation3 + $0x30] sm:$0xff] %vm1461_vm6, %v2227_v50  ;;  %v2230_v31 = vmul.f32 0.5, %v2214_v61  ;;  %v2197_v30 = vmul.f32 %v2181_v47, %v7930_v45  ;;  %v2165_v0 = vmul.f32 0.6931472, %v6408_v36  ;;  %v8008_v43 = vld [vmem:[#allocation3 + $0x18] sm:$0xff] (%p1480_p9)  ;;  %v9484_v61 = vld [vmem:[#allocation35_spill] sm:$0xff] (%p1480_p9) }
 0x4bb   : >> { %v6410_v51 = vpop.eup %6409  ;;  %v2229_v52 = vmul.f32 0.5, %v2213_v24  ;;  %v2196_v28 = vmul.f32 %v2180_v41, %v7930_v45  ;;  %9473 = vst [vmem:[#allocation65_spill] sm:$0xff] (%p1480_p9), %v8008_v43  ;;  %5940 = vmatpush3.bf16.msra.mxu1 (%p1480_p9), %v9475_v12  ;;  %v2564_v47 = vsub.f32 (%p1480_p9), %v8047_v62, %v9484_v61  ;;  %v2566_v24 = vsub.f32 (%p1480_p9), %v8047_v62, %v9485_v44  ;;  %v9486_v41 = vld [vmem:[#allocation29_spill] sm:$0xff] (%p1480_p9) }
 0x4bc   : >> { %v2163_v40 = vmul.f32 0.6931472, %v6410_v51  ;;  %2246 = vst.msk [vmem:[#allocation3 + $0x48] sm:$0xff] %vm1461_vm6, %v2230_v31  ;;  %v2216_v13 = vadd.f32 %v6416_v7, %v2197_v30  ;;  %v2183_v18 = vadd.f32 %v2165_v0, %v7910_v33  ;;  %v8020_v11 = vld [vmem:[#allocation3 + $0x28] sm:$0xff] (%p1480_p9)  ;;  %5941 = vmatprep.subr.bf16.mxu1 (%p1480_p9), %v9475_v12  ;;  %v2565_v51 = vsub.f32 (%p1480_p9), %v8047_v62, %v9486_v41  ;;  %v9487_v31 = vld [vmem:[#allocation25_spill] sm:$0xff] (%p1480_p9)  ;;  %v9489_v7 = vld [vmem:[#allocation34_spill] sm:$0xff] (%p1480_p9) }
 0x4bd   : >> { %v6412_v20 = vpop.eup %6411  ;;  %2245 = vst.msk [vmem:[#allocation3 + $0x40] sm:$0xff] %vm1461_vm6, %v2229_v52  ;;  %v2215_v49 = vadd.f32 %v6417_v57, %v2196_v28  ;;  %9477 = vst [vmem:[#allocation66_spill] sm:$0xff] (%p1480_p9), %v8020_v11  ;;  %v8022_v5 = vld [vmem:[#allocation3 + $0x20] sm:$0xff] (%p1480_p9)  ;;  %v2580_v36 = vmul.f32 (%p1480_p9), 100.0, %v2564_v47  ;;  %v2582_v0 = vmul.f32 (%p1480_p9), 100.0, %v2566_v24  ;;  %v9488_v52 = vld [vmem:[#allocation33_spill] sm:$0xff] (%p1480_p9) }
 0x4be   : >> { %v2182_v32 = vadd.f32 %v2163_v40, %v7891_v6  ;;  %v6414_v27 = vpop.eup %6413  ;;  %v2232_v35 = vmul.f32 0.5, %v2216_v13  ;;  %v2199_v14 = vmul.f32 %v2183_v18, %v7930_v45  ;;  %v2169_v56 = vmul.f32 0.6931472, %v6412_v20  ;;  %9478 = vst [vmem:[#allocation67_spill] sm:$0xff] (%p1480_p9), %v8022_v5 }
 0x4bf   : >> { %v2231_v23 = vmul.f32 0.5, %v2215_v49  ;;  %v2167_v29 = vmul.f32 0.6931472, %v6414_v27  ;;  %5942 = vmatpush3.bf16.msra.mxu1 (%p1480_p9), %v9475_v12  ;;  %v8056_v30 = vadd.f32 (%p1480_p9), %v2580_v36, %v9487_v31  ;;  %v2567_v28 = vsub.f32 (%p1480_p9), %v8047_v62, %v9488_v52  ;;  %v9490_v49 = vld [vmem:[#allocation37_spill] sm:$0xff] (%p1480_p9) }
 0x4c0   : >> { %v2198_v42 = vmul.f32 %v2182_v32, %v7930_v45  ;;  %2248 = vst.msk [vmem:[#allocation3 + $0x58] sm:$0xff] %vm1461_vm6, %v2232_v35  ;;  %v2218_v33 = vadd.f32 %v6418_v10, %v2199_v14  ;;  %v2185_v37 = vadd.f32 %v2169_v56, %v7916_v8  ;;  %v8028_v59 = vld [vmem:[#allocation3 + $0x38] sm:$0xff] (%p1480_p9)  ;;  %5943 = vmatprep.subr.bf16.mxu1 (%p1480_p9), %v9475_v12  ;;  %v2581_v40 = vmul.f32 (%p1480_p9), 100.0, %v2565_v51  ;;  %v9491_v14 = vld [vmem:[#allocation39_spill] sm:$0xff] (%p1480_p9)  ;;  %v9492_v10 = vld [vmem:[#allocation40_spill] sm:$0xff] (%p1480_p9) }
 0x4c1   : >> { %2247 = vst.msk [vmem:[#allocation3 + $0x50] sm:$0xff] %vm1461_vm6, %v2231_v23  ;;  %v2184_v6 = vadd.f32 %v2167_v29, %v7900_v53  ;;  %v9471_v53 = vmov (%p1480_p9), 0   ;;  %9479 = vst [vmem:[#allocation68_spill] sm:$0xff] (%p1480_p9), %v8028_v59  ;;  %v8030_v22 = vld [vmem:[#allocation3 + $0x30] sm:$0xff] (%p1480_p9)  ;;  %v2568_v13 = vsub.f32 (%p1480_p9), %v8047_v62, %v9489_v7  ;;  %v2612_v18 = vsel (%p1480_p9), %vm530_vm1, %v8056_v30, -inf }
 0x4c2   : >> { %v2217_v58 = vadd.f32 %v6419_v38, %v2198_v42  ;;  %v2234_v55 = vmul.f32 0.5, %v2218_v33  ;;  %v2201_v34 = vmul.f32 %v2185_v37, %v7930_v45  ;;  %6423 = vset.pattern.permute.xlu1 (%p1480_p9), %v9471_v53  ;;  %6422 = vset.pattern.permute.xlu0 (%p1480_p9), %v9471_v53  ;;  %9480 = vst [vmem:[#allocation69_spill] sm:$0xff] (%p1480_p9), %v8030_v22  ;;  %v2583_v57 = vmul.f32 (%p1480_p9), 100.0, %v2567_v28  ;;  %v9497_v51 = vld [vmem:[#allocation53_spill] sm:$0xff] (%p1480_p9) }
 0x4c3   : >> { %v2200_v2 = vmul.f32 %v2184_v6, %v7930_v45  ;;  %1482 = sbr.rel (!%p1480_p9) target bundleno = 732 (0x2dc), region = 79  ;;  %v8002_v45 = vld [vmem:[#allocation3 + $0x10] sm:$0xff] (%p1480_p9)  ;;  %2273 = vperm.xlu0 (%p1480_p9), %6422, %v8004_v3   ;;  %v8036_v60 = vld [vmem:[#allocation3 + $0x48] sm:$0xff] (%p1480_p9)  ;;  %5944 = vmatpush3.bf16.msra.mxu1 (%p1480_p9), %v9475_v12  ;;  %v8065_v20 = vadd.f32 (%p1480_p9), %v2582_v0, %v9487_v31  ;;  %v2569_v32 = vsub.f32 (%p1480_p9), %v8047_v62, %v9490_v49  ;;  %v2584_v35 = vmul.f32 (%p1480_p9), 100.0, %v2568_v13 }
 0x4c4   : >> { %v2233_v16 = vmul.f32 0.5, %v2217_v58  ;;  %2250 = vst.msk [vmem:[#allocation3 + $0x68] sm:$0xff] %vm1461_vm6, %v2234_v55  ;;  %v2220_v21 = vadd.f32 %v6420_v4, %v2201_v34  ;;  %9472 = vst [vmem:[#allocation64_spill] sm:$0xff] (%p1480_p9), %v8002_v45  ;;  %2283 = vperm.xlu1 (%p1480_p9), %6423, %v8002_v45   ;;  %v8038_v25 = vld [vmem:[#allocation3 + $0x40] sm:$0xff] (%p1480_p9)  ;;  %5945 = vmatprep.subr.bf16.mxu1 (%p1480_p9), %v9474_v48  ;;  %v8070_v27 = vadd.f32 (%p1480_p9), %v2581_v40, %v9487_v31  ;;  %v9493_v6 = vld [vmem:[#allocation44_spill] sm:$0xff] (%p1480_p9) }
 0x4c5   : >> { %v2219_v8 = vadd.f32 %v6421_v15, %v2200_v2  ;;  %9481 = vst [vmem:[#allocation70_spill] sm:$0xff] (%p1480_p9), %v8036_v60  ;;  %9482 = vst [vmem:[#allocation71_spill] sm:$0xff] (%p1480_p9), %v8038_v25  ;;  %v2570_v56 = vsub.f32 (%p1480_p9), %v8047_v62, %v9491_v14  ;;  %v2618_v23 = vsel (%p1480_p9), %vm530_vm1, %v8065_v20, -inf  ;;  %v8077_v42 = vadd.f32 (%p1480_p9), %v2583_v57, %v9487_v31  ;;  %v9494_v4 = vld [vmem:[#allocation42_spill] sm:$0xff] (%p1480_p9) }
 0x4c6   : >> { %2249 = vst.msk [vmem:[#allocation3 + $0x60] sm:$0xff] %vm1461_vm6, %v2233_v16  ;;  %v2236_v19 = vmul.f32 0.5, %v2220_v21  ;;  %v2585_v29 = vmul.f32 (%p1480_p9), 100.0, %v2569_v32  ;;  %v2571_v33 = vsub.f32 (%p1480_p9), %v8047_v62, %v9492_v10  ;;  %v2615_v37 = vsel (%p1480_p9), %vm530_vm1, %v8070_v27, -inf }
 0x4c7   : >> { %v2235_v9 = vmul.f32 0.5, %v2219_v8  ;;  %2278 = vperm.xlu0 (%p1480_p9), %6422, %v8010_v54   ;;  %v2266_v26 = vld [vmem:[#allocation3 + $0x58] sm:$0xff] (%p1480_p9)  ;;  %v8084_v38 = vadd.f32 (%p1480_p9), %v2584_v35, %v9487_v31  ;;  %v2586_v58 = vmul.f32 (%p1480_p9), 100.0, %v2570_v56  ;;  %v2572_v55 = vsub.f32 (%p1480_p9), %v8047_v62, %v9493_v6 }
 0x4c8   : >> { %2252 = vst.msk [vmem:[#allocation3 + $0x78] sm:$0xff] %vm1461_vm6, %v2236_v19  ;;  %2288 = vperm.xlu1 (%p1480_p9), %6423, %v8008_v43   ;;  %v8044_v17 = vld [vmem:[#allocation3 + $0x50] sm:$0xff] (%p1480_p9)  ;;  %v2621_v34 = vsel (%p1480_p9), %vm530_vm1, %v8077_v42, -inf  ;;  %v8091_v16 = vadd.f32 (%p1480_p9), %v2585_v29, %v9487_v31  ;;  %v2587_v2 = vmul.f32 (%p1480_p9), 100.0, %v2571_v33  ;;  %v2573_v21 = vsub.f32 (%p1480_p9), %v8047_v62, %v9494_v4 }
 0x4c9   : >> { %2251 = vst.msk [vmem:[#allocation3 + $0x70] sm:$0xff] %vm1461_vm6, %v2235_v9  ;;  %9483 = vst [vmem:[#allocation72_spill] sm:$0xff] (%p1480_p9), %v8044_v17  ;;  %v2624_v15 = vsel (%p1480_p9), %vm530_vm1, %v8084_v38, -inf  ;;  %v8098_v8 = vadd.f32 (%p1480_p9), %v2586_v58, %v9487_v31  ;;  %v2588_v19 = vmul.f32 (%p1480_p9), 100.0, %v2572_v55  ;;  %v9495_v9 = vld [vmem:[#allocation48_spill] sm:$0xff] (%p1480_p9)  ;;  %v2576_v0 = vsub.f32 (%p1480_p9), %v8047_v62, %v9497_v51  ;;  %v9500_v55 = vld [vmem:[#allocation54_spill] sm:$0xff] (%p1480_p9) }
 0x4ca   : > { %v2574_v53 = vsub.f32 %v8047_v62, %v9495_v9 }
 0x4cb   : > { %2293 = vperm.xlu0 %6422, %v8022_v5   ;;  %v2268_v39 = vld [vmem:[#allocation3 + $0x68] sm:$0xff]  ;;  %v2630_v47 = vsel %vm530_vm1, %v8098_v8, -inf  ;;  %v8112_v36 = vadd.f32 %v2588_v19, %v9487_v31  ;;  %v2592_v56 = vmul.f32 100.0, %v2576_v0 }
 0x4cc   : > { %2298 = vperm.xlu1 %6423, %v8020_v11   ;;  %v2590_v24 = vmul.f32 100.0, %v2574_v53 }
 0x4cd   : > { %v2267_v50 = vld [vmem:[#allocation3 + $0x60] sm:$0xff]  ;;  %v2636_v32 = vsel %vm530_vm1, %v8112_v36, -inf }
 0x4ce   : > { %v8126_v35 = vadd.f32 %v2590_v24, %v9487_v31 }
 0x4cf   : > { %2303 = vperm.xlu0 %6422, %v8030_v22   ;;  %v2270_v46 = vld [vmem:[#allocation3 + $0x78] sm:$0xff] }
 0x4d0   : > { %2308 = vperm.xlu1 %6423, %v8028_v59   ;;  %v2269_v63 = vld [vmem:[#allocation3 + $0x70] sm:$0xff] }
 0x4d3   : > { %2313 = vperm.xlu0 %6422, %v8038_v25  }
 0x4d4   : > { %2318 = vperm.xlu1 %6423, %v8036_v60  }
 0x4d7   : > { %2323 = vperm.xlu0 %6422, %v8044_v17  }
 0x4d8   : > { %2328 = vperm.xlu1 %6423, %v2266_v26   ;;  %v2627_v26 = vsel %vm530_vm1, %v8091_v16, -inf }
 0x4db   : > { %2333 = vperm.xlu0 %6422, %v2267_v50   ;;  %v2589_v50 = vmul.f32 100.0, %v2573_v21  ;;  %v8140_v21 = vadd.f32 %v2592_v56, %v9487_v31 }
 0x4dc   : > { %2338 = vperm.xlu1 %6423, %v2268_v39   ;;  %v8105_v39 = vadd.f32 %v2587_v2, %v9487_v31  ;;  %v2642_v2 = vsel %vm530_vm1, %v8126_v35, -inf }
 0x4dd   : > { %v8119_v40 = vadd.f32 %v2589_v50, %v9487_v31  ;;  %v2648_v50 = vsel %vm530_vm1, %v8140_v21, -inf }
 0x4de   : > { %v2633_v28 = vsel %vm530_vm1, %v8105_v39, -inf }
 0x4df   : > { %2343 = vperm.xlu0 %6422, %v2269_v63   ;;  %v2639_v33 = vsel %vm530_vm1, %v8119_v40, -inf }
 0x4e0   : > { %2348 = vperm.xlu1 %6423, %v2270_v46   ;;  %v9496_v46 = vld [vmem:[#allocation46_spill] sm:$0xff] }
 0x4e1   : > { %v2575_v63 = vsub.f32 %v8047_v62, %v9496_v46 }
 0x4e3   : > { %v2591_v13 = vmul.f32 100.0, %v2575_v63 }
 0x4fe   : > { %2613 = vmax.xlane.f32.xlu0 %v2612_v18  ;;  %v9498_v18 = vld [vmem:[#allocation50_spill] sm:$0xff] }
 0x4ff   : > { %v2577_v57 = vsub.f32 %v8047_v62, %v9498_v18 }
 0x501   : > { %v2593_v58 = vmul.f32 100.0, %v2577_v57 }
 0x502   : > { %2619 = vmax.xlane.f32.xlu0 %v2618_v23  ;;  %v9499_v23 = vld [vmem:[#allocation56_spill] sm:$0xff] }
 0x503   : > { %v2578_v29 = vsub.f32 %v8047_v62, %v9499_v23  ;;  %v8145_v53 = vadd.f32 %v2593_v58, %v9487_v31 }
 0x504   : > { %2616 = vmax.xlane.f32.xlu1 %v2615_v37  ;;  %v8133_v37 = vadd.f32 %v2591_v13, %v9487_v31 }
 0x505   : > { %v2651_v63 = vsel %vm530_vm1, %v8145_v53, -inf }
 0x506   : > { %2622 = vmax.xlane.f32.xlu0 %v2621_v34  ;;  %v2579_v34 = vsub.f32 %v8047_v62, %v9500_v55  ;;  %v2645_v19 = vsel %vm530_vm1, %v8133_v37, -inf }
 0x508   : > { %2625 = vmax.xlane.f32.xlu1 %v2624_v15  ;;  %v2594_v15 = vmul.f32 100.0, %v2578_v29 }
 0x50a   : > { %2628 = vmax.xlane.f32.xlu0 %v2627_v26  ;;  %v2595_v26 = vmul.f32 100.0, %v2579_v34  ;;  %v8150_v62 = vadd.f32 %v2594_v15, %v9487_v31 }
 0x50c   : > { %2631 = vmax.xlane.f32.xlu1 %v2630_v47  ;;  %v8155_v47 = vadd.f32 %v2595_v26, %v9487_v31  ;;  %v2654_v24 = vsel %vm530_vm1, %v8150_v62, -inf }
 0x50e   : > { %2634 = vmax.xlane.f32.xlu0 %v2633_v28  ;;  %v2657_v0 = vsel %vm530_vm1, %v8155_v47, -inf }
 0x510   : > { %2637 = vmax.xlane.f32.xlu1 %v2636_v32 }
 0x512   : > { %2640 = vmax.xlane.f32.xlu0 %v2639_v33 }
 0x514   : > { %2643 = vmax.xlane.f32.xlu1 %v2642_v2 }
 0x516   : > { %2646 = vmax.xlane.f32.xlu0 %v2645_v19 }
 0x518   : > { %2649 = vmax.xlane.f32.xlu1 %v2648_v50 }
 0x51a   : > { %2652 = vmax.xlane.f32.xlu0 %v2651_v63 }
 0x51c   : > { %2655 = vmax.xlane.f32.xlu1 %v2654_v24 }
 0x51e   : > { %2658 = vmax.xlane.f32.xlu0 %v2657_v0 }
 0x542   : > { %v2274_v13 = vpop.permute.xlu0 %2273 }
 0x543   : > { %v2284_v28 = vpop.permute.xlu1 %2283  ;;  %v2351_v2 = vsub.f32 %v2274_v13, %v9484_v61 }
 0x544   : > { %v2353_v34 = vsub.f32 %v2284_v28, %v9485_v44 }
 0x545   : > { %v2367_v60 = vmul.f32 100.0, %v2351_v2 }
 0x546   : > { %v2279_v32 = vpop.permute.xlu0 %2278  ;;  %v2369_v17 = vmul.f32 100.0, %v2353_v34 }
 0x547   : > { %v2289_v57 = vpop.permute.xlu1 %2288  ;;  %v2352_v19 = vsub.f32 %v2279_v32, %v9486_v41 }
 0x548   : > { %v2354_v15 = vsub.f32 %v2289_v57, %v9488_v52 }
 0x549   : > { %v2368_v57 = vmul.f32 100.0, %v2352_v19 }
 0x54a   : > { %v2294_v29 = vpop.permute.xlu0 %2293  ;;  %v2370_v44 = vmul.f32 100.0, %v2354_v15  ;;  %v9503_v15 = vld [vmem:[#allocation28_spill] sm:$0xff] }
 0x54b   : > { %v2299_v56 = vpop.permute.xlu1 %2298  ;;  %v2355_v50 = vsub.f32 %v2294_v29, %v9489_v7 }
 0x54c   : > { %v2356_v26 = vsub.f32 %v2299_v56, %v9490_v49  ;;  %v8180_v19 = vadd.f32 %v2370_v44, %v9503_v15  ;;  %v9510_v15 = vld [vmem:[#allocation45_spill] sm:$0xff] }
 0x54d   : > { %v2371_v32 = vmul.f32 100.0, %v2355_v50 }
 0x54e   : > { %v2304_v58 = vpop.permute.xlu0 %2303  ;;  %v2372_v61 = vmul.f32 100.0, %v2356_v26  ;;  %v9504_v26 = vld [vmem:[#allocation26_spill] sm:$0xff] }
 0x54f   : > { %v2309_v33 = vpop.permute.xlu1 %2308  ;;  %v2357_v24 = vsub.f32 %v2304_v58, %v9491_v14  ;;  %v9502_v14 = vld [vmem:[#allocation36_spill] sm:$0xff]  ;;  %v8183_v50 = vadd.f32 %v2368_v57, %v9504_v26 }
 0x550   : > { %v2358_v63 = vsub.f32 %v2309_v33, %v9492_v10  ;;  %v9501_v10 = vld [vmem:[#allocation27_spill] sm:$0xff]  ;;  %v8175_v34 = vadd.f32 %v2367_v60, %v9502_v14  ;;  %v9507_v60 = vld [vmem:[#allocation41_spill] sm:$0xff] }
 0x551   : > { %v2373_v56 = vmul.f32 100.0, %v2357_v24  ;;  %v8172_v58 = vadd.f32 %v2369_v17, %v9501_v10 }
 0x552   : > { %v2314_v31 = vpop.permute.xlu0 %2313  ;;  %v2374_v52 = vmul.f32 100.0, %v2358_v63  ;;  %v9505_v63 = vld [vmem:[#allocation32_spill] sm:$0xff] }
 0x553   : > { %v2319_v0 = vpop.permute.xlu1 %2318  ;;  %v2359_v13 = vsub.f32 %v2314_v31, %v9493_v6  ;;  %v8186_v24 = vadd.f32 %v2372_v61, %v9505_v63 }
 0x554   : > { %v2360_v28 = vsub.f32 %v2319_v0, %v9494_v4  ;;  %v9506_v0 = vld [vmem:[#allocation30_spill] sm:$0xff]  ;;  %v8192_v10 = vadd.f32 %v2374_v52, %v9507_v60  ;;  %v9513_v4 = vld [vmem:[#allocation51_spill] sm:$0xff] }
 0x555   : > { %v2375_v29 = vmul.f32 100.0, %v2359_v13 }
 0x556   : > { %v2376_v49 = vmul.f32 100.0, %v2360_v28  ;;  %v2324_v33 = vpop.permute.xlu0 %2323  ;;  %v8189_v28 = vadd.f32 %v2371_v32, %v9506_v0  ;;  %v2401_v32 = vsel %vm530_vm1, %v8172_v58, -inf  ;;  %v2409_v0 = vsel %vm530_vm1, %v8192_v10, -inf }
 0x557   : > { %v2329_v7 = vpop.permute.xlu1 %2328  ;;  %v2361_v31 = vsub.f32 %v2324_v33, %v9495_v9  ;;  %v9509_v33 = vld [vmem:[#allocation43_spill] sm:$0xff]  ;;  %v8201_v57 = vadd.f32 %v2375_v29, %v9510_v15 }
 0x558   : > { %v2362_v2 = vsub.f32 %v2329_v7, %v9496_v46  ;;  %v9508_v7 = vld [vmem:[#allocation38_spill] sm:$0xff]  ;;  %v8198_v44 = vadd.f32 %v2376_v49, %v9509_v33  ;;  %v2400_v49 = vsel %vm530_vm1, %v8183_v50, -inf  ;;  %v9511_v29 = vld [vmem:[#allocation47_spill] sm:$0xff]  ;;  %v9512_v33 = vld [vmem:[#allocation49_spill] sm:$0xff] }
 0x559   : > { %v2377_v13 = vmul.f32 100.0, %v2361_v31  ;;  %v8195_v14 = vadd.f32 %v2373_v56, %v9508_v7  ;;  %v2402_v56 = vsel %vm530_vm1, %v8180_v19, -inf  ;;  %v2405_v7 = vsel %vm530_vm1, %v8186_v24, -inf  ;;  %v9514_v46 = vld [vmem:[#allocation52_spill] sm:$0xff] }
 0x55a   : > { %v2378_v17 = vmul.f32 100.0, %v2362_v2  ;;  %v2334_v61 = vpop.permute.xlu0 %2333  ;;  %v2399_v2 = vsel %vm530_vm1, %v8175_v34, -inf  ;;  %v2406_v6 = vmax.f32 %v2400_v49, %v2405_v7  ;;  %v9515_v7 = vld [vmem:[#allocation55_spill] sm:$0xff]  ;;  %v9516_v49 = vld [vmem:[#allocation57_spill] sm:$0xff] }
 0x55b   : > { %v2339_v26 = vpop.permute.xlu1 %2338  ;;  %v2363_v31 = vsub.f32 %v2334_v61, %v9497_v51  ;;  %v8217_v60 = vadd.f32 %v2377_v13, %v9512_v33  ;;  %v2407_v51 = vsel %vm530_vm1, %v8195_v14, -inf  ;;  %v2411_v13 = vsel %vm530_vm1, %v8201_v57, -inf }
 0x55c   : > { %v2364_v52 = vsub.f32 %v2339_v26, %v9498_v18  ;;  %v8214_v15 = vadd.f32 %v2378_v17, %v9511_v29  ;;  %v2403_v26 = vsel %vm530_vm1, %v8189_v28, -inf  ;;  %v2413_v17 = vsel %vm530_vm1, %v8198_v44, -inf }
 0x55d   : > { %v2379_v61 = vmul.f32 100.0, %v2363_v31  ;;  %v2404_v41 = vmax.f32 %v2399_v2, %v2403_v26  ;;  %v2415_v59 = vsel %vm530_vm1, %v8217_v60, -inf }
 0x55e   : > { %v2380_v63 = vmul.f32 100.0, %v2364_v52  ;;  %v2344_v33 = vpop.permute.xlu0 %2343  ;;  %v2417_v25 = vsel %vm530_vm1, %v8214_v15, -inf }
 0x55f   : > { %v2349_v29 = vpop.permute.xlu1 %2348  ;;  %v8235_v52 = vadd.f32 %v2379_v61, %v9514_v46  ;;  %v2365_v9 = vsub.f32 %v2344_v33, %v9499_v23  ;;  %v2412_v33 = vmax.f32 %v2404_v41, %v2411_v13 }
 0x560   : > { %v8232_v18 = vadd.f32 %v2380_v63, %v9513_v4  ;;  %v2366_v31 = vsub.f32 %v2349_v29, %v9500_v55  ;;  %v2410_v4 = vmax.f32 %v2402_v56, %v2409_v0  ;;  %v2408_v29 = vmax.f32 %v2401_v32, %v2407_v51 }
 0x561   : > { %v2419_v63 = vsel %vm530_vm1, %v8235_v52, -inf  ;;  %v2381_v46 = vmul.f32 100.0, %v2365_v9  ;;  %v2414_v55 = vmax.f32 %v2406_v6, %v2413_v17 }
 0x562   : > { %v2421_v22 = vsel %vm530_vm1, %v8232_v18, -inf  ;;  %v2382_v61 = vmul.f32 100.0, %v2366_v31  ;;  %v2418_v23 = vmax.f32 %v2410_v4, %v2417_v25  ;;  %v2416_v11 = vmax.f32 %v2408_v29, %v2415_v59 }
 0x563   : > { %v8251_v26 = vadd.f32 %v2381_v46, %v9516_v49  ;;  %v2422_v5 = vmax.f32 %v2414_v55, %v2421_v22  ;;  %v2420_v45 = vmax.f32 %v2412_v33, %v2419_v63 }
 0x564   : > { %v8248_v2 = vadd.f32 %v2382_v61, %v9515_v7 }
 0x565   : > { %v2423_v9 = vsel %vm530_vm1, %v8251_v26, -inf  ;;  %v2427_v6 = vmax.f32 %v2420_v45, %v2422_v5 }
 0x566   : > { %v2425_v43 = vsel %vm530_vm1, %v8248_v2, -inf  ;;  %v2424_v51 = vmax.f32 %v2416_v11, %v2423_v9 }
 0x567   : > { %v2426_v0 = vmax.f32 %v2418_v23, %v2425_v43 }
 0x569   : > { %v2428_v41 = vmax.f32 %v2424_v51, %v2426_v0 }
 0x56b   : > { %v2429_v32 = vmax.f32 %v2427_v6, %v2428_v41 }
 0x56d   : > { %v2430_v56 = vrot.slane %v2429_v32, 4 }
 0x56f   : > { %v2431_v17 = vmax.f32 %v2429_v32, %v2430_v56 }
 0x571   : > { %v2432_v13 = vrot.slane %v2431_v17, 2 }
 0x573   : > { %v2433_v46 = vmax.f32 %v2431_v17, %v2432_v13 }
 0x575   : > { %v2434_v31 = vrot.slane %v2433_v46, 1 }
 0x577   : > { %v8257_v25 = vmax.f32 %v2433_v46, %v2434_v31 }
 0x579   : > { %v2436_v59 = vsub.f32 %v8175_v34, %v8257_v25  ;;  %v2437_v22 = vsub.f32 %v8183_v50, %v8257_v25  ;;  %v2438_v43 = vsub.f32 %v8172_v58, %v8257_v25  ;;  %v2439_v45 = vsub.f32 %v8180_v19, %v8257_v25 }
 0x57a   : > { %v2440_v23 = vsub.f32 %v8189_v28, %v8257_v25  ;;  %v2441_v63 = vsub.f32 %v8186_v24, %v8257_v25  ;;  %v2442_v58 = vsub.f32 %v8195_v14, %v8257_v25  ;;  %v2443_v19 = vsub.f32 %v8192_v10, %v8257_v25 }
 0x57b   : > { %v2452_v11 = vmul.f32 1.442695, %v2436_v59  ;;  %v2454_v5 = vmul.f32 1.442695, %v2437_v22  ;;  %v2456_v4 = vmul.f32 1.442695, %v2438_v43  ;;  %v2444_v28 = vsub.f32 %v8201_v57, %v8257_v25 }
 0x57c   : > { %v2458_v55 = vmul.f32 1.442695, %v2439_v45  ;;  %v2460_v34 = vmul.f32 1.442695, %v2440_v23  ;;  %v2462_v50 = vmul.f32 1.442695, %v2441_v63  ;;  %v2445_v24 = vsub.f32 %v8198_v44, %v8257_v25 }
 0x57d   : > { %6424 = vpow2.f32 %v2452_v11  ;;  %v2464_v61 = vmul.f32 1.442695, %v2442_v58  ;;  %v2466_v29 = vmul.f32 1.442695, %v2443_v19  ;;  %v2446_v33 = vsub.f32 %v8217_v60, %v8257_v25 }
 0x57e   : > { %6426 = vpow2.f32 %v2454_v5  ;;  %v2468_v14 = vmul.f32 1.442695, %v2444_v28  ;;  %v2447_v0 = vsub.f32 %v8214_v15, %v8257_v25  ;;  %v2470_v51 = vmul.f32 1.442695, %v2445_v24 }
 0x57f   : > { %6428 = vpow2.f32 %v2456_v4  ;;  %v2472_v32 = vmul.f32 1.442695, %v2446_v33  ;;  %v2448_v56 = vsub.f32 %v8235_v52, %v8257_v25  ;;  %v2449_v17 = vsub.f32 %v8232_v18, %v8257_v25 }
 0x580   : > { %6430 = vpow2.f32 %v2458_v55  ;;  %v2474_v60 = vmul.f32 1.442695, %v2447_v0  ;;  %v2450_v52 = vsub.f32 %v8251_v26, %v8257_v25  ;;  %v2451_v45 = vsub.f32 %v8248_v2, %v8257_v25 }
 0x581   : > { %6432 = vpow2.f32 %v2460_v34  ;;  %v2476_v22 = vmul.f32 1.442695, %v2448_v56  ;;  %v2478_v18 = vmul.f32 1.442695, %v2449_v17 }
 0x582   : > { %6434 = vpow2.f32 %v2462_v50  ;;  %v2480_v55 = vmul.f32 1.442695, %v2450_v52  ;;  %v2482_v58 = vmul.f32 1.442695, %v2451_v45 }
 0x583   : > { %6436 = vpow2.f32 %v2464_v61 }
 0x584   : > { %6438 = vpow2.f32 %v2466_v29 }
 0x585   : > { %6440 = vpow2.f32 %v2468_v14 }
 0x586   : > { %6442 = vpow2.f32 %v2470_v51 }
 0x587   : > { %v6425_v9 = vpop.eup %6424  ;;  %6444 = vpow2.f32 %v2472_v32 }
 0x588   : > { %v6427_v10 = vpop.eup %6426  ;;  %6446 = vpow2.f32 %v2474_v60 }
 0x589   : > { %v6429_v6 = vpop.eup %6428  ;;  %v5914_v41 = vpack.c.bf16 %v6427_v10, %v6425_v9 }
 0x58a   : > { %v6431_v57 = vpop.eup %6430 }
 0x58b   : > { %5915 = vmatpush3.bf16.msra.mxu0 %v5914_v41  ;;  %v8285_v44 = vpop.xlane.xlu0 %2613  ;;  %v6433_v13 = vpop.eup %6432  ;;  %v5917_v46 = vpack.c.bf16 %v6431_v57, %v6429_v6 }
 0x58c   : > { %5916 = vmatprep.subr.bf16.mxu0 %v9474_v48  ;;  %v2660_v15 = vsub.f32 %v8056_v30, %v8285_v44  ;;  %v6435_v31 = vpop.eup %6434 }
 0x58d   : > { %v6437_v26 = vpop.eup %6436  ;;  %v5920_v4 = vpack.c.bf16 %v6435_v31, %v6433_v13 }
 0x58e   : > { %v2676_v59 = vmul.f32 1.442695, %v2660_v15  ;;  %v6439_v23 = vpop.eup %6438 }
 0x58f   : > { %5918 = vmatpush3.bf16.msra.mxu0 %v5917_v46  ;;  %v8294_v43 = vpop.xlane.xlu0 %2619  ;;  %v5923_v19 = vpack.c.bf16 %v6439_v23, %v6437_v26 }
 0x590   : > { %5919 = vmatprep.subr.bf16.mxu0 %v9474_v48  ;;  %v2662_v11 = vsub.f32 %v8065_v20, %v8294_v43  ;;  %6448 = vpow2.f32 %v2676_v59 }
 0x591   : > { %v8299_v30 = vpop.xlane.xlu1 %2616  ;;  %6450 = vpow2.f32 %v2476_v22 }
 0x592   : > { %v2661_v5 = vsub.f32 %v8070_v27, %v8299_v30  ;;  %v2680_v63 = vmul.f32 1.442695, %v2662_v11  ;;  %6452 = vpow2.f32 %v2478_v18  ;;  %v6441_v27 = vpop.eup %6440 }
 0x593   : > { %5921 = vmatpush3.bf16.msra.mxu0 %v5920_v4  ;;  %v8305_v2 = vpop.xlane.xlu0 %2622  ;;  %v6443_v28 = vpop.eup %6442 }
 0x594   : > { %v2678_v34 = vmul.f32 1.442695, %v2661_v5  ;;  %6454 = vpow2.f32 %v2680_v63  ;;  %5922 = vmatprep.subr.bf16.mxu0 %v9474_v48  ;;  %v2663_v20 = vsub.f32 %v8077_v42, %v8305_v2  ;;  %v6445_v9 = vpop.eup %6444 }
 0x595   : > { %v8310_v50 = vpop.xlane.xlu1 %2625  ;;  %v6447_v0 = vpop.eup %6446 }
 0x596   : > { %6456 = vpow2.f32 %v2678_v34  ;;  %v2664_v61 = vsub.f32 %v8084_v38, %v8310_v50  ;;  %v2682_v29 = vmul.f32 1.442695, %v2663_v20  ;;  %v5926_v38 = vpack.c.bf16 %v6443_v28, %v6441_v27 }
 0x597   : > { %6458 = vpow2.f32 %v2480_v55  ;;  %5924 = vmatpush3.bf16.msra.mxu0 %v5923_v19  ;;  %v8314_v33 = vpop.xlane.xlu0 %2628 }
 0x598   : > { %v2684_v24 = vmul.f32 1.442695, %v2664_v61  ;;  %6460 = vpow2.f32 %v2482_v58  ;;  %5925 = vmatprep.subr.bf16.mxu0 %v9474_v48  ;;  %v2665_v42 = vsub.f32 %v8091_v16, %v8314_v33 }
 0x599   : > { %6462 = vpow2.f32 %v2682_v29  ;;  %v8319_v14 = vpop.xlane.xlu1 %2631  ;;  %v9517_v29 = vmov 1.0  }
 0x59a   : > { %6464 = vpow2.f32 %v2684_v24  ;;  %v2666_v10 = vsub.f32 %v8098_v8, %v8319_v14  ;;  %v6449_v51 = vpop.eup %6448  ;;  %v2686_v6 = vmul.f32 1.442695, %v2665_v42  ;;  %v5929_v8 = vpack.c.bf16 %v6447_v0, %v6445_v9 }
 0x59b   : > { %5927 = vmatpush3.bf16.msra.mxu0 %v5926_v38  ;;  %v8323_v57 = vpop.xlane.xlu0 %2634  ;;  %5513 = vmatprep.mubr.msk.f32.mxu1 %vm530_vm1, %v6449_v51  ;;  %v6451_v32 = vpop.eup %6450 }
 0x59c   : > { %v2688_v41 = vmul.f32 1.442695, %v2666_v10  ;;  %6466 = vpow2.f32 %v2686_v6  ;;  %5928 = vmatprep.subr.bf16.mxu0 %v9474_v48  ;;  %v2667_v16 = vsub.f32 %v8105_v39, %v8323_v57  ;;  %v6453_v60 = vpop.eup %6452 }
 0x59d   : > { %v8329_v56 = vpop.xlane.xlu1 %2637 }
 0x59e   : > { %6468 = vpow2.f32 %v2688_v41  ;;  %v2668_v17 = vsub.f32 %v8112_v36, %v8329_v56  ;;  %v6455_v15 = vpop.eup %6454  ;;  %v2690_v13 = vmul.f32 1.442695, %v2667_v16  ;;  %v5932_v36 = vpack.c.bf16 %v6453_v60, %v6451_v32 }
 0x59f   : > { %5930 = vmatpush3.bf16.msra.mxu0 %v5929_v8  ;;  %v8333_v52 = vpop.xlane.xlu0 %2640 }
 0x5a0   : > { %v6457_v46 = vpop.eup %6456  ;;  %v2692_v31 = vmul.f32 1.442695, %v2668_v17  ;;  %6470 = vpow2.f32 %v2690_v13  ;;  %5931 = vmatprep.subr.bf16.mxu0 %v9474_v48  ;;  %v2669_v39 = vsub.f32 %v8119_v40, %v8333_v52 }
 0x5a1   : > { %v6459_v59 = vpop.eup %6458  ;;  %5514 = vmatmul.mubr.msk.f32.vlgmr.msra.gmra.mrb[0].mxu1 %vm530_vm1, %v6457_v46  ;;  %v8339_v22 = vpop.xlane.xlu1 %2643 }
 0x5a2   : > { %v6461_v18 = vpop.eup %6460  ;;  %6472 = vpow2.f32 %v2692_v31  ;;  %5516 = vmatprep.mubr.msk.f32.mxu1 %vm530_vm1, %v6455_v15  ;;  %v2670_v45 = vsub.f32 %v8126_v35, %v8339_v22  ;;  %v2694_v26 = vmul.f32 1.442695, %v2669_v39 }
 0x5a3   : > { %v6463_v11 = vpop.eup %6462  ;;  %5933 = vmatpush3.bf16.msra.mxu0 %v5932_v36  ;;  %v8344_v23 = vpop.xlane.xlu0 %2646  ;;  %v5935_v63 = vpack.c.bf16 %v6461_v18, %v6459_v59 }
 0x5a4   : > { %v6465_v5 = vpop.eup %6464  ;;  %v2696_v4 = vmul.f32 1.442695, %v2670_v45  ;;  %6474 = vpow2.f32 %v2694_v26  ;;  %5934 = vmatprep.subr.bf16.mxu0 %v9474_v48  ;;  %v2671_v40 = vsub.f32 %v8133_v37, %v8344_v23 }
 0x5a5   : > { %5517 = vmatmul.mubr.msk.f32.gmra.mrb[2].mxu1 %vm530_vm1, %v6463_v11  ;;  %v8350_v55 = vpop.xlane.xlu1 %2649 }
 0x5a6   : > { %6476 = vpow2.f32 %v2696_v4  ;;  %v2672_v35 = vsub.f32 %v8140_v21, %v8350_v55  ;;  %5519 = vmatprep.mubr.msk.f32.mxu1 %vm530_vm1, %v6465_v5  ;;  %v6467_v34 = vpop.eup %6466  ;;  %v2698_v58 = vmul.f32 1.442695, %v2671_v40 }
 0x5a7   : > { %5936 = vmatpush3.bf16.msra.mxu0 %v5935_v63  ;;  %v8355_v19 = vpop.xlane.xlu0 %2652 }
 0x5a8   : > { %v6469_v20 = vpop.eup %6468  ;;  %v2700_v27 = vmul.f32 1.442695, %v2672_v35  ;;  %6478 = vpow2.f32 %v2698_v58  ;;  %v2673_v37 = vsub.f32 %v8145_v53, %v8355_v19  ;;  %5969 = vmatprep.subr.bf16.mxu0 %v9475_v12 }
 0x5a9   : > { %5520 = vmatmul.mubr.msk.f32.gmra.mrb[4].mxu1 %vm530_vm1, %v6467_v34  ;;  %v8360_v61 = vpop.xlane.xlu1 %2655 }
 0x5aa   : > { %6480 = vpow2.f32 %v2700_v27  ;;  %v2674_v21 = vsub.f32 %v8150_v62, %v8360_v61  ;;  %5522 = vmatprep.mubr.msk.f32.mxu1 %vm530_vm1, %v6469_v20  ;;  %v6471_v28 = vpop.eup %6470  ;;  %5495 = vmatmul.mubr.f32.vlgmr.msra.gmra.mrb[0].mxu0 %v9517_v29  ;;  %v2702_v24 = vmul.f32 1.442695, %v2673_v37 }
 0x5ab   : > { %v8367_v0 = vpop.xlane.xlu0 %2658  ;;  %5970 = vmatpush3.bf16.msra.mxu0 %v9475_v12 }
 0x5ac   : > { %v6473_v9 = vpop.eup %6472  ;;  %v2704_v42 = vmul.f32 1.442695, %v2674_v21  ;;  %6482 = vpow2.f32 %v2702_v24  ;;  %v2675_v53 = vsub.f32 %v8155_v47, %v8367_v0  ;;  %5971 = vmatprep.subr.bf16.mxu0 %v9475_v12 }
 0x5ad   : > { %5523 = vmatmul.mubr.msk.f32.gmra.mrb[6].mxu1 %vm530_vm1, %v6471_v28 }
 0x5ae   : > { %6484 = vpow2.f32 %v2704_v42  ;;  %5525 = vmatprep.mubr.msk.f32.mxu1 %vm530_vm1, %v6473_v9  ;;  %v6475_v62 = vpop.eup %6474  ;;  %v2706_v38 = vmul.f32 1.442695, %v2675_v53 }
 0x5af   : > { %5972 = vmatpush3.bf16.msra.mxu0 %v9475_v12 }
 0x5b0   : > { %v6477_v10 = vpop.eup %6476  ;;  %6486 = vpow2.f32 %v2706_v38  ;;  %5973 = vmatprep.subr.bf16.mxu0 %v9475_v12 }
 0x5b1   : > { %5526 = vmatmul.mubr.msk.f32.gmra.mrb[8].mxu1 %vm530_vm1, %v6475_v62 }
 0x5b2   : > { %5528 = vmatprep.mubr.msk.f32.mxu1 %vm530_vm1, %v6477_v10  ;;  %v6479_v51 = vpop.eup %6478 }
 0x5b3   : > { %5974 = vmatpush3.bf16.msra.mxu0 %v9475_v12 }
 0x5b4   : > { %v6481_v6 = vpop.eup %6480  ;;  %5975 = vmatprep.subr.bf16.mxu0 %v9475_v12 }
 0x5b5   : > { %5529 = vmatmul.mubr.msk.f32.gmra.mrb[10].mxu1 %vm530_vm1, %v6479_v51 }
 0x5b6   : > { %5531 = vmatprep.mubr.msk.f32.mxu1 %vm530_vm1, %v6481_v6  ;;  %v6483_v47 = vpop.eup %6482 }
 0x5b7   : > { %5976 = vmatpush3.bf16.msra.mxu0 %v9475_v12 }
 0x5b8   : > { %v6485_v41 = vpop.eup %6484  ;;  %5977 = vmatprep.subr.bf16.mxu0 %v9474_v48 }
 0x5b9   : > { %5532 = vmatmul.mubr.msk.f32.gmra.mrb[12].mxu1 %vm530_vm1, %v6483_v47 }
 0x5ba   : > { %5534 = vmatprep.mubr.msk.f32.mxu1 %vm530_vm1, %v6485_v41  ;;  %v6487_v32 = vpop.eup %6486 }
 0x5bd   : > { %5535 = vmatmul.mubr.msk.f32.gmra.mrb[14].mxu1 %vm530_vm1, %v6487_v32 }
 0x5be   : > { %5569 = vmatprep.mubr.msk.f32.mxu1 %vm6703_vm4, %v9476_v1 }
 0x674   : > { %v5515_v16 = vpop.f32.mrb[0].mxu1 }
 0x675   : > { %6488 = vlog2.f32 %v5515_v16  ;;  %v2822_v60 = vpop.f32.mrb[1].mxu1 }
 0x676   : > { %6490 = vlog2.f32 %v2822_v60 }
 0x678   : > { %v5518_v8 = vpop.f32.mrb[2].mxu1 }
 0x679   : > { %6492 = vlog2.f32 %v5518_v8  ;;  %v2832_v17 = vpop.f32.mrb[3].mxu1 }
 0x67a   : > { %6494 = vlog2.f32 %v2832_v17  ;;  %v9519_v17 = vld [vmem:[#allocation64_spill] sm:$0xff] }
 0x67c   : > { %v5521_v15 = vpop.f32.mrb[4].mxu1 }
 0x67d   : > { %6496 = vlog2.f32 %v5521_v15  ;;  %v2842_v13 = vpop.f32.mrb[5].mxu1  ;;  %v8390_v46 = vpop.f32.mrb[0].mxu0 }
 0x67e   : > { %6498 = vlog2.f32 %v2842_v13  ;;  %v5496_v59 = vpop.f32.mrb[1].mxu0 }
 0x67f   : > { %v6489_v31 = vpop.eup %6488 }
 0x680   : > { %v6491_v39 = vpop.eup %6490  ;;  %v2904_v18 = vmul.f32 0.6931472, %v6489_v31  ;;  %v5524_v36 = vpop.f32.mrb[6].mxu1 }
 0x681   : > { %v2902_v45 = vmul.f32 0.6931472, %v6491_v39  ;;  %6500 = vlog2.f32 %v5524_v36  ;;  %v2852_v11 = vpop.f32.mrb[7].mxu1 }
 0x682   : > { %v2934_v26 = vadd.f32 %v2904_v18, %v8299_v30  ;;  %6502 = vlog2.f32 %v2852_v11 }
 0x683   : > { %v6493_v5 = vpop.eup %6492  ;;  %v2933_v4 = vadd.f32 %v2902_v45, %v8285_v44 }
 0x684   : > { %v6495_v40 = vpop.eup %6494  ;;  %v2950_v63 = vmul.f32 -0.01, %v2934_v26  ;;  %v2908_v35 = vmul.f32 0.6931472, %v6493_v5  ;;  %v5527_v34 = vpop.f32.mrb[8].mxu1 }
 0x685   : > { %v2949_v58 = vmul.f32 -0.01, %v2933_v4  ;;  %v2906_v20 = vmul.f32 0.6931472, %v6495_v40  ;;  %6504 = vlog2.f32 %v5527_v34  ;;  %v2862_v27 = vpop.f32.mrb[9].mxu1  ;;  %v9521_v40 = vld [vmem:[#allocation66_spill] sm:$0xff] }
 0x686   : > { %v2936_v37 = vadd.f32 %v2908_v35, %v8305_v2  ;;  %6506 = vlog2.f32 %v2862_v27  ;;  %v2968_v21 = vadd.f32 %v2950_v63, %v8010_v54  ;;  %v9518_v54 = vld [vmem:[#allocation65_spill] sm:$0xff] }
 0x687   : > { %v6497_v28 = vpop.eup %6496  ;;  %v2935_v30 = vadd.f32 %v2906_v20, %v8294_v43  ;;  %v2967_v24 = vadd.f32 %v2949_v58, %v8004_v3 }
 0x688   : > { %v6499_v9 = vpop.eup %6498  ;;  %v2952_v44 = vmul.f32 -0.01, %v2936_v37  ;;  %v2912_v42 = vmul.f32 0.6931472, %v6497_v28  ;;  %v5530_v53 = vpop.f32.mrb[10].mxu1  ;;  %v2984_v62 = vmul.f32 0.5, %v2968_v21 }
 0x689   : > { %v2951_v38 = vmul.f32 -0.01, %v2935_v30  ;;  %v2910_v10 = vmul.f32 0.6931472, %v6499_v9  ;;  %6508 = vlog2.f32 %v5530_v53  ;;  %v2872_v51 = vpop.f32.mrb[11].mxu1  ;;  %v2983_v6 = vmul.f32 0.5, %v2967_v24 }
 0x68a   : > { %v2938_v2 = vadd.f32 %v2912_v42, %v8314_v33  ;;  %6510 = vlog2.f32 %v2872_v51  ;;  %3006 = vperm.xlu0 %6422, %v2984_v62   ;;  %v2970_v47 = vadd.f32 %v2952_v44, %v9518_v54  ;;  %v9522_v37 = vld [vmem:[#allocation69_spill] sm:$0xff]  ;;  %v9523_v62 = vld [vmem:[#allocation68_spill] sm:$0xff] }
 0x68b   : > { %v6501_v41 = vpop.eup %6500  ;;  %v2937_v43 = vadd.f32 %v2910_v10, %v8310_v50  ;;  %3001 = vperm.xlu1 %6423, %v2983_v6   ;;  %v2969_v15 = vadd.f32 %v2951_v38, %v9519_v17  ;;  %v9520_v50 = vld [vmem:[#allocation67_spill] sm:$0xff] }
 0x68c   : > { %v6503_v3 = vpop.eup %6502  ;;  %v2954_v32 = vmul.f32 -0.01, %v2938_v2  ;;  %v2916_v16 = vmul.f32 0.6931472, %v6501_v41  ;;  %v5533_v60 = vpop.f32.mrb[12].mxu1  ;;  %v2986_v8 = vmul.f32 0.5, %v2970_v47 }
 0x68d   : > { %v2953_v13 = vmul.f32 -0.01, %v2937_v43  ;;  %v2914_v31 = vmul.f32 0.6931472, %v6503_v3  ;;  %6512 = vlog2.f32 %v5533_v60  ;;  %v2882_v59 = vpop.f32.mrb[13].mxu1  ;;  %v2985_v4 = vmul.f32 0.5, %v2969_v15 }
 0x68e   : > { %v2940_v33 = vadd.f32 %v2916_v16, %v8323_v57  ;;  %6514 = vlog2.f32 %v2882_v59  ;;  %v2972_v63 = vadd.f32 %v2954_v32, %v9521_v40  ;;  %v9525_v47 = vld [vmem:[#allocation70_spill] sm:$0xff] }
 0x68f   : > { %v6505_v39 = vpop.eup %6504  ;;  %v2939_v18 = vadd.f32 %v2914_v31, %v8319_v14  ;;  %3016 = vperm.xlu1 %6423, %v2986_v8   ;;  %v2971_v36 = vadd.f32 %v2953_v13, %v9520_v50  ;;  %v6656_v40 = vld [vmem:[#allocation3 + $0x68] sm:$0xff] }
 0x690   : > { %v6507_v45 = vpop.eup %6506  ;;  %v2956_v11 = vmul.f32 -0.01, %v2940_v33  ;;  %v2920_v26 = vmul.f32 0.6931472, %v6505_v39  ;;  %v8405_v5 = vpop.f32.mrb[14].mxu1  ;;  %v2988_v9 = vmul.f32 0.5, %v2972_v63 }
 0x691   : > { %v2955_v35 = vmul.f32 -0.01, %v2939_v18  ;;  %v2918_v34 = vmul.f32 0.6931472, %v6507_v45  ;;  %v2892_v58 = vpop.f32.mrb[15].mxu1  ;;  %v2987_v20 = vmul.f32 0.5, %v2971_v36 }
 0x692   : > { %v2942_v57 = vadd.f32 %v2920_v26, %v8333_v52  ;;  %6516 = vlog2.f32 %v2892_v58  ;;  %v2974_v38 = vadd.f32 %v2956_v11, %v9523_v62  ;;  %v6654_v18 = vld [vmem:[#allocation3 + $0x58] sm:$0xff]  ;;  %v9531_v62 = vld [vmem:[#allocation25_spill] sm:$0xff] }
 0x693   : > { %v6509_v27 = vpop.eup %6508  ;;  %6518 = vlog2.f32 %v8390_v46  ;;  %v2941_v14 = vadd.f32 %v2918_v34, %v8329_v56  ;;  %3011 = vperm.xlu1 %6423, %v2985_v4   ;;  %3021 = vperm.xlu0 %6422, %v2987_v20   ;;  %v2973_v21 = vadd.f32 %v2955_v35, %v9522_v37  ;;  %v9524_v56 = vld [vmem:[#allocation71_spill] sm:$0xff] }
 0x694   : > { %v6511_v28 = vpop.eup %6510  ;;  %v2958_v30 = vmul.f32 -0.01, %v2942_v57  ;;  %v2924_v24 = vmul.f32 0.6931472, %v6509_v27  ;;  %v2990_v32 = vmul.f32 0.5, %v2974_v38  ;;  %v6657_v35 = vld [vmem:[#allocation3 + $0x70] sm:$0xff]  ;;  %6520 = vlog2.f32 %v8405_v5 }
 0x695   : > { %v2957_v44 = vmul.f32 -0.01, %v2941_v14  ;;  %v2922_v42 = vmul.f32 0.6931472, %v6511_v28  ;;  %v2989_v53 = vmul.f32 0.5, %v2973_v21  ;;  %v9527_v21 = vld [vmem:[#allocation24_spill] sm:$0xff] }
 0x696   : > { %v2944_v52 = vadd.f32 %v2924_v24, %v8344_v23  ;;  %v2976_v41 = vadd.f32 %v2958_v30, %v9525_v47  ;;  %v6658_v27 = vld [vmem:[#allocation2] sm:$0x1]  ;;  %v9528_v30 = vld [vmem:[#allocation29_spill] sm:$0xff] }
 0x697   : > { %v6513_v10 = vpop.eup %6512  ;;  %v2943_v46 = vadd.f32 %v2922_v42, %v8339_v22  ;;  %3026 = vperm.xlu1 %6423, %v2988_v9   ;;  %3031 = vperm.xlu0 %6422, %v2989_v53   ;;  %v2975_v51 = vadd.f32 %v2957_v44, %v9524_v56  ;;  %v9526_v22 = vld [vmem:[#allocation72_spill] sm:$0xff]  ;;  %v9529_v44 = vld [vmem:[#allocation33_spill] sm:$0xff]  ;;  %v9530_v53 = vld [vmem:[#allocation35_spill] sm:$0xff] }
 0x698   : > { %v6515_v6 = vpop.eup %6514  ;;  %v2960_v2 = vmul.f32 -0.01, %v2944_v52  ;;  %v2928_v54 = vmul.f32 0.6931472, %v6513_v10  ;;  %v2992_v13 = vmul.f32 0.5, %v2976_v41  ;;  %v9532_v10 = vld [vmem:[#allocation37_spill] sm:$0xff] }
 0x699   : > { %v2959_v43 = vmul.f32 -0.01, %v2943_v46  ;;  %v2926_v3 = vmul.f32 0.6931472, %v6515_v6  ;;  %v2991_v16 = vmul.f32 0.5, %v2975_v51  ;;  %v9533_v51 = vld [vmem:[#allocation31_spill] sm:$0xff] }
 0x69a   : > { %v2946_v60 = vadd.f32 %v2928_v54, %v8355_v19  ;;  %v2978_v50 = vadd.f32 %v6654_v18, %v2960_v2  ;;  %v6655_v19 = vld [vmem:[#allocation3 + $0x60] sm:$0xff]  ;;  %v9537_v18 = vld [vmem:[#allocation48_spill] sm:$0xff] }
 0x69b   : > { %v2945_v23 = vadd.f32 %v2926_v3, %v8350_v55  ;;  %3036 = vperm.xlu1 %6423, %v2990_v32   ;;  %3041 = vperm.xlu0 %6422, %v2991_v16   ;;  %v2977_v8 = vadd.f32 %v2959_v43, %v9526_v22  ;;  %v9534_v41 = vld [vmem:[#allocation39_spill] sm:$0xff]  ;;  %v9535_v16 = vld [vmem:[#allocation34_spill] sm:$0xff] }
 0x69c   : > { %v6517_v17 = vpop.eup %6516  ;;  %v2962_v15 = vmul.f32 -0.01, %v2946_v60  ;;  %v2994_v26 = vmul.f32 0.5, %v2978_v50 }
 0x69d   : > { %v6519_v31 = vpop.eup %6518  ;;  %v2961_v59 = vmul.f32 -0.01, %v2945_v23  ;;  %v2930_v33 = vmul.f32 0.6931472, %v6517_v17  ;;  %v2993_v39 = vmul.f32 0.5, %v2977_v8  ;;  %v9536_v8 = vld [vmem:[#allocation44_spill] sm:$0xff] }
 0x69e   : > { %v2555_v55 = vmul.f32 0.6931472, %v6519_v31  ;;  %v2980_v63 = vadd.f32 %v6656_v40, %v2962_v15 }
 0x69f   : > { %v2947_v36 = vadd.f32 %v2930_v33, %v8360_v61  ;;  %3046 = vperm.xlu1 %6423, %v2992_v13   ;;  %3051 = vperm.xlu0 %6422, %v2993_v39   ;;  %v2979_v45 = vadd.f32 %v6655_v19, %v2961_v59 }
 0x6a0   : > { %v2556_v58 = vadd.f32 %v2555_v55, %v8257_v25  ;;  %v2996_v20 = vmul.f32 0.5, %v2980_v63 }
 0x6a1   : > { %v2963_v11 = vmul.f32 -0.01, %v2947_v36  ;;  %v2995_v4 = vmul.f32 0.5, %v2979_v45  ;;  %v6521_v36 = vpop.eup %6520 }
 0x6a2   : > { %v2557_v61 = vmul.f32 -0.01, %v2556_v58  ;;  %v2932_v63 = vmul.f32 0.6931472, %v6521_v36 }
 0x6a3   : > { %3056 = vperm.xlu1 %6423, %v2994_v26   ;;  %3061 = vperm.xlu0 %6422, %v2995_v4   ;;  %v2981_v34 = vadd.f32 %v6657_v35, %v2963_v11  ;;  %v9538_v4 = vld [vmem:[#allocation46_spill] sm:$0xff] }
 0x6a4   : > { %v2965_v14 = vadd.f32 %v6658_v27, %v2557_v61  ;;  %v2948_v27 = vadd.f32 %v2932_v63, %v8367_v0 }
 0x6a5   : > { %v2997_v57 = vmul.f32 0.5, %v2981_v34 }
 0x6a6   : > { %v2966_v37 = vmul.f32 0.5, %v2965_v14 }
 0x6a7   : > { %3066 = vperm.xlu1 %6423, %v2996_v20   ;;  %3071 = vperm.xlu0 %6422, %v2997_v57   ;;  %v9539_v57 = vld [vmem:[#allocation50_spill] sm:$0xff] }
 0x6a8   : > { %v8423_v28 = vrot.slane %v2966_v37, %v9527_v21 }
 0x6aa   : > { %v3293_v24 = vsub.f32 %v8423_v28, %v9528_v30  ;;  %v3295_v42 = vsub.f32 %v8423_v28, %v9529_v44  ;;  %v3292_v25 = vsub.f32 %v8423_v28, %v9530_v53  ;;  %v3297_v46 = vsub.f32 %v8423_v28, %v9532_v10 }
 0x6ab   : > { %v3294_v6 = vsub.f32 %v8423_v28, %v9533_v51  ;;  %v3298_v43 = vsub.f32 %v8423_v28, %v9534_v41  ;;  %v3296_v60 = vsub.f32 %v8423_v28, %v9535_v16  ;;  %v3300_v17 = vsub.f32 %v8423_v28, %v9536_v8 }
 0x6ac   : > { %v3309_v9 = vmul.f32 100.0, %v3293_v24  ;;  %v3311_v52 = vmul.f32 100.0, %v3295_v42  ;;  %v3308_v56 = vmul.f32 100.0, %v3292_v25  ;;  %v3313_v47 = vmul.f32 100.0, %v3297_v46 }
 0x6ad   : > { %v3310_v32 = vmul.f32 100.0, %v3294_v6  ;;  %v3314_v22 = vmul.f32 100.0, %v3298_v43  ;;  %v3312_v31 = vmul.f32 100.0, %v3296_v60  ;;  %v3316_v39 = vmul.f32 100.0, %v3300_v17  ;;  %v9541_v60 = vld [vmem:[#allocation40_spill] sm:$0xff]  ;;  %v9542_v17 = vld [vmem:[#allocation42_spill] sm:$0xff] }
 0x6ae   : > { %v8432_v38 = vadd.f32 %v3309_v9, %v9531_v62  ;;  %v8442_v54 = vadd.f32 %v3311_v52, %v9531_v62  ;;  %v8447_v3 = vadd.f32 %v3308_v56, %v9531_v62  ;;  %v8454_v23 = vadd.f32 %v3313_v47, %v9531_v62  ;;  %v9540_v9 = vld [vmem:[#allocation54_spill] sm:$0xff] }
 0x6af   : > { %v8461_v13 = vadd.f32 %v3310_v32, %v9531_v62  ;;  %v8466_v33 = vadd.f32 %v3314_v22, %v9531_v62  ;;  %v3302_v50 = vsub.f32 %v8423_v28, %v9537_v18  ;;  %v8473_v45 = vadd.f32 %v3312_v31, %v9531_v62  ;;  %v6659_v56 = vld [vmem:[#allocation3 + $0x78] sm:$0xff] }
 0x6b0   : > { %v3343_v2 = vsel %vm530_vm1, %v8432_v38, -inf  ;;  %v3349_v5 = vsel %vm530_vm1, %v8442_v54, -inf  ;;  %v3340_v15 = vsel %vm530_vm1, %v8447_v3, -inf  ;;  %v3355_v59 = vsel %vm530_vm1, %v8454_v23, -inf }
 0x6b1   : > { %v3346_v19 = vsel %vm530_vm1, %v8461_v13, -inf  ;;  %v3358_v55 = vsel %vm530_vm1, %v8466_v33, -inf  ;;  %v8478_v11 = vadd.f32 %v3316_v39, %v9531_v62  ;;  %v3318_v26 = vmul.f32 100.0, %v3302_v50  ;;  %v9543_v39 = vld [vmem:[#allocation53_spill] sm:$0xff] }
 0x6b2   : > { %v3303_v40 = vsub.f32 %v8423_v28, %v9538_v4  ;;  %v3352_v35 = vsel %vm530_vm1, %v8473_v45, -inf  ;;  %v3305_v61 = vsub.f32 %v8423_v28, %v9539_v57  ;;  %v3307_v42 = vsub.f32 %v8423_v28, %v9540_v9 }
 0x6b3   : > { %v3364_v34 = vsel %vm530_vm1, %v8478_v11, -inf  ;;  %v8487_v58 = vadd.f32 %v3318_v26, %v9531_v62  ;;  %v2964_v25 = vmul.f32 -0.01, %v2948_v27  ;;  %v3304_v50 = vsub.f32 %v8423_v28, %v9543_v39  ;;  %v9544_v26 = vld [vmem:[#allocation56_spill] sm:$0xff] }
 0x6b4   : > { %v3319_v20 = vmul.f32 100.0, %v3303_v40  ;;  %v3321_v24 = vmul.f32 100.0, %v3305_v61  ;;  %v3323_v0 = vmul.f32 100.0, %v3307_v42  ;;  %v3306_v40 = vsub.f32 %v8423_v28, %v9544_v26 }
 0x6b5   : > { %v3370_v14 = vsel %vm530_vm1, %v8487_v58, -inf  ;;  %v2982_v6 = vadd.f32 %v6659_v56, %v2964_v25 }
 0x6b6   : > { %v8495_v37 = vadd.f32 %v3319_v20, %v9531_v62  ;;  %v8502_v46 = vadd.f32 %v3321_v24, %v9531_v62  ;;  %v8507_v47 = vadd.f32 %v3323_v0, %v9531_v62 }
 0x6b7   : > { %v2998_v43 = vmul.f32 0.5, %v2982_v6 }
 0x6b8   : > { %v3373_v52 = vsel %vm530_vm1, %v8495_v37, -inf  ;;  %v3385_v32 = vsel %vm530_vm1, %v8507_v47, -inf }
 0x6c6   : > { %3344 = vmax.xlane.f32.xlu0 %v3343_v2  ;;  %v3379_v2 = vsel %vm530_vm1, %v8502_v46, -inf }
 0x6ca   : > { %3350 = vmax.xlane.f32.xlu0 %v3349_v5  ;;  %v3299_v5 = vsub.f32 %v8423_v28, %v9541_v60 }
 0x6cb   : > { %3341 = vmax.xlane.f32.xlu1 %v3340_v15  ;;  %v3301_v15 = vsub.f32 %v8423_v28, %v9542_v17  ;;  %v9545_v28 = vld [vmem:[#allocation7_spill] sm:$0xff] }
 0x6cc   : > { %v3315_v22 = vmul.f32 100.0, %v3299_v5 }
 0x6ce   : > { %3356 = vmax.xlane.f32.xlu0 %v3355_v59  ;;  %v8516_v31 = vadd.f32 %v3315_v22, %v9531_v62  ;;  %v3317_v59 = vmul.f32 100.0, %v3301_v15 }
 0x6cf   : > { %3347 = vmax.xlane.f32.xlu1 %v3346_v19 }
 0x6d0   : > { %v3361_v36 = vsel %vm530_vm1, %v8516_v31, -inf  ;;  %v8523_v19 = vadd.f32 %v3317_v59, %v9531_v62 }
 0x6d2   : > { %3359 = vmax.xlane.f32.xlu0 %v3358_v55  ;;  %v3320_v55 = vmul.f32 100.0, %v3304_v50  ;;  %v3367_v63 = vsel %vm530_vm1, %v8523_v19, -inf }
 0x6d3   : > { %3353 = vmax.xlane.f32.xlu1 %v3352_v35 }
 0x6d4   : > { %v8530_v35 = vadd.f32 %v3320_v55, %v9531_v62 }
 0x6d6   : > { %3365 = vmax.xlane.f32.xlu0 %v3364_v34  ;;  %v3322_v34 = vmul.f32 100.0, %v3306_v40  ;;  %v3376_v20 = vsel %vm530_vm1, %v8530_v35, -inf }
 0x6d8   : > { %v8535_v61 = vadd.f32 %v3322_v34, %v9531_v62  ;;  %v9546_v62 = vld [vmem:[#allocation26_spill] sm:$0xff] }
 0x6da   : > { %3371 = vmax.xlane.f32.xlu0 %v3370_v14  ;;  %v3382_v27 = vsel %vm530_vm1, %v8535_v61, -inf }
 0x6de   : > { %3374 = vmax.xlane.f32.xlu0 %v3373_v52 }
 0x6e2   : > { %3380 = vmax.xlane.f32.xlu0 %v3379_v2 }
 0x6e4   : > { %3076 = vperm.xlu1 %6423, %v2998_v43  }
 0x6e6   : > { %3386 = vmax.xlane.f32.xlu0 %v3385_v32 }
 0x708   : > { %3362 = vmax.xlane.f32.xlu1 %v3361_v36 }
 0x709   : > { %v3007_v24 = vpop.permute.xlu0 %3006 }
 0x70a   : > { %v3002_v14 = vpop.permute.xlu1 %3001  ;;  %v3080_v22 = vsub.f32 %v3007_v24, %v9528_v30 }
 0x70b   : > { %v3079_v15 = vsub.f32 %v3002_v14, %v9530_v53  ;;  %v9547_v53 = vld [vmem:[#allocation36_spill] sm:$0xff] }
 0x70c   : > { %3368 = vmax.xlane.f32.xlu1 %v3367_v63  ;;  %v3096_v55 = vmul.f32 100.0, %v3080_v22 }
 0x70d   : > { %v3095_v63 = vmul.f32 100.0, %v3079_v15  ;;  %v9549_v15 = vld [vmem:[#allocation27_spill] sm:$0xff] }
 0x70e   : > { %v3017_v42 = vpop.permute.xlu1 %3016  ;;  %v8548_v21 = vadd.f32 %v3096_v55, %v9546_v62 }
 0x70f   : > { %v3082_v59 = vsub.f32 %v3017_v42, %v9529_v44  ;;  %v8554_v42 = vadd.f32 %v3095_v63, %v9547_v53 }
 0x710   : > { %3377 = vmax.xlane.f32.xlu1 %v3376_v20 }
 0x711   : > { %v3098_v34 = vmul.f32 100.0, %v3082_v59 }
 0x712   : > { %v3022_v25 = vpop.permute.xlu0 %3021  ;;  %v3012_v52 = vpop.permute.xlu1 %3011 }
 0x713   : > { %v3081_v50 = vsub.f32 %v3012_v52, %v9533_v51  ;;  %v3083_v20 = vsub.f32 %v3022_v25, %v9535_v16  ;;  %v9548_v52 = vld [vmem:[#allocation28_spill] sm:$0xff] }
 0x714   : > { %3383 = vmax.xlane.f32.xlu1 %v3382_v27  ;;  %v8557_v51 = vadd.f32 %v3098_v34, %v9548_v52  ;;  %v9551_v52 = vld [vmem:[#allocation32_spill] sm:$0xff] }
 0x715   : > { %v3097_v27 = vmul.f32 100.0, %v3081_v50  ;;  %v3099_v22 = vmul.f32 100.0, %v3083_v20  ;;  %v8566_v50 = vsel %vm530_vm1, %v8548_v21, -inf }
 0x716   : > { %v3032_v0 = vpop.permute.xlu0 %3031  ;;  %v3027_v56 = vpop.permute.xlu1 %3026 }
 0x717   : > { %v3084_v24 = vsub.f32 %v3027_v56, %v9532_v10  ;;  %v8560_v59 = vadd.f32 %v3097_v27, %v9549_v15  ;;  %v3085_v56 = vsub.f32 %v3032_v0, %v9534_v41  ;;  %v8582_v15 = vsel %vm530_vm1, %v8557_v51, -inf  ;;  %v9550_v0 = vld [vmem:[#allocation30_spill] sm:$0xff] }
 0x718   : > { %v8585_v41 = vadd.f32 %v3099_v22, %v9550_v0 }
 0x719   : > { %v3100_v63 = vmul.f32 100.0, %v3084_v24 }
 0x71a   : > { %v3042_v6 = vpop.permute.xlu0 %3041  ;;  %v3037_v2 = vpop.permute.xlu1 %3036 }
 0x71b   : > { %v3086_v10 = vsub.f32 %v3037_v2, %v9541_v60  ;;  %v3087_v34 = vsub.f32 %v3042_v6, %v9536_v8  ;;  %v8591_v6 = vsel %vm530_vm1, %v8560_v59, -inf }
 0x71d   : > { %v3102_v44 = vmul.f32 100.0, %v3086_v10  ;;  %v3103_v53 = vmul.f32 100.0, %v3087_v34  ;;  %v9552_v10 = vld [vmem:[#allocation38_spill] sm:$0xff] }
 0x71e   : > { %v3052_v43 = vpop.permute.xlu0 %3051  ;;  %v3047_v32 = vpop.permute.xlu1 %3046 }
 0x71f   : > { %v3088_v20 = vsub.f32 %v3047_v32, %v9542_v17  ;;  %v3089_v32 = vsub.f32 %v3052_v43, %v9537_v18  ;;  %v3101_v17 = vmul.f32 100.0, %v3085_v56 }
 0x721   : > { %v3104_v62 = vmul.f32 100.0, %v3088_v20 }
 0x722   : > { %v8540_v5 = vpop.permute.xlu0 %3061  ;;  %v3057_v36 = vpop.permute.xlu1 %3056 }
 0x723   : > { %v3090_v60 = vsub.f32 %v3057_v36, %v9538_v4  ;;  %v3091_v43 = vsub.f32 %v8540_v5, %v9543_v39  ;;  %v9557_v39 = vld [vmem:[#allocation47_spill] sm:$0xff] }
 0x725   : > { %4072 = vperm.xlu1 %6423, %v9545_v28   ;;  %v3106_v34 = vmul.f32 100.0, %v3090_v60 }
 0x726   : > { %v3072_v40 = vpop.permute.xlu0 %3071  ;;  %v3067_v14 = vpop.permute.xlu1 %3066 }
 0x727   : > { %v3092_v16 = vsub.f32 %v3067_v14, %v9539_v57  ;;  %v3105_v14 = vmul.f32 100.0, %v3089_v32  ;;  %v8638_v18 = vadd.f32 %v3106_v34, %v9557_v39 }
 0x729   : > { %v3108_v20 = vmul.f32 100.0, %v3092_v16 }
 0x753   : > { %v8550_v12 = vpop.xlane.xlu0 %3344 }
 0x754   : > { %v3389_v25 = vsub.f32 %v8432_v38, %v8550_v12  ;;  %v8578_v38 = vsel %vm530_vm1, %v8554_v42, -inf }
 0x756   : > { %v3406_v24 = vmul.f32 1.442695, %v3389_v25 }
 0x757   : > { %v8569_v55 = vpop.xlane.xlu0 %3350 }
 0x758   : > { %v8574_v27 = vpop.xlane.xlu1 %3341  ;;  %v3391_v8 = vsub.f32 %v8442_v54, %v8569_v55  ;;  %v3093_v54 = vsub.f32 %v3072_v40, %v9544_v26  ;;  %v9553_v40 = vld [vmem:[#allocation41_spill] sm:$0xff] }
 0x759   : > { %v3388_v2 = vsub.f32 %v8447_v3, %v8574_v27  ;;  %v8601_v3 = vadd.f32 %v3100_v63, %v9551_v52  ;;  %v8613_v63 = vadd.f32 %v3101_v17, %v9552_v10  ;;  %v3107_v17 = vmul.f32 100.0, %v3091_v43  ;;  %v9556_v26 = vld [vmem:[#allocation49_spill] sm:$0xff] }
 0x75a   : > { %v3410_v25 = vmul.f32 1.442695, %v3391_v8  ;;  %v3109_v60 = vmul.f32 100.0, %v3093_v54 }
 0x75b   : > { %v3404_v22 = vmul.f32 1.442695, %v3388_v2  ;;  %v8598_v0 = vpop.xlane.xlu0 %3356  ;;  %v3133_v5 = vsel %vm530_vm1, %v8601_v3, -inf }
 0x75c   : > { %v8603_v30 = vpop.xlane.xlu1 %3347  ;;  %v3393_v56 = vsub.f32 %v8454_v23, %v8598_v0 }
 0x75d   : > { %6522 = vpow2.f32 %v3404_v22  ;;  %v3390_v36 = vsub.f32 %v8461_v13, %v8603_v30  ;;  %v8620_v22 = vadd.f32 %v3102_v44, %v9553_v40  ;;  %v9554_v13 = vld [vmem:[#allocation43_spill] sm:$0xff]  ;;  %v8635_v44 = vadd.f32 %v3105_v14, %v9556_v26 }
 0x75e   : > { %6524 = vpow2.f32 %v3406_v24  ;;  %v8623_v32 = vadd.f32 %v3104_v62, %v9554_v13  ;;  %v9555_v24 = vld [vmem:[#allocation45_spill] sm:$0xff]  ;;  %v3414_v62 = vmul.f32 1.442695, %v3393_v56  ;;  %v9559_v56 = vld [vmem:[#allocation52_spill] sm:$0xff] }
 0x75f   : > { %v3408_v2 = vmul.f32 1.442695, %v3390_v36  ;;  %v8615_v57 = vpop.xlane.xlu0 %3359  ;;  %v8632_v36 = vadd.f32 %v3103_v53, %v9555_v24  ;;  %v3135_v53 = vsel %vm530_vm1, %v8613_v63, -inf  ;;  %v8652_v34 = vadd.f32 %v3107_v17, %v9559_v56 }
 0x760   : > { %v3394_v23 = vsub.f32 %v8466_v33, %v8615_v57  ;;  %v8627_v8 = vpop.xlane.xlu1 %3353  ;;  %v9558_v33 = vld [vmem:[#allocation51_spill] sm:$0xff]  ;;  %v3141_v14 = vsel %vm530_vm1, %v8623_v32, -inf  ;;  %v3143_v26 = vsel %vm530_vm1, %v8635_v44, -inf  ;;  %v3145_v17 = vsel %vm530_vm1, %v8638_v18, -inf }
 0x761   : > { %6526 = vpow2.f32 %v3408_v2  ;;  %v3392_v16 = vsub.f32 %v8473_v45, %v8627_v8  ;;  %v8641_v4 = vadd.f32 %v3108_v20, %v9558_v33  ;;  %v3131_v2 = vsel %vm530_vm1, %v8585_v41, -inf }
 0x762   : > { %6528 = vpow2.f32 %v3410_v25  ;;  %v3416_v43 = vmul.f32 1.442695, %v3394_v23  ;;  %v3137_v45 = vsel %vm530_vm1, %v8620_v22, -inf  ;;  %v8655_v20 = vadd.f32 %v3109_v60, %v9516_v49 }
 0x763   : > { %v3412_v54 = vmul.f32 1.442695, %v3392_v16  ;;  %v3134_v16 = vmax.f32 %v8566_v50, %v3133_v5  ;;  %v3139_v33 = vsel %vm530_vm1, %v8632_v36, -inf  ;;  %v3149_v60 = vsel %vm530_vm1, %v8641_v4, -inf }
 0x764   : > { %v3077_v25 = vpop.permute.xlu1 %3076  ;;  %v3136_v50 = vmax.f32 %v8591_v6, %v3135_v53  ;;  %v3138_v5 = vmax.f32 %v8582_v15, %v3137_v45 }
 0x765   : > { %6530 = vpow2.f32 %v3412_v54  ;;  %v3094_v23 = vsub.f32 %v3077_v25, %v9540_v9  ;;  %v3132_v25 = vmax.f32 %v8578_v38, %v3131_v2  ;;  %v3142_v56 = vmax.f32 %v3134_v16, %v3141_v14 }
 0x766   : > { %6532 = vpow2.f32 %v3414_v62  ;;  %v3147_v62 = vsel %vm530_vm1, %v8652_v34, -inf  ;;  %v3151_v9 = vsel %vm530_vm1, %v8655_v20, -inf  ;;  %v3144_v38 = vmax.f32 %v3136_v50, %v3143_v26 }
 0x767   : > { %v6523_v39 = vpop.eup %6522  ;;  %6534 = vpow2.f32 %v3416_v43  ;;  %v3110_v54 = vmul.f32 100.0, %v3094_v23  ;;  %v3140_v43 = vmax.f32 %v3132_v25, %v3139_v33  ;;  %v3146_v2 = vmax.f32 %v3138_v5, %v3145_v17 }
 0x768   : > { %v6525_v49 = vpop.eup %6524  ;;  %5588 = vmatprep.mubr.msk.f32.mxu0 %vm530_vm1, %v6523_v39  ;;  %v3150_v6 = vmax.f32 %v3142_v56, %v3149_v60  ;;  %v3152_v14 = vmax.f32 %v3144_v38, %v3151_v9 }
 0x769   : > { %v8676_v24 = vadd.f32 %v3110_v54, %v9515_v7  ;;  %5589 = vmatmul.mubr.msk.f32.vlgmr.msra.gmra.mrb[2].mxu0 %vm530_vm1, %v6525_v49  ;;  %v3148_v45 = vmax.f32 %v3140_v43, %v3147_v62 }
 0x76b   : > { %v6527_v53 = vpop.eup %6526  ;;  %v3153_v15 = vsel %vm530_vm1, %v8676_v24, -inf  ;;  %v3155_v16 = vmax.f32 %v3148_v45, %v3150_v6  ;;  %v8704_v45 = vpop.xlane.xlu0 %3365 }
 0x76c   : > { %v6529_v39 = vpop.eup %6528  ;;  %v3154_v23 = vmax.f32 %v3146_v2, %v3153_v15  ;;  %5591 = vmatprep.mubr.msk.f32.mxu0 %vm530_vm1, %v6527_v53 }
 0x76d   : > { %5592 = vmatmul.mubr.msk.f32.gmra.mrb[4].mxu0 %vm530_vm1, %v6529_v39 }
 0x76e   : > { %v3156_v54 = vmax.f32 %v3152_v14, %v3154_v23 }
 0x76f   : > { %v6531_v7 = vpop.eup %6530 }
 0x770   : > { %v6533_v49 = vpop.eup %6532  ;;  %v3157_v33 = vmax.f32 %v3155_v16, %v3156_v54  ;;  %5594 = vmatprep.mubr.msk.f32.mxu0 %vm530_vm1, %v6531_v7  ;;  %v8710_v54 = vpop.xlane.xlu0 %3371 }
 0x771   : > { %v6535_v26 = vpop.eup %6534  ;;  %5595 = vmatmul.mubr.msk.f32.gmra.mrb[6].mxu0 %vm530_vm1, %v6533_v49 }
 0x772   : > { %v3158_v56 = vrot.slane %v3157_v33, 4  ;;  %5597 = vmatprep.mubr.msk.f32.mxu0 %vm530_vm1, %v6535_v26 }
 0x774   : > { %v3159_v17 = vmax.f32 %v3157_v33, %v3158_v56 }
 0x776   : > { %v3160_v9 = vrot.slane %v3159_v17, 2 }
 0x778   : > { %v3161_v60 = vmax.f32 %v3159_v17, %v3160_v9 }
 0x77a   : > { %v3162_v25 = vrot.slane %v3161_v60, 1 }
 0x77c   : > { %v8686_v50 = vmax.f32 %v3161_v60, %v3162_v25 }
 0x77e   : > { %v3164_v5 = vsub.f32 %v8554_v42, %v8686_v50  ;;  %v3165_v62 = vsub.f32 %v8548_v21, %v8686_v50  ;;  %v3166_v7 = vsub.f32 %v8560_v59, %v8686_v50  ;;  %v3167_v43 = vsub.f32 %v8557_v51, %v8686_v50 }
 0x77f   : > { %v3168_v53 = vsub.f32 %v8585_v41, %v8686_v50  ;;  %v3169_v39 = vsub.f32 %v8601_v3, %v8686_v50  ;;  %v3170_v42 = vsub.f32 %v8613_v63, %v8686_v50  ;;  %v3171_v51 = vsub.f32 %v8620_v22, %v8686_v50 }
 0x780   : > { %v3180_v38 = vmul.f32 1.442695, %v3164_v5  ;;  %v3182_v2 = vmul.f32 1.442695, %v3165_v62  ;;  %v3184_v6 = vmul.f32 1.442695, %v3166_v7  ;;  %v3172_v14 = vsub.f32 %v8632_v36, %v8686_v50  ;;  %v8723_v5 = vpop.xlane.xlu0 %3374 }
 0x781   : > { %v3186_v15 = vmul.f32 1.442695, %v3167_v43  ;;  %v3188_v21 = vmul.f32 1.442695, %v3168_v53  ;;  %v3190_v59 = vmul.f32 1.442695, %v3169_v39  ;;  %v3173_v23 = vsub.f32 %v8623_v32, %v8686_v50 }
 0x782   : > { %6536 = vpow2.f32 %v3180_v38  ;;  %v3192_v41 = vmul.f32 1.442695, %v3170_v42  ;;  %v3194_v3 = vmul.f32 1.442695, %v3171_v51  ;;  %v3196_v63 = vmul.f32 1.442695, %v3172_v14 }
 0x783   : > { %6538 = vpow2.f32 %v3182_v2  ;;  %v3174_v22 = vsub.f32 %v8635_v44, %v8686_v50  ;;  %v3198_v33 = vmul.f32 1.442695, %v3173_v23  ;;  %v3175_v26 = vsub.f32 %v8638_v18, %v8686_v50 }
 0x784   : > { %6540 = vpow2.f32 %v3184_v6  ;;  %v3176_v32 = vsub.f32 %v8652_v34, %v8686_v50  ;;  %v3177_v60 = vsub.f32 %v8641_v4, %v8686_v50  ;;  %v3396_v18 = vsub.f32 %v8478_v11, %v8704_v45 }
 0x785   : > { %6542 = vpow2.f32 %v3186_v15  ;;  %v3200_v9 = vmul.f32 1.442695, %v3174_v22  ;;  %v3202_v44 = vmul.f32 1.442695, %v3175_v26  ;;  %v3179_v34 = vsub.f32 %v8676_v24, %v8686_v50 }
 0x786   : > { %6544 = vpow2.f32 %v3188_v21  ;;  %v3204_v43 = vmul.f32 1.442695, %v3176_v32  ;;  %v3206_v4 = vmul.f32 1.442695, %v3177_v60  ;;  %v3178_v2 = vsub.f32 %v8655_v20, %v8686_v50  ;;  %v8738_v20 = vpop.xlane.xlu0 %3380 }
 0x787   : > { %6546 = vpow2.f32 %v3190_v59  ;;  %v3420_v53 = vmul.f32 1.442695, %v3396_v18  ;;  %v3398_v24 = vsub.f32 %v8487_v58, %v8710_v54  ;;  %v3210_v21 = vmul.f32 1.442695, %v3179_v34 }
 0x788   : > { %6548 = vpow2.f32 %v3192_v41  ;;  %v3399_v59 = vsub.f32 %v8495_v37, %v8723_v5  ;;  %v3208_v51 = vmul.f32 1.442695, %v3178_v2 }
 0x789   : > { %6550 = vpow2.f32 %v3194_v3  ;;  %v3424_v14 = vmul.f32 1.442695, %v3398_v24 }
 0x78a   : > { %6552 = vpow2.f32 %v3196_v63  ;;  %v3401_v63 = vsub.f32 %v8502_v46, %v8738_v20 }
 0x78b   : > { %6554 = vpow2.f32 %v3198_v33  ;;  %v8752_v33 = vpop.xlane.xlu0 %3386 }
 0x78c   : > { %v6537_v16 = vpop.eup %6536  ;;  %6556 = vpow2.f32 %v3200_v9  ;;  %v3403_v9 = vsub.f32 %v8507_v47, %v8752_v33 }
 0x78d   : > { %v6539_v49 = vpop.eup %6538  ;;  %6558 = vpow2.f32 %v3202_v44 }
 0x78e   : > { %v6541_v36 = vpop.eup %6540  ;;  %v5946_v56 = vpack.c.bf16 %v6539_v49, %v6537_v16  ;;  %6560 = vpow2.f32 %v3204_v43  ;;  %v3426_v16 = vmul.f32 1.442695, %v3399_v59  ;;  %v3434_v34 = vmul.f32 1.442695, %v3403_v9 }
 0x78f   : > { %v6543_v17 = vpop.eup %6542  ;;  %6562 = vpow2.f32 %v3206_v4 }
 0x790   : > { %5947 = vmatpush3.bf16.msra.mxu1 %v5946_v56  ;;  %v6545_v25 = vpop.eup %6544  ;;  %v5949_v62 = vpack.c.bf16 %v6543_v17, %v6541_v36  ;;  %v3430_v17 = vmul.f32 1.442695, %v3401_v63 }
 0x791   : > { %5948 = vmatprep.subr.bf16.mxu1 %v9474_v48  ;;  %v6547_v7 = vpop.eup %6546 }
 0x792   : > { %v6549_v11 = vpop.eup %6548  ;;  %v5952_v15 = vpack.c.bf16 %v6547_v7, %v6545_v25 }
 0x793   : > { %v6551_v39 = vpop.eup %6550 }
 0x794   : > { %5950 = vmatpush3.bf16.msra.mxu1 %v5949_v62  ;;  %v6553_v58 = vpop.eup %6552  ;;  %v5955_v3 = vpack.c.bf16 %v6551_v39, %v6549_v11 }
 0x795   : > { %v8727_v38 = vpop.xlane.xlu1 %3362  ;;  %5951 = vmatprep.subr.bf16.mxu1 %v9474_v48  ;;  %v6555_v23 = vpop.eup %6554 }
 0x796   : > { %v3395_v6 = vsub.f32 %v8516_v31, %v8727_v38  ;;  %v6557_v49 = vpop.eup %6556  ;;  %v5958_v26 = vpack.c.bf16 %v6555_v23, %v6553_v58 }
 0x797   : > { %v6559_v36 = vpop.eup %6558 }
 0x798   : > { %v3418_v42 = vmul.f32 1.442695, %v3395_v6  ;;  %5953 = vmatpush3.bf16.msra.mxu1 %v5952_v15  ;;  %v6561_v32 = vpop.eup %6560  ;;  %v5961_v44 = vpack.c.bf16 %v6559_v36, %v6557_v49 }
 0x799   : > { %v8740_v31 = vpop.xlane.xlu1 %3368  ;;  %5954 = vmatprep.subr.bf16.mxu1 %v9474_v48  ;;  %v6563_v60 = vpop.eup %6562 }
 0x79a   : > { %6564 = vpow2.f32 %v3418_v42  ;;  %v3397_v41 = vsub.f32 %v8523_v19, %v8740_v31 }
 0x79b   : > { %6566 = vpow2.f32 %v3420_v53 }
 0x79c   : > { %6568 = vpow2.f32 %v3210_v21  ;;  %v3422_v37 = vmul.f32 1.442695, %v3397_v41  ;;  %5956 = vmatpush3.bf16.msra.mxu1 %v5955_v3 }
 0x79d   : > { %v8747_v22 = vpop.xlane.xlu1 %3377  ;;  %6570 = vpow2.f32 %v3208_v51  ;;  %5957 = vmatprep.subr.bf16.mxu1 %v9474_v48 }
 0x79e   : > { %6572 = vpow2.f32 %v3422_v37  ;;  %v3400_v19 = vsub.f32 %v8530_v35, %v8747_v22 }
 0x79f   : > { %6574 = vpow2.f32 %v3424_v14 }
 0x7a0   : > { %v3428_v56 = vmul.f32 1.442695, %v3400_v19  ;;  %6576 = vpow2.f32 %v3426_v16  ;;  %5959 = vmatpush3.bf16.msra.mxu1 %v5958_v26 }
 0x7a1   : > { %v8754_v46 = vpop.xlane.xlu1 %3383  ;;  %5960 = vmatprep.subr.bf16.mxu1 %v9474_v48 }
 0x7a2   : > { %6578 = vpow2.f32 %v3428_v56  ;;  %v3402_v35 = vsub.f32 %v8535_v61, %v8754_v46  ;;  %v5964_v61 = vpack.c.bf16 %v6563_v60, %v6561_v32 }
 0x7a3   : > { %6580 = vpow2.f32 %v3430_v17 }
 0x7a4   : > { %v6565_v25 = vpop.eup %6564  ;;  %v3432_v18 = vmul.f32 1.442695, %v3402_v35  ;;  %5962 = vmatpush3.bf16.msra.mxu1 %v5961_v44  ;;  %v9560_v35 = vld [vmem:[#allocation9_spill] sm:$0xff] }
 0x7a5   : > { %v6567_v62 = vpop.eup %6566  ;;  %5598 = vmatmul.mubr.msk.f32.gmra.mrb[8].mxu0 %vm530_vm1, %v6565_v25  ;;  %5963 = vmatprep.subr.bf16.mxu1 %v9474_v48 }
 0x7a6   : > { %v6569_v7 = vpop.eup %6568  ;;  %6582 = vpow2.f32 %v3432_v18  ;;  %5600 = vmatprep.mubr.msk.f32.mxu0 %vm530_vm1, %v6567_v62 }
 0x7a7   : > { %v6571_v47 = vpop.eup %6570  ;;  %6584 = vpow2.f32 %v3434_v34  ;;  %v9561_v34 = vld [vmem:[#allocation10_spill] sm:$0xff] }
 0x7a8   : > { %v6573_v43 = vpop.eup %6572  ;;  %5965 = vmatpush3.bf16.msra.mxu1 %v5964_v61  ;;  %v5967_v6 = vpack.c.bf16 %v6569_v7, %v6571_v47 }
 0x7a9   : > { %v6575_v4 = vpop.eup %6574  ;;  %5601 = vmatmul.mubr.msk.f32.gmra.mrb[10].mxu0 %vm530_vm1, %v6573_v43  ;;  %5966 = vmatprep.subr.bf16.mxu1 %v9474_v48 }
 0x7aa   : > { %5603 = vmatprep.mubr.msk.f32.mxu0 %vm530_vm1, %v6575_v4  ;;  %v6577_v2 = vpop.eup %6576 }
 0x7ac   : > { %v6579_v11 = vpop.eup %6578  ;;  %5968 = vmatpush3.bf16.msra.mxu1 %v5967_v6 }
 0x7ad   : > { %5604 = vmatmul.mubr.msk.f32.gmra.mrb[12].mxu0 %vm530_vm1, %v6577_v2  ;;  %6009 = vmatprep.subr.bf16.mxu1 %v9474_v48  ;;  %v6581_v53 = vpop.eup %6580 }
 0x7ae   : > { %5606 = vmatprep.mubr.msk.f32.mxu0 %vm530_vm1, %v6579_v11  ;;  %v9563_v11 = vld [vmem:[#allocation14_spill] sm:$0xff] }
 0x7af   : > { %5570 = vmatmul.mubr.f32.vlgmr.msra.gmra.mrb[16].mxu1 %v9517_v29 }
 0x7b0   : > { %v6583_v24 = vpop.eup %6582  ;;  %5698 = vmatprep.mubr.msk.f32.mxu1 %vm6703_vm4, %v9476_v1 }
 0x7b1   : > { %5607 = vmatmul.mubr.msk.f32.gmra.mrb[14].mxu0 %vm530_vm1, %v6581_v53  ;;  %v6585_v15 = vpop.eup %6584 }
 0x7b2   : > { %5609 = vmatprep.mubr.msk.f32.mxu0 %vm530_vm1, %v6583_v24  ;;  %v9564_v24 = vld [vmem:[#allocation12_spill] sm:$0xff] }
 0x7b5   : > { %5610 = vmatmul.mubr.msk.f32.gmra.mrb[16].mxu0 %vm530_vm1, %v6585_v15 }
 0x7b6   : > { %5644 = vmatprep.mubr.msk.f32.mxu0 %vm6703_vm4, %v9476_v1 }
 0x83c   : > { %v5590_v39 = vpop.f32.mrb[2].mxu0 }
 0x83d   : > { %6586 = vlog2.f32 %v5590_v39  ;;  %v3550_v21 = vpop.f32.mrb[3].mxu0 }
 0x83e   : > { %6588 = vlog2.f32 %v3550_v21 }
 0x840   : > { %v5593_v42 = vpop.f32.mrb[4].mxu0 }
 0x841   : > { %6590 = vlog2.f32 %v5593_v42  ;;  %v3560_v59 = vpop.f32.mrb[5].mxu0 }
 0x842   : > { %6592 = vlog2.f32 %v3560_v59 }
 0x844   : > { %v5596_v51 = vpop.f32.mrb[6].mxu0 }
 0x845   : > { %6594 = vlog2.f32 %v5596_v51  ;;  %v3570_v41 = vpop.f32.mrb[7].mxu0 }
 0x846   : > { %6596 = vlog2.f32 %v3570_v41 }
 0x847   : > { %v6587_v58 = vpop.eup %6586 }
 0x848   : > { %v6589_v14 = vpop.eup %6588  ;;  %v3632_v3 = vmul.f32 0.6931472, %v6587_v58 }
 0x849   : > { %v3630_v23 = vmul.f32 0.6931472, %v6589_v14 }
 0x84a   : > { %v3662_v37 = vadd.f32 %v3632_v3, %v8550_v12 }
 0x84b   : > { %v6591_v16 = vpop.eup %6590  ;;  %v3661_v63 = vadd.f32 %v3630_v23, %v8574_v27 }
 0x84c   : > { %v6593_v19 = vpop.eup %6592  ;;  %v3636_v49 = vmul.f32 0.6931472, %v6591_v16  ;;  %v3678_v26 = vmul.f32 -0.01, %v3662_v37 }
 0x84d   : > { %v3634_v36 = vmul.f32 0.6931472, %v6593_v19  ;;  %v3677_v56 = vmul.f32 -0.01, %v3661_v63 }
 0x84e   : > { %3864 = vperm.xlu0 %6422, %v3678_v26   ;;  %v3695_v17 = vmul.f32 %v3678_v26, %v9545_v28  ;;  %v3664_v32 = vadd.f32 %v3636_v49, %v8569_v55  ;;  %v9562_v55 = vld [vmem:[#allocation8_spill] sm:$0xff] }
 0x84f   : > { %v6595_v9 = vpop.eup %6594  ;;  %3859 = vperm.xlu1 %6423, %v3677_v56   ;;  %v3694_v60 = vmul.f32 %v3677_v56, %v9560_v35  ;;  %v3663_v44 = vadd.f32 %v3634_v36, %v8603_v30 }
 0x850   : > { %v6597_v12 = vpop.eup %6596  ;;  %v3640_v25 = vmul.f32 0.6931472, %v6595_v9  ;;  %v3680_v18 = vmul.f32 -0.01, %v3664_v32 }
 0x851   : > { %v3638_v27 = vmul.f32 0.6931472, %v6597_v12  ;;  %v5978_v62 = vpack.c.bf16 %v3695_v17, %v3694_v60  ;;  %v3679_v7 = vmul.f32 -0.01, %v3663_v44  ;;  %v9565_v12 = vld [vmem:[#allocation18_spill] sm:$0xff] }
 0x852   : > { %4067 = vperm.xlu0 %6422, %v9560_v35   ;;  %v3697_v47 = vmul.f32 %v3680_v18, %v9561_v34  ;;  %v3666_v61 = vadd.f32 %v3640_v25, %v8598_v0 }
 0x853   : > { %5979 = vmatpush3.bf16.msra.mxu0 %v5978_v62  ;;  %3874 = vperm.xlu1 %6423, %v3680_v18   ;;  %v3696_v43 = vmul.f32 %v3679_v7, %v9562_v55  ;;  %v3665_v4 = vadd.f32 %v3638_v27, %v8627_v8 }
 0x854   : > { %5980 = vmatprep.subr.bf16.mxu0 %v9474_v48  ;;  %v3682_v30 = vmul.f32 -0.01, %v3666_v61 }
 0x855   : > { %v5981_v2 = vpack.c.bf16 %v3697_v47, %v3696_v43  ;;  %v3681_v6 = vmul.f32 -0.01, %v3665_v4 }
 0x856   : > { %v3699_v53 = vmul.f32 %v3682_v30, %v9563_v11 }
 0x857   : > { %3869 = vperm.xlu1 %6423, %v3679_v7   ;;  %5982 = vmatpush3.bf16.msra.mxu0 %v5981_v2  ;;  %v3698_v15 = vmul.f32 %v3681_v6, %v9564_v24  ;;  %v9567_v2 = vld [vmem:[#allocation11_spill] sm:$0xff] }
 0x858   : > { %3879 = vperm.xlu0 %6422, %v3681_v6   ;;  %5983 = vmatprep.subr.bf16.mxu0 %v9474_v48 }
 0x859   : > { %v5984_v0 = vpack.c.bf16 %v3699_v53, %v3698_v15 }
 0x85b   : > { %3884 = vperm.xlu1 %6423, %v3682_v30   ;;  %5985 = vmatpush3.bf16.msra.mxu0 %v5984_v0 }
 0x85c   : > { %5986 = vmatprep.subr.bf16.mxu0 %v9474_v48 }
 0x878   : > { %v5599_v8 = vpop.f32.mrb[8].mxu0 }
 0x879   : > { %6598 = vlog2.f32 %v5599_v8  ;;  %v3580_v39 = vpop.f32.mrb[9].mxu0 }
 0x87a   : > { %6600 = vlog2.f32 %v3580_v39 }
 0x87c   : > { %v5602_v21 = vpop.f32.mrb[10].mxu0 }
 0x87d   : > { %6602 = vlog2.f32 %v5602_v21  ;;  %v3590_v42 = vpop.f32.mrb[11].mxu0 }
 0x87e   : > { %6604 = vlog2.f32 %v3590_v42 }
 0x880   : > { %v5605_v59 = vpop.f32.mrb[12].mxu0 }
 0x881   : > { %6606 = vlog2.f32 %v5605_v59  ;;  %v3600_v51 = vpop.f32.mrb[13].mxu0 }
 0x882   : > { %6608 = vlog2.f32 %v3600_v51  ;;  %v8794_v58 = vpop.f32.mrb[16].mxu1 }
 0x883   : > { %v6599_v41 = vpop.eup %6598  ;;  %v5571_v37 = vpop.f32.mrb[17].mxu1 }
 0x884   : > { %v6601_v14 = vpop.eup %6600  ;;  %v3644_v3 = vmul.f32 0.6931472, %v6599_v41  ;;  %v5608_v23 = vpop.f32.mrb[14].mxu0  ;;  %v9569_v41 = vld [vmem:[#allocation13_spill] sm:$0xff] }
 0x885   : > { %v3642_v16 = vmul.f32 0.6931472, %v6601_v14  ;;  %6610 = vlog2.f32 %v5608_v23  ;;  %v3610_v63 = vpop.f32.mrb[15].mxu0  ;;  %v9570_v23 = vld [vmem:[#allocation20_spill] sm:$0xff] }
 0x886   : > { %6612 = vlog2.f32 %v3610_v63  ;;  %v3668_v19 = vadd.f32 %v3644_v3, %v8727_v38  ;;  %v9566_v38 = vld [vmem:[#allocation16_spill] sm:$0xff] }
 0x887   : > { %v6603_v49 = vpop.eup %6602  ;;  %v3667_v26 = vadd.f32 %v3642_v16, %v8615_v57 }
 0x888   : > { %v6605_v36 = vpop.eup %6604  ;;  %v3648_v56 = vmul.f32 0.6931472, %v6603_v49  ;;  %v5611_v17 = vpop.f32.mrb[16].mxu0  ;;  %v3684_v32 = vmul.f32 -0.01, %v3668_v19 }
 0x889   : > { %v3646_v9 = vmul.f32 0.6931472, %v6605_v36  ;;  %6614 = vlog2.f32 %v5611_v17  ;;  %v3620_v60 = vpop.f32.mrb[17].mxu0  ;;  %v3683_v44 = vmul.f32 -0.01, %v3667_v26 }
 0x88a   : > { %6616 = vlog2.f32 %v3620_v60  ;;  %3894 = vperm.xlu1 %6423, %v3684_v32   ;;  %v3701_v25 = vmul.f32 %v3684_v32, %v9565_v12  ;;  %v3670_v18 = vadd.f32 %v3648_v56, %v8740_v31  ;;  %v9568_v31 = vld [vmem:[#allocation19_spill] sm:$0xff]  ;;  %v9572_v32 = vld [vmem:[#allocation21_spill] sm:$0xff] }
 0x88b   : > { %v6607_v27 = vpop.eup %6606  ;;  %3889 = vperm.xlu0 %6422, %v3683_v44   ;;  %v3700_v62 = vmul.f32 %v3683_v44, %v9566_v38  ;;  %v3669_v57 = vadd.f32 %v3646_v9, %v8704_v45  ;;  %v9571_v56 = vld [vmem:[#allocation15_spill] sm:$0xff]  ;;  %6618 = vlog2.f32 %v8794_v58 }
 0x88c   : > { %v6609_v7 = vpop.eup %6608  ;;  %v3652_v47 = vmul.f32 0.6931472, %v6607_v27  ;;  %v3686_v61 = vmul.f32 -0.01, %v3670_v18  ;;  %v9573_v18 = vld [vmem:[#allocation17_spill] sm:$0xff] }
 0x88d   : > { %v3650_v43 = vmul.f32 0.6931472, %v6609_v7  ;;  %v5987_v4 = vpack.c.bf16 %v3701_v25, %v3700_v62  ;;  %v3685_v30 = vmul.f32 -0.01, %v3669_v57  ;;  %v9574_v62 = vld [vmem:[#allocation22_spill] sm:$0xff] }
 0x88e   : > { %3904 = vperm.xlu1 %6423, %v3686_v61   ;;  %v3703_v6 = vmul.f32 %v3686_v61, %v9567_v2  ;;  %v3672_v53 = vadd.f32 %v3652_v47, %v8723_v5  ;;  %v9575_v57 = vmov 1.0|1.0  }
 0x88f   : > { %v6611_v15 = vpop.eup %6610  ;;  %5988 = vmatpush3.bf16.msra.mxu0 %v5987_v4  ;;  %3899 = vperm.xlu0 %6422, %v3685_v30   ;;  %v3702_v0 = vmul.f32 %v3685_v30, %v9568_v31  ;;  %v3671_v8 = vadd.f32 %v3650_v43, %v8710_v54  ;;  %v9576_v43 = vld [vmem:[#allocation23_spill] sm:$0xff]  ;;  %v9577_v30 = vld [vmem:[#allocation24_spill] sm:$0xff] }
 0x890   : > { %v6613_v39 = vpop.eup %6612  ;;  %v3656_v45 = vmul.f32 0.6931472, %v6611_v15  ;;  %5989 = vmatprep.subr.bf16.mxu0 %v9474_v48  ;;  %v3688_v21 = vmul.f32 -0.01, %v3672_v53 }
 0x891   : > { %v3654_v42 = vmul.f32 0.6931472, %v6613_v39  ;;  %v5990_v59 = vpack.c.bf16 %v3703_v6, %v3702_v0  ;;  %v3687_v51 = vmul.f32 -0.01, %v3671_v8  ;;  %v9578_v39 = vld [vmem:[#allocation29_spill] sm:$0xff] }
 0x892   : > { %3914 = vperm.xlu1 %6423, %v3688_v21   ;;  %v3705_v14 = vmul.f32 %v3688_v21, %v9569_v41  ;;  %v3674_v5 = vadd.f32 %v3656_v45, %v8738_v20  ;;  %v9579_v21 = vld [vmem:[#allocation35_spill] sm:$0xff] }
 0x893   : > { %v6615_v3 = vpop.eup %6614  ;;  %5991 = vmatpush3.bf16.msra.mxu0 %v5990_v59  ;;  %3909 = vperm.xlu0 %6422, %v3687_v51   ;;  %v3704_v37 = vmul.f32 %v3687_v51, %v9570_v23  ;;  %v3673_v54 = vadd.f32 %v3654_v42, %v8747_v22 }
 0x894   : > { %v6617_v16 = vpop.eup %6616  ;;  %v3660_v63 = vmul.f32 0.6931472, %v6615_v3  ;;  %5992 = vmatprep.subr.bf16.mxu0 %v9474_v48  ;;  %v3690_v19 = vmul.f32 -0.01, %v3674_v5 }
 0x895   : > { %v3658_v49 = vmul.f32 0.6931472, %v6617_v16  ;;  %v5993_v26 = vpack.c.bf16 %v3705_v14, %v3704_v37  ;;  %v3689_v36 = vmul.f32 -0.01, %v3673_v54  ;;  %v9580_v37 = vld [vmem:[#allocation26_spill] sm:$0xff]  ;;  %v9581_v16 = vld [vmem:[#allocation36_spill] sm:$0xff] }
 0x896   : > { %3924 = vperm.xlu1 %6423, %v3690_v19   ;;  %v3707_v17 = vmul.f32 %v3690_v19, %v9571_v56  ;;  %v3676_v20 = vadd.f32 %v3660_v63, %v8752_v33  ;;  %v9582_v19 = vld [vmem:[#allocation33_spill] sm:$0xff] }
 0x897   : > { %5994 = vmatpush3.bf16.msra.mxu0 %v5993_v26  ;;  %3919 = vperm.xlu0 %6422, %v3689_v36   ;;  %v3706_v9 = vmul.f32 %v3689_v36, %v9572_v32  ;;  %v3675_v22 = vadd.f32 %v3658_v49, %v8754_v46  ;;  %v6619_v46 = vpop.eup %6618  ;;  %v9583_v26 = vld [vmem:[#allocation25_spill] sm:$0xff] }
 0x898   : > { %5995 = vmatprep.subr.bf16.mxu0 %v9474_v48  ;;  %v3692_v60 = vmul.f32 -0.01, %v3676_v20  ;;  %v3283_v7 = vmul.f32 0.6931472, %v6619_v46  ;;  %v9585_v46 = vld [vmem:[#allocation31_spill] sm:$0xff] }
 0x899   : > { %v5996_v44 = vpack.c.bf16 %v3707_v17, %v3706_v9  ;;  %v3691_v25 = vmul.f32 -0.01, %v3675_v22 }
 0x89a   : > { %3934 = vperm.xlu1 %6423, %v3692_v60   ;;  %v3709_v27 = vmul.f32 %v3692_v60, %v9573_v18  ;;  %v3284_v47 = vadd.f32 %v3283_v7, %v8686_v50  ;;  %v4073_v50 = vpop.permute.xlu1 %4072 }
 0x89b   : > { %5997 = vmatpush3.bf16.msra.mxu0 %v5996_v44  ;;  %3929 = vperm.xlu0 %6422, %v3691_v25   ;;  %v3708_v33 = vmul.f32 %v3691_v25, %v9574_v62 }
 0x89c   : > { %5998 = vmatprep.subr.bf16.mxu0 %v9474_v48  ;;  %v3285_v61 = vmul.f32 -0.01, %v3284_v47  ;;  %v9586_v47 = vld [vmem:[#allocation34_spill] sm:$0xff] }
 0x89d   : > { %v5999_v58 = vpack.c.bf16 %v3709_v27, %v3708_v33  ;;  %v9584_v33 = vld [vmem:[#allocation28_spill] sm:$0xff] }
 0x89e   : > { %4082 = vperm.xlu1 %6423, %v9561_v34   ;;  %v3693_v4 = vmul.f32 %v3285_v61, %v9576_v43  ;;  %v8859_v6 = vrot.slane %v3285_v61, %v9577_v30 }
 0x89f   : > { %4077 = vperm.xlu0 %6422, %v9562_v55   ;;  %6000 = vmatpush3.bf16.msra.mxu0 %v5999_v58 }
 0x8a0   : > { %6001 = vmatprep.subr.bf16.mxu0 %v9474_v48 }
 0x8a2   : > { %4092 = vperm.xlu1 %6423, %v9563_v11   ;;  %5645 = vmatmul.mubr.f32.vlgmr.msra.gmra.mrb[18].mxu0 %v9517_v29 }
 0x8a3   : > { %4087 = vperm.xlu0 %6422, %v9564_v24   ;;  %6002 = vmatpush3.bf16.msra.mxu0 %v9575_v57 }
 0x8a4   : > { %6003 = vmatprep.subr.bf16.mxu0 %v9474_v48  ;;  %5663 = vmatprep.mubr.msk.f32.mxu0 %vm6703_vm4, %v9476_v1 }
 0x8a6   : > { %4102 = vperm.xlu1 %6423, %v9565_v12  }
 0x8a7   : > { %4097 = vperm.xlu0 %6422, %v9566_v38   ;;  %6004 = vmatpush3.bf16.msra.mxu0 %v9575_v57 }
 0x8a8   : > { %6005 = vmatprep.subr.bf16.mxu0 %v9474_v48 }
 0x8aa   : > { %4112 = vperm.xlu1 %6423, %v9567_v2  }
 0x8ab   : > { %4107 = vperm.xlu0 %6422, %v9568_v31   ;;  %6006 = vmatpush3.bf16.msra.mxu0 %v9575_v57 }
 0x8ac   : > { %6007 = vmatprep.subr.bf16.mxu0 %v9474_v48 }
 0x8ae   : > { %4122 = vperm.xlu1 %6423, %v9569_v41  }
 0x8af   : > { %4117 = vperm.xlu0 %6422, %v9570_v23   ;;  %6008 = vmatpush3.bf16.msra.mxu0 %v9575_v57 }
 0x8b0   : > { %6041 = vmatprep.subr.bf16.mxu0 %v9575_v57 }
 0x8b2   : > { %4132 = vperm.xlu1 %6423, %v9571_v56   ;;  %5664 = vmatmul.mubr.msk.f32.vlgmr.msra.gmra.mrb[18].mxu0 %vm530_vm1, %v3693_v4 }
 0x8b3   : > { %4127 = vperm.xlu0 %6422, %v9572_v32   ;;  %6042 = vmatpush3.bf16.msra.mxu0 %v9575_v57 }
 0x8b4   : > { %6043 = vmatprep.subr.bf16.mxu0 %v9575_v57 }
 0x8b6   : > { %4142 = vperm.xlu1 %6423, %v9573_v18  }
 0x8b7   : > { %4137 = vperm.xlu0 %6422, %v9574_v62   ;;  %6044 = vmatpush3.bf16.msra.mxu0 %v9575_v57 }
 0x8b8   : > { %6045 = vmatprep.subr.bf16.mxu0 %v9575_v57 }
 0x8bb   : > { %6046 = vmatpush3.bf16.msra.mxu0 %v9575_v57 }
 0x8bc   : > { %6047 = vmatprep.subr.bf16.mxu0 %v9575_v57 }
 0x8bf   : > { %6048 = vmatpush3.bf16.msra.mxu0 %v9575_v57 }
 0x8c0   : > { %6073 = vmatprep.subr.bf16.mxu0 %v9474_v48 }
 0x8cd   : > { %v3865_v53 = vpop.permute.xlu0 %3864 }
 0x8ce   : > { %v3938_v15 = vadd.f32 %v3865_v53, %v8859_v6  ;;  %v3860_v0 = vpop.permute.xlu1 %3859 }
 0x8cf   : > { %v3937_v8 = vadd.f32 %v3860_v0, %v8859_v6 }
 0x8d0   : > { %v3954_v45 = vsub.f32 %v3938_v15, %v9578_v39 }
 0x8d1   : > { %v3953_v42 = vsub.f32 %v3937_v8, %v9579_v21  ;;  %v4068_v59 = vpop.permute.xlu0 %4067  ;;  %v9587_v8 = vld [vmem:[#allocation27_spill] sm:$0xff] }
 0x8d2   : > { %v3970_v51 = vmul.f32 100.0, %v3954_v45  ;;  %v3875_v14 = vpop.permute.xlu1 %3874  ;;  %v9588_v45 = vld [vmem:[#allocation37_spill] sm:$0xff] }
 0x8d3   : > { %v3969_v5 = vmul.f32 100.0, %v3953_v42  ;;  %v3940_v3 = vadd.f32 %v3875_v14, %v8859_v6 }
 0x8d4   : > { %v3986_v54 = vadd.f32 %v3970_v51, %v9580_v37  ;;  %v9589_v51 = vld [vmem:[#allocation30_spill] sm:$0xff] }
 0x8d5   : > { %v3985_v63 = vadd.f32 %v3969_v5, %v9581_v16  ;;  %v3956_v49 = vsub.f32 %v3940_v3, %v9582_v19 }
 0x8d6   : > { %v4002_v36 = vadd.f32 %v3986_v54, %v9583_v26  ;;  %v3870_v17 = vpop.permute.xlu1 %3869 }
 0x8d7   : > { %v4001_v20 = vadd.f32 %v3985_v63, %v9583_v26  ;;  %v3972_v9 = vmul.f32 100.0, %v3956_v49  ;;  %v3939_v22 = vadd.f32 %v3870_v17, %v8859_v6  ;;  %v3880_v60 = vpop.permute.xlu0 %3879 }
 0x8d8   : > { %v4019_v44 = vmul.f32 1.442695, %v4002_v36  ;;  %v3941_v25 = vadd.f32 %v3880_v60, %v8859_v6 }
 0x8d9   : > { %v4017_v27 = vmul.f32 1.442695, %v4001_v20  ;;  %v3988_v58 = vadd.f32 %v3972_v9, %v9584_v33  ;;  %v3955_v7 = vsub.f32 %v3939_v22, %v9585_v46 }
 0x8da   : > { %6620 = vpow2.f32 %v4019_v44  ;;  %v3957_v61 = vsub.f32 %v3941_v25, %v9586_v47  ;;  %v3885_v4 = vpop.permute.xlu1 %3884 }
 0x8db   : > { %6622 = vpow2.f32 %v4017_v27  ;;  %v8877_v30 = vadd.f32 %v3988_v58, %v9583_v26  ;;  %v3971_v53 = vmul.f32 100.0, %v3955_v7  ;;  %v3942_v15 = vadd.f32 %v3885_v4, %v8859_v6  ;;  %v9590_v4 = vld [vmem:[#allocation40_spill] sm:$0xff] }
 0x8dc   : > { %v3973_v0 = vmul.f32 100.0, %v3957_v61 }
 0x8dd   : > { %v3987_v39 = vadd.f32 %v3971_v53, %v9587_v8  ;;  %v3958_v21 = vsub.f32 %v3942_v15, %v9588_v45  ;;  %v4023_v42 = vmul.f32 1.442695, %v8877_v30  ;;  %v9591_v15 = vld [vmem:[#allocation39_spill] sm:$0xff] }
 0x8de   : > { %v3989_v14 = vadd.f32 %v3973_v0, %v9589_v51 }
 0x8df   : > { %v8885_v5 = vadd.f32 %v3987_v39, %v9583_v26  ;;  %v3974_v3 = vmul.f32 100.0, %v3958_v21  ;;  %6624 = vpow2.f32 %v4023_v42 }
 0x8e0   : > { %v8888_v37 = vadd.f32 %v3989_v14, %v9583_v26 }
 0x8e1   : > { %v4021_v54 = vmul.f32 1.442695, %v8885_v5  ;;  %v3990_v16 = vadd.f32 %v3974_v3, %v9551_v52  ;;  %v9592_v3 = vld [vmem:[#allocation42_spill] sm:$0xff] }
 0x8e2   : > { %v4025_v63 = vmul.f32 1.442695, %v8888_v37 }
 0x8e3   : > { %6626 = vpow2.f32 %v4021_v54  ;;  %v8894_v19 = vadd.f32 %v3990_v16, %v9583_v26 }
 0x8e4   : > { %v8896_v49 = vpop.eup %6620  ;;  %6628 = vpow2.f32 %v4025_v63  ;;  %v9593_v63 = vld [vmem:[#allocation44_spill] sm:$0xff] }
 0x8e5   : > { %v8898_v17 = vpop.eup %6622  ;;  %v4050_v9 = vmul.f32 %v8896_v49, %v4002_v36  ;;  %v4027_v22 = vmul.f32 1.442695, %v8894_v19 }
 0x8e6   : > { %v4049_v60 = vmul.f32 %v8898_v17, %v4001_v20  ;;  %5736 = vmatprep.mubr.msk.f32.mxu0 %vm530_vm1, %v8898_v17  ;;  %v6050_v52 = vpack.c.bf16 %v8896_v49, %v8898_v17 }
 0x8e7   : > { %v4146_v44 = vmul.f32 %v4073_v50, %v4050_v9  ;;  %6630 = vpow2.f32 %v4027_v22  ;;  %5737 = vmatmul.mubr.msk.f32.vlgmr.msra.gmra.mrb[20].mxu0 %vm530_vm1, %v8896_v49 }
 0x8e8   : > { %v4145_v25 = vmul.f32 %v4068_v59, %v4049_v60 }
 0x8e9   : > { %v8909_v33 = vpop.eup %6624 }
 0x8ea   : > { %v6010_v27 = vpack.c.bf16 %v4146_v44, %v4145_v25 }
 0x8ec   : > { %6011 = vmatpush3.bf16.msra.mxu1 %v6010_v27 }
 0x8ed   : > { %v8911_v36 = vpop.eup %6626  ;;  %6012 = vmatprep.subr.bf16.mxu1 %v9474_v48 }
 0x8ee   : > { %5739 = vmatprep.mubr.msk.f32.mxu0 %vm530_vm1, %v8911_v36  ;;  %v6053_v20 = vpack.c.bf16 %v8909_v33, %v8911_v36  ;;  %v8918_v50 = vpop.eup %6628 }
 0x8ef   : > { %5740 = vmatmul.mubr.msk.f32.gmra.mrb[22].mxu0 %vm530_vm1, %v8909_v33 }
 0x8f0   : > { %5742 = vmatprep.mubr.msk.f32.mxu0 %vm530_vm1, %v8918_v50 }
 0x8f1   : > { %v8924_v59 = vpop.eup %6630 }
 0x8f2   : > { %v6056_v58 = vpack.c.bf16 %v8924_v59, %v8918_v50 }
 0x8f3   : > { %5743 = vmatmul.mubr.msk.f32.gmra.mrb[24].mxu0 %vm530_vm1, %v8924_v59 }
 0x909   : > { %v3895_v46 = vpop.permute.xlu1 %3894 }
 0x90a   : > { %v3944_v7 = vadd.f32 %v3895_v46, %v8859_v6  ;;  %v3890_v47 = vpop.permute.xlu0 %3889 }
 0x90b   : > { %v3943_v61 = vadd.f32 %v3890_v47, %v8859_v6 }
 0x90c   : > { %v3960_v53 = vsub.f32 %v3944_v7, %v9590_v4 }
 0x90d   : > { %v3959_v0 = vsub.f32 %v3943_v61, %v9591_v15  ;;  %v3905_v8 = vpop.permute.xlu1 %3904  ;;  %v9594_v61 = vld [vmem:[#allocation46_spill] sm:$0xff]  ;;  %v9595_v15 = vld [vmem:[#allocation45_spill] sm:$0xff] }
 0x90e   : > { %v3976_v39 = vmul.f32 100.0, %v3960_v53  ;;  %v3946_v45 = vadd.f32 %v3905_v8, %v8859_v6  ;;  %v3900_v21 = vpop.permute.xlu0 %3899  ;;  %v9596_v8 = vld [vmem:[#allocation48_spill] sm:$0xff] }
 0x90f   : > { %v3975_v42 = vmul.f32 100.0, %v3959_v0  ;;  %v3945_v51 = vadd.f32 %v3900_v21, %v8859_v6 }
 0x910   : > { %v3992_v14 = vadd.f32 %v3976_v39, %v9553_v40  ;;  %v3962_v54 = vsub.f32 %v3946_v45, %v9592_v3 }
 0x911   : > { %v3991_v16 = vadd.f32 %v3975_v42, %v9552_v10  ;;  %v3961_v9 = vsub.f32 %v3945_v51, %v9593_v63  ;;  %v3915_v22 = vpop.permute.xlu1 %3914  ;;  %v9597_v63 = vld [vmem:[#allocation47_spill] sm:$0xff] }
 0x912   : > { %v8941_v60 = vadd.f32 %v3992_v14, %v9583_v26  ;;  %v3978_v44 = vmul.f32 100.0, %v3962_v54  ;;  %v3948_v25 = vadd.f32 %v3915_v22, %v8859_v6  ;;  %v3910_v27 = vpop.permute.xlu0 %3909  ;;  %v9598_v22 = vld [vmem:[#allocation50_spill] sm:$0xff] }
 0x913   : > { %v8945_v46 = vadd.f32 %v3991_v16, %v9583_v26  ;;  %v3977_v7 = vmul.f32 100.0, %v3961_v9  ;;  %v3947_v40 = vadd.f32 %v3910_v27, %v8859_v6  ;;  %v9599_v27 = vld [vmem:[#allocation49_spill] sm:$0xff] }
 0x914   : > { %v4031_v47 = vmul.f32 1.442695, %v8941_v60  ;;  %v3994_v10 = vadd.f32 %v3978_v44, %v9554_v13  ;;  %v3964_v4 = vsub.f32 %v3948_v25, %v9594_v61 }
 0x915   : > { %v4029_v53 = vmul.f32 1.442695, %v8945_v46  ;;  %v3993_v0 = vadd.f32 %v3977_v7, %v9595_v15  ;;  %v3963_v39 = vsub.f32 %v3947_v40, %v9596_v8  ;;  %v3925_v45 = vpop.permute.xlu1 %3924  ;;  %v9600_v40 = vld [vmem:[#allocation53_spill] sm:$0xff] }
 0x916   : > { %6632 = vpow2.f32 %v4031_v47  ;;  %v8955_v21 = vadd.f32 %v3994_v10, %v9583_v26  ;;  %v3980_v42 = vmul.f32 100.0, %v3964_v4  ;;  %v3950_v51 = vadd.f32 %v3925_v45, %v8859_v6  ;;  %v3920_v14 = vpop.permute.xlu0 %3919 }
 0x917   : > { %6634 = vpow2.f32 %v4029_v53  ;;  %v8959_v13 = vadd.f32 %v3993_v0, %v9583_v26  ;;  %v3979_v3 = vmul.f32 100.0, %v3963_v39  ;;  %v3949_v54 = vadd.f32 %v3920_v14, %v8859_v6  ;;  %v9602_v14 = vld [vmem:[#allocation54_spill] sm:$0xff] }
 0x918   : > { %v4035_v16 = vmul.f32 1.442695, %v8955_v21  ;;  %v3996_v9 = vadd.f32 %v3980_v42, %v9597_v63  ;;  %v3966_v44 = vsub.f32 %v3950_v51, %v9598_v22  ;;  %v9601_v42 = vld [vmem:[#allocation51_spill] sm:$0xff]  ;;  %v9603_v63 = vld [vmem:[#allocation52_spill] sm:$0xff] }
 0x919   : > { %v4033_v25 = vmul.f32 1.442695, %v8959_v13  ;;  %v3995_v7 = vadd.f32 %v3979_v3, %v9599_v27  ;;  %v3965_v47 = vsub.f32 %v3949_v54, %v9600_v40  ;;  %v3935_v10 = vpop.permute.xlu1 %3934  ;;  %v4052_v54 = vmul.f32 %v8909_v33, %v8877_v30  ;;  %v9604_v22 = vld [vmem:[#allocation56_spill] sm:$0xff] }
 0x91a   : > { %6636 = vpow2.f32 %v4035_v16  ;;  %v8969_v61 = vadd.f32 %v3996_v9, %v9583_v26  ;;  %v3982_v4 = vmul.f32 100.0, %v3966_v44  ;;  %v3952_v53 = vadd.f32 %v3935_v10, %v8859_v6  ;;  %v3930_v15 = vpop.permute.xlu0 %3929 }
 0x91b   : > { %6638 = vpow2.f32 %v4033_v25  ;;  %v8973_v0 = vadd.f32 %v3995_v7, %v9583_v26  ;;  %v3981_v8 = vmul.f32 100.0, %v3965_v47  ;;  %v3951_v39 = vadd.f32 %v3930_v15, %v8859_v6 }
 0x91c   : > { %v4039_v45 = vmul.f32 1.442695, %v8969_v61  ;;  %v3998_v51 = vadd.f32 %v3982_v4, %v9601_v42  ;;  %v3968_v3 = vsub.f32 %v3952_v53, %v9602_v14  ;;  %v4051_v27 = vmul.f32 %v8911_v36, %v8885_v5 }
 0x91d   : > { %v4037_v16 = vmul.f32 1.442695, %v8973_v0  ;;  %v3997_v9 = vadd.f32 %v3981_v8, %v9603_v63  ;;  %v3967_v44 = vsub.f32 %v3951_v39, %v9604_v22  ;;  %v4083_v25 = vpop.permute.xlu1 %4082  ;;  %v9605_v8 = vld [vmem:[#allocation55_spill] sm:$0xff]  ;;  %v4054_v5 = vmul.f32 %v8924_v59, %v8894_v19 }
 0x91e   : > { %6640 = vpow2.f32 %v4039_v45  ;;  %v8987_v6 = vadd.f32 %v3998_v51, %v9583_v26  ;;  %v3984_v7 = vmul.f32 100.0, %v3968_v3  ;;  %v4148_v40 = vmul.f32 %v4083_v25, %v4052_v54  ;;  %v4078_v47 = vpop.permute.xlu0 %4077  ;;  %v9606_v51 = vld [vmem:[#allocation57_spill] sm:$0xff] }
 0x91f   : > { %6642 = vpow2.f32 %v4037_v16  ;;  %v8990_v30 = vadd.f32 %v3997_v9, %v9583_v26  ;;  %v3983_v10 = vmul.f32 100.0, %v3967_v44  ;;  %v4147_v4 = vmul.f32 %v4078_v47, %v4051_v27 }
 0x920   : > { %v8992_v53 = vpop.eup %6632  ;;  %v4043_v15 = vmul.f32 1.442695, %v8987_v6  ;;  %v4000_v39 = vadd.f32 %v3984_v7, %v9605_v8  ;;  %v4053_v16 = vmul.f32 %v8918_v50, %v8888_v37  ;;  %v9607_v59 = vlaneseq }
 0x921   : > { %v8998_v45 = vpop.eup %6634  ;;  %v4041_v42 = vmul.f32 1.442695, %v8990_v30  ;;  %v3999_v14 = vadd.f32 %v3983_v10, %v9606_v51  ;;  %v6013_v3 = vpack.c.bf16 %v4148_v40, %v4147_v4  ;;  %v4093_v54 = vpop.permute.xlu1 %4092  ;;  %v4056_v7 = vmul.f32 %v8992_v53, %v8941_v60 }
 0x922   : > { %6644 = vpow2.f32 %v4043_v15  ;;  %v9005_v63 = vadd.f32 %v4000_v39, %v9583_v26  ;;  %v4150_v9 = vmul.f32 %v4093_v54, %v4054_v5  ;;  %5745 = vmatprep.mubr.msk.f32.mxu0 %vm530_vm1, %v8998_v45  ;;  %v4088_v19 = vpop.permute.xlu0 %4087  ;;  %v6059_v37 = vpack.c.bf16 %v8992_v53, %v8998_v45 }
 0x923   : > { %6646 = vpow2.f32 %v4041_v42  ;;  %v9010_v22 = vadd.f32 %v3999_v14, %v9583_v26  ;;  %v4149_v44 = vmul.f32 %v4088_v19, %v4053_v16  ;;  %6014 = vmatpush3.bf16.msra.mxu1 %v6013_v3  ;;  %5746 = vmatmul.mubr.msk.f32.gmra.mrb[26].mxu0 %vm530_vm1, %v8992_v53  ;;  %v4055_v4 = vmul.f32 %v8998_v45, %v8945_v46 }
 0x924   : > { %v9016_v25 = vpop.eup %6636  ;;  %v4047_v27 = vmul.f32 1.442695, %v9005_v63  ;;  %6015 = vmatprep.subr.bf16.mxu1 %v9474_v48 }
 0x925   : > { %v9022_v40 = vpop.eup %6638  ;;  %v4045_v26 = vmul.f32 1.442695, %v9010_v22  ;;  %v6016_v47 = vpack.c.bf16 %v4150_v9, %v4149_v44  ;;  %v4103_v10 = vpop.permute.xlu1 %4102  ;;  %v4058_v46 = vmul.f32 %v9016_v25, %v8955_v21 }
 0x926   : > { %6648 = vpow2.f32 %v4047_v27  ;;  %v4152_v15 = vmul.f32 %v4103_v10, %v4056_v7  ;;  %5748 = vmatprep.mubr.msk.f32.mxu0 %vm530_vm1, %v9022_v40  ;;  %v4098_v8 = vpop.permute.xlu0 %4097  ;;  %v6062_v60 = vpack.c.bf16 %v9016_v25, %v9022_v40  ;;  %v4057_v3 = vmul.f32 %v9022_v40, %v8959_v13 }
 0x927   : > { %6650 = vpow2.f32 %v4045_v26  ;;  %v4151_v39 = vmul.f32 %v4098_v8, %v4055_v4  ;;  %6017 = vmatpush3.bf16.msra.mxu1 %v6016_v47  ;;  %5749 = vmatmul.mubr.msk.f32.gmra.mrb[28].mxu0 %vm530_vm1, %v9016_v25 }
 0x928   : > { %v9033_v5 = vpop.eup %6640  ;;  %6018 = vmatprep.subr.bf16.mxu1 %v9474_v48 }
 0x929   : > { %v9038_v42 = vpop.eup %6642  ;;  %v6019_v51 = vpack.c.bf16 %v4152_v15, %v4151_v39  ;;  %v4113_v14 = vpop.permute.xlu1 %4112  ;;  %v4060_v44 = vmul.f32 %v9033_v5, %v8969_v61 }
 0x92a   : > { %v4154_v54 = vmul.f32 %v4113_v14, %v4058_v46  ;;  %5751 = vmatprep.mubr.msk.f32.mxu0 %vm530_vm1, %v9038_v42  ;;  %v4108_v16 = vpop.permute.xlu0 %4107  ;;  %v6065_v9 = vpack.c.bf16 %v9033_v5, %v9038_v42  ;;  %v4059_v26 = vmul.f32 %v9038_v42, %v8973_v0 }
 0x92b   : > { %v4153_v19 = vmul.f32 %v4108_v16, %v4057_v3  ;;  %6020 = vmatpush3.bf16.msra.mxu1 %v6019_v51  ;;  %5752 = vmatmul.mubr.msk.f32.gmra.mrb[30].mxu0 %vm530_vm1, %v9033_v5 }
 0x92c   : > { %v9048_v21 = vpop.eup %6644  ;;  %6021 = vmatprep.subr.bf16.mxu1 %v9474_v48 }
 0x92d   : > { %v9053_v13 = vpop.eup %6646  ;;  %v6022_v27 = vpack.c.bf16 %v4154_v54, %v4153_v19  ;;  %v4123_v7 = vpop.permute.xlu1 %4122  ;;  %v4062_v8 = vmul.f32 %v9048_v21, %v8987_v6 }
 0x92e   : > { %v4156_v47 = vmul.f32 %v4123_v7, %v4060_v44  ;;  %5754 = vmatprep.mubr.msk.f32.mxu0 %vm530_vm1, %v9053_v13  ;;  %v4118_v10 = vpop.permute.xlu0 %4117  ;;  %v6068_v4 = vpack.c.bf16 %v9048_v21, %v9053_v13  ;;  %v4061_v51 = vmul.f32 %v9053_v13, %v8990_v30 }
 0x92f   : > { %v4155_v15 = vmul.f32 %v4118_v10, %v4059_v26  ;;  %6023 = vmatpush3.bf16.msra.mxu1 %v6022_v27  ;;  %5755 = vmatmul.mubr.msk.f32.gmra.mrb[32].mxu0 %vm530_vm1, %v9048_v21 }
 0x930   : > { %v9063_v61 = vpop.eup %6648  ;;  %6024 = vmatprep.subr.bf16.mxu1 %v9474_v48 }
 0x931   : > { %v9068_v0 = vpop.eup %6650  ;;  %v6025_v39 = vpack.c.bf16 %v4156_v47, %v4155_v15  ;;  %v4133_v46 = vpop.permute.xlu1 %4132  ;;  %v4064_v6 = vmul.f32 %v9063_v61, %v9005_v63 }
 0x932   : > { %v4158_v14 = vmul.f32 %v4133_v46, %v4062_v8  ;;  %5757 = vmatprep.mubr.msk.f32.mxu0 %vm530_vm1, %v9068_v0  ;;  %v4128_v3 = vpop.permute.xlu0 %4127  ;;  %v6071_v54 = vpack.c.bf16 %v9063_v61, %v9068_v0  ;;  %v4063_v44 = vmul.f32 %v9068_v0, %v9010_v22 }
 0x933   : > { %v4157_v16 = vmul.f32 %v4128_v3, %v4061_v51  ;;  %6026 = vmatpush3.bf16.msra.mxu1 %v6025_v39  ;;  %5758 = vmatmul.mubr.msk.f32.gmra.mrb[34].mxu0 %vm530_vm1, %v9063_v61 }
 0x934   : > { %6027 = vmatprep.subr.bf16.mxu1 %v9474_v48  ;;  %5827 = vmatprep.mubr.msk.f32.mxu0 %vm6703_vm4, %v9476_v1 }
 0x935   : > { %v6028_v30 = vpack.c.bf16 %v4158_v14, %v4157_v16  ;;  %v4143_v19 = vpop.permute.xlu1 %4142 }
 0x936   : > { %v4160_v27 = vmul.f32 %v4143_v19, %v4064_v6  ;;  %v4138_v7 = vpop.permute.xlu0 %4137 }
 0x937   : > { %v4159_v26 = vmul.f32 %v4138_v7, %v4063_v44  ;;  %6029 = vmatpush3.bf16.msra.mxu1 %v6028_v30 }
 0x938   : > { %6030 = vmatprep.subr.bf16.mxu1 %v9474_v48 }
 0x939   : > { %v6031_v47 = vpack.c.bf16 %v4160_v27, %v4159_v26 }
 0x93b   : > { %6032 = vmatpush3.bf16.msra.mxu1 %v6031_v47 }
 0x93c   : > { %6033 = vmatprep.subr.bf16.mxu1 %v9474_v48 }
 0x93e   : > { %5699 = vmatmul.mubr.f32.vlgmr.msra.gmra.mrb[18].mxu1 %v9517_v29 }
 0x93f   : > { %6034 = vmatpush3.bf16.msra.mxu1 %v9575_v57  ;;  %5717 = vmatprep.mubr.msk.f32.mxu1 %vm6703_vm4, %v9476_v1 }
 0x940   : > { %6035 = vmatprep.subr.bf16.mxu1 %v9474_v48 }
 0x943   : > { %6036 = vmatpush3.bf16.msra.mxu1 %v9575_v57 }
 0x944   : > { %6037 = vmatprep.subr.bf16.mxu1 %v9474_v48 }
 0x947   : > { %6038 = vmatpush3.bf16.msra.mxu1 %v9575_v57 }
 0x948   : > { %6039 = vmatprep.subr.bf16.mxu1 %v9474_v48 }
 0x94b   : > { %6040 = vmatpush3.bf16.msra.mxu1 %v9575_v57 }
 0x94c   : > { %6049 = vmatprep.subr.bf16.mxu1 %v9474_v48 }
 0x985   : > { %v3849_v63 = vpop.f32.mrb[18].mxu0 }
 0x986   : > { %4753 = vperm.xlu0 %6422, %v3849_v63   ;;  %v5665_v22 = vpop.f32.mrb[19].mxu0 }
 0x9ba   : > { %v5738_v10 = vpop.f32.mrb[20].mxu0 }
 0x9bb   : > { %v4572_v15 = vsub.f32 %v5738_v10, %v9545_v28  ;;  %v4422_v8 = vpop.f32.mrb[21].mxu0 }
 0x9bc   : > { %v4571_v39 = vsub.f32 %v4422_v8, %v9560_v35 }
 0x9bd   : > { %v4588_v46 = vand.u32 2147483647, %v4572_v15 }
 0x9be   : > { %v4587_v51 = vand.u32 2147483647, %v4571_v39 }
 0x9c0   : > { %v6074_v14 = vpack.c.bf16 %v4588_v46, %v4587_v51 }
 0x9c2   : > { %v5741_v3 = vpop.f32.mrb[22].mxu0  ;;  %6075 = vmatpush3.bf16.msra.mxu0 %v6074_v14 }
 0x9c3   : > { %v4574_v16 = vsub.f32 %v5741_v3, %v9561_v34  ;;  %v4432_v6 = vpop.f32.mrb[23].mxu0  ;;  %6076 = vmatprep.subr.bf16.mxu0 %v9474_v48 }
 0x9c4   : > { %v4573_v30 = vsub.f32 %v4432_v6, %v9562_v55 }
 0x9c5   : > { %v4590_v19 = vand.u32 2147483647, %v4574_v16 }
 0x9c6   : > { %v4589_v44 = vand.u32 2147483647, %v4573_v30  ;;  %v5744_v27 = vpop.f32.mrb[24].mxu0 }
 0x9c7   : > { %v4576_v28 = vsub.f32 %v5744_v27, %v9563_v11  ;;  %v4442_v7 = vpop.f32.mrb[25].mxu0 }
 0x9c8   : > { %v6077_v26 = vpack.c.bf16 %v4590_v19, %v4589_v44  ;;  %v4575_v35 = vsub.f32 %v4442_v7, %v9564_v24 }
 0x9c9   : > { %v4592_v47 = vand.u32 2147483647, %v4576_v28 }
 0x9ca   : > { %v4591_v63 = vand.u32 2147483647, %v4575_v35  ;;  %6078 = vmatpush3.bf16.msra.mxu0 %v6077_v26 }
 0x9cb   : > { %6079 = vmatprep.subr.bf16.mxu0 %v9474_v48 }
 0x9cc   : > { %v6080_v34 = vpack.c.bf16 %v4592_v47, %v4591_v63 }
 0x9ce   : > { %6081 = vmatpush3.bf16.msra.mxu0 %v6080_v34 }
 0x9cf   : > { %6082 = vmatprep.subr.bf16.mxu0 %v9474_v48 }
 0x9f6   : > { %v5747_v22 = vpop.f32.mrb[26].mxu0 }
 0x9f7   : > { %v4578_v55 = vsub.f32 %v5747_v22, %v9565_v12  ;;  %v4452_v10 = vpop.f32.mrb[27].mxu0 }
 0x9f8   : > { %v4577_v15 = vsub.f32 %v4452_v10, %v9566_v38 }
 0x9f9   : > { %v4594_v11 = vand.u32 2147483647, %v4578_v55 }
 0x9fa   : > { %v4593_v8 = vand.u32 2147483647, %v4577_v15  ;;  %v5750_v39 = vpop.f32.mrb[28].mxu0 }
 0x9fb   : > { %v4580_v24 = vsub.f32 %v5750_v39, %v9567_v2  ;;  %v4462_v46 = vpop.f32.mrb[29].mxu0 }
 0x9fc   : > { %v6083_v51 = vpack.c.bf16 %v4594_v11, %v4593_v8  ;;  %v4579_v14 = vsub.f32 %v4462_v46, %v9568_v31 }
 0x9fd   : > { %v4596_v3 = vand.u32 2147483647, %v4580_v24 }
 0x9fe   : > { %v4595_v16 = vand.u32 2147483647, %v4579_v14  ;;  %v5753_v6 = vpop.f32.mrb[30].mxu0  ;;  %6084 = vmatpush3.bf16.msra.mxu0 %v6083_v51 }
 0x9ff   : > { %v4582_v30 = vsub.f32 %v5753_v6, %v9569_v41  ;;  %v4472_v19 = vpop.f32.mrb[31].mxu0  ;;  %6085 = vmatprep.subr.bf16.mxu0 %v9474_v48 }
 0xa00   : > { %v6086_v12 = vpack.c.bf16 %v4596_v3, %v4595_v16  ;;  %v4581_v38 = vsub.f32 %v4472_v19, %v9570_v23 }
 0xa01   : > { %v4598_v44 = vand.u32 2147483647, %v4582_v30 }
 0xa02   : > { %v4597_v27 = vand.u32 2147483647, %v4581_v38  ;;  %v5756_v28 = vpop.f32.mrb[32].mxu0  ;;  %6087 = vmatpush3.bf16.msra.mxu0 %v6086_v12 }
 0xa03   : > { %v4584_v2 = vsub.f32 %v5756_v28, %v9571_v56  ;;  %v4482_v7 = vpop.f32.mrb[33].mxu0  ;;  %6088 = vmatprep.subr.bf16.mxu0 %v9474_v48 }
 0xa04   : > { %v6089_v31 = vpack.c.bf16 %v4598_v44, %v4597_v27  ;;  %v4583_v26 = vsub.f32 %v4482_v7, %v9572_v32 }
 0xa05   : > { %v4600_v35 = vand.u32 2147483647, %v4584_v2  ;;  %v4754_v45 = vpop.permute.xlu0 %4753 }
 0xa06   : > { %v4599_v41 = vand.u32 2147483647, %v4583_v26  ;;  %v5759_v47 = vpop.f32.mrb[34].mxu0  ;;  %6090 = vmatpush3.bf16.msra.mxu0 %v6089_v31 }
 0xa07   : > { %v4586_v63 = vsub.f32 %v5759_v47, %v9573_v18  ;;  %v4492_v34 = vpop.f32.mrb[35].mxu0  ;;  %6091 = vmatprep.subr.bf16.mxu0 %v9474_v48 }
 0xa08   : > { %v6092_v23 = vpack.c.bf16 %v4600_v35, %v4599_v41  ;;  %v4585_v22 = vsub.f32 %v4492_v34, %v9574_v62 }
 0xa09   : > { %v4602_v55 = vand.u32 2147483647, %v4586_v63 }
 0xa0a   : > { %v4601_v56 = vand.u32 2147483647, %v4585_v22  ;;  %6093 = vmatpush3.bf16.msra.mxu0 %v6092_v23 }
 0xa0b   : > { %6094 = vmatprep.subr.bf16.mxu0 %v9474_v48 }
 0xa0c   : > { %v6095_v10 = vpack.c.bf16 %v4602_v55, %v4601_v56 }
 0xa0e   : > { %6096 = vmatpush3.bf16.msra.mxu0 %v6095_v10 }
 0xa11   : > { %v4227_v32 = vpop.f32.mrb[18].mxu1  ;;  %5828 = vmatmul.mubr.f32.vlgmr.msra.gmra.mrb[36].mxu0 %v9517_v29 }
 0xa12   : > { %v5700_v15 = vpop.f32.mrb[19].mxu1  ;;  %5718 = vmatmul.mubr.msk.f32.vlgmr.msra.gmra.mrb[20].mxu1 %vm530_vm1, %v4227_v32 }
 0xa13   : > { %6051 = vmatpush3.bf16.msra.mxu1 %v6050_v52  ;;  %5792 = vmatprep.mubr.msk.f32.mxu1 %vm6703_vm4, %v9476_v1 }
 0xa14   : > { %6052 = vmatprep.subr.bf16.mxu1 %v9474_v48 }
 0xa17   : > { %6054 = vmatpush3.bf16.msra.mxu1 %v6053_v20 }
 0xa18   : > { %6055 = vmatprep.subr.bf16.mxu1 %v9474_v48 }
 0xa1b   : > { %6057 = vmatpush3.bf16.msra.mxu1 %v6056_v58  ;;  %v4749_v58 = vand.u32 127, %v9607_v59 }
 0xa1c   : > { %6058 = vmatprep.subr.bf16.mxu1 %v9474_v48 }
 0xa1d   : > { %vm4757_vm8 = vcmp.eq.s32.totalorder %v4749_v58, 1  ;;  %vm4750_vm9 = vcmp.eq.s32.totalorder %v4749_v58, 0  ;;  %vm4765_vm10 = vcmp.eq.s32.totalorder %v4749_v58, 2  ;;  %vm4773_vm11 = vcmp.eq.s32.totalorder %v4749_v58, 3 }
 0xa1e   : > { %v4756_v25 = vsel %vm4750_vm9, %v4754_v45, 0.0 }
 0xa1f   : > { %6060 = vmatpush3.bf16.msra.mxu1 %v6059_v37 }
 0xa20   : > { %6061 = vmatprep.subr.bf16.mxu1 %v9474_v48 }
 0xa23   : > { %6063 = vmatpush3.bf16.msra.mxu1 %v6062_v60 }
 0xa24   : > { %6064 = vmatprep.subr.bf16.mxu1 %v9474_v48 }
 0xa27   : > { %6066 = vmatpush3.bf16.msra.mxu1 %v6065_v9 }
 0xa28   : > { %6067 = vmatprep.subr.bf16.mxu1 %v9474_v48 }
 0xa2b   : > { %6069 = vmatpush3.bf16.msra.mxu1 %v6068_v4 }
 0xa2c   : > { %6070 = vmatprep.subr.bf16.mxu1 %v9474_v48 }
 0xa2f   : > { %6072 = vmatpush3.bf16.msra.mxu1 %v6071_v54 }
 0xa30   : > { %6097 = vmatprep.subr.bf16.mxu1 %v9474_v48 }
 0xa32   : > { %5793 = vmatmul.mubr.f32.vlgmr.msra.gmra.mrb[22].mxu1 %v9517_v29  ;;  %v4305_v29 = vstv %s4304_s21 }
 0xa33   : > { %6098 = vmatpush3.bf16.msra.mxu1 %v9575_v57  ;;  %5846 = vmatprep.mubr.msk.f32.mxu1 %vm6703_vm4, %v9476_v1  ;;  %6652 = vrcp.f32 %v4305_v29 }
 0xa34   : > { %6099 = vmatprep.subr.bf16.mxu1 %v9474_v48 }
 0xa37   : > { %6100 = vmatpush3.bf16.msra.mxu1 %v9575_v57 }
 0xa38   : > { %6101 = vmatprep.subr.bf16.mxu1 %v9474_v48 }
 0xa3b   : > { %6102 = vmatpush3.bf16.msra.mxu1 %v9575_v57 }
 0xa3c   : > { %6103 = vmatprep.subr.bf16.mxu1 %v9474_v48 }
 0xa3d   : > { %v6653_v18 = vpop.eup %6652 }
 0xa3f   : > { %6104 = vmatpush3.bf16.msra.mxu1 %v9575_v57 }
 0xae4   : > { %v4669_v62 = vpop.f32.mrb[36].mxu0 }
 0xae5   : > { %4768 = vperm.xlu0 %6422, %v4669_v62   ;;  %v4300_v1 = vpop.f32.mrb[20].mxu1  ;;  %v5829_v49 = vpop.f32.mrb[37].mxu0 }
 0xae6   : > { %v4307_v17 = vmul.f32 %v6653_v18, %v4300_v1  ;;  %v5719_v52 = vpop.f32.mrb[21].mxu1 }
 0xae8   : > { %4760 = vperm.xlu1 %6423, %v4307_v17  }
 0xb05   : > { %v4567_v33 = vpop.f32.mrb[22].mxu1 }
 0xb06   : > { %v4673_v36 = vsub.f32 %v4567_v33, %v9576_v43  ;;  %v5794_v20 = vpop.f32.mrb[23].mxu1 }
 0xb08   : > { %v4674_v50 = vand.u32 2147483647, %v4673_v36 }
 0xb0a   : > { %5847 = vmatmul.mubr.msk.f32.vlgmr.msra.gmra.mrb[24].mxu1 %vm530_vm1, %v4674_v50 }
 0xb64   : > { %v4769_v40 = vpop.permute.xlu0 %4768 }
 0xb65   : > { %v4771_v43 = vsel %vm4765_vm10, %v4769_v40, 0.0 }
 0xb67   : > { %v4761_v53 = vpop.permute.xlu1 %4760 }
 0xb68   : > { %v4763_v37 = vsel %vm4757_vm8, %v4761_v53, 0.0 }
 0xb69   : > { %v4764_v60 = vadd.f32 %v4763_v37, %v4756_v25 }
 0xb6b   : > { %v4772_v42 = vadd.f32 %v4771_v43, %v4764_v60 }
 0xbdd   : > { %v4744_v48 = vpop.f32.mrb[24].mxu1 }
 0xbde   : > { %4776 = vperm.xlu1 %6423, %v4744_v48   ;;  %v5848_v57 = vpop.f32.mrb[25].mxu1 }
 0xc5d   : > { %v4777_v5 = vpop.permute.xlu1 %4776 }
 0xc5e   : > { %v4779_v9 = vsel %vm4773_vm11, %v4777_v5, 0.0 }
 0xc5f   : > { %v4780_v21 = vadd.f32 %v4779_v9, %v4772_v42 }
 0xc61   : > { %4781 = vst [vmem:[%s234_s9] sm:$0x1] %v4780_v21 }
 0xc62 PF: > { %s21_s23 = sadd.s32 1, %s6689_s23  }
 0xc63   : > { %p18_p10 = scmp.ge.s32.totalorder %s21_s23, 4  }
 0xc65   :  { %20 = sbr.rel (!%p18_p10) target bundleno = 16 (0x10), region = 90 }

</bundles_post_ra>
